<compile_context>
chip_gen: v6e
topology: v6e:2x2x1
jax: 0.10.0
libtpu: 0.0.40
codegen_flags: <defaults>
</compile_context>

<pallas_src>
import numpy as np
import jax
import jax.numpy as jnp
from jax import lax
from jax.experimental import pallas as pl
from jax.experimental.pallas import tpu as pltpu

H = W = 7
HW = H * W                 # 49 spatial positions
C_IN = 1248
C_MID = 192
C_OUT = 48
NTAP = 9
OUT_PAD = 128              # lane-dense output width (wrapper slices [:, :48])
EPS = 1e-5

TAPS = tuple((dy, dx) for dy in (-1, 0, 1) for dx in (-1, 0, 1))
TAP_SHIFTS = tuple(W * dy + dx for dy, dx in TAPS)   # (-8,-7,-6,-1,0,1,6,7,8)
CENTER = TAPS.index((0, 0))                          # tap 4, shift 0


def _round_up(v, m):
    return (v + m - 1) // m * m


def pick_k_steps():
    """2-step K pipelining only pays off on v5e; newer chips prefer 1 step."""
    try:
        kind = jax.devices()[0].device_kind.lower()
    except Exception:
        return 1
    if "v5 lite" in kind or "v5e" in kind or "v5litepod" in kind:
        return 2
    return 1


def channel_pad_for(k_steps):
    """No pad for a single full-K block; pad to a 128*k multiple otherwise."""
    return C_IN if k_steps == 1 else _round_up(C_IN, 128 * k_steps)


def _tap_row_mask():
    """(HW, 9*48) source-row validity mask with the per-tap row shift folded in.

    mask[q, tap*48:(tap+1)*48] = 1 iff destination row r = q - shift(tap) is in
    [0, 48] and the 3x3 tap (dy, dx) stays inside the 7x7 image at row r.
    """
    m = np.zeros((HW, NTAP * C_OUT), np.float32)
    for t, (dy, dx) in enumerate(TAPS):
        s = W * dy + dx
        for q in range(HW):
            r = q - s
            if 0 <= r < HW:
                ry, rx = divmod(r, W)
                if 0 <= ry + dy < H and 0 <= rx + dx < W:
                    m[q, t * C_OUT:(t + 1) * C_OUT] = 1.0
    return m


# ---------------------------------------------------------------------------
# kernel pieces
# ---------------------------------------------------------------------------
def _bn1_relu_conv1x1(x_ref, g1_ref, b1_ref, w1_ref):
    """BN1 (batch stats, two-pass var) + ReLU + partial 1x1 conv (bf16 MXU)."""
    x = x_ref[...]                                           # (49, Ck) f32
    mean = jnp.sum(x, axis=0, keepdims=True) * (1.0 / HW)
    xc = x - mean
    var = jnp.sum(xc * xc, axis=0, keepdims=True) * (1.0 / HW)
    scale = g1_ref[...] * lax.rsqrt(var + EPS)
    h = jnp.maximum(xc * scale + b1_ref[...], 0.0).astype(jnp.bfloat16)
    return jnp.dot(h, w1_ref[...], preferred_element_type=jnp.float32)


def _bn2_relu_conv3x3(y, g2_ref, b2_ref, w2_ref, mask_ref, out_ref):
    """BN2+ReLU, one (49,192)x(192,432) all-tap matmul, mask + slice-add epilogue."""
    mean2 = jnp.sum(y, axis=0, keepdims=True) * (1.0 / HW)   # y: (49, 192) f32
    yc = y - mean2
    var2 = jnp.sum(yc * yc, axis=0, keepdims=True) * (1.0 / HW)
    scale2 = g2_ref[...] * lax.rsqrt(var2 + EPS)
    h2 = jnp.maximum(yc * scale2 + b2_ref[...], 0.0).astype(jnp.bfloat16)

    yy = jnp.dot(h2, w2_ref[...], preferred_element_type=jnp.float32)  # (49, 432)
    yy = yy * mask_ref[...]        # ONE lane-dense mul folds all tap row masks

    # lane-dense output slab: zero once (full-lane store), then accumulate taps
    out_ref[...] = jnp.zeros((HW, OUT_PAD), jnp.float32)
    lo = CENTER * C_OUT
    out_ref[:, 0:C_OUT] = yy[:, lo:lo + C_OUT]               # center tap, shift 0
    for t, s in enumerate(TAP_SHIFTS):
        if s == 0:
            continue
        lo = t * C_OUT
        if s > 0:
            # dst rows [0, HW-s) read src rows [s, HW); wrapped rows are masked out
            out_ref[0:HW - s, 0:C_OUT] += yy[s:HW, lo:lo + C_OUT]
        else:
            out_ref[-s:HW, 0:C_OUT] += yy[0:HW + s, lo:lo + C_OUT]


def _kernel_single(x_ref, g1_ref, b1_ref, w1_ref, g2_ref, b2_ref, w2_ref,
                   mask_ref, out_ref):
    y = _bn1_relu_conv1x1(x_ref, g1_ref, b1_ref, w1_ref)
    _bn2_relu_conv3x3(y, g2_ref, b2_ref, w2_ref, mask_ref, out_ref)


def _kernel_multi(x_ref, g1_ref, b1_ref, w1_ref, g2_ref, b2_ref, w2_ref,
                  mask_ref, out_ref, acc_ref):
    k = pl.program_id(0)

    @pl.when(k == 0)
    def _init():
        acc_ref[...] = jnp.zeros_like(acc_ref)

    acc_ref[...] += _bn1_relu_conv1x1(x_ref, g1_ref, b1_ref, w1_ref)

    @pl.when(k == pl.num_programs(0) - 1)
    def _finalize():
        _bn2_relu_conv3x3(acc_ref[...], g2_ref, b2_ref, w2_ref, mask_ref, out_ref)


# ---------------------------------------------------------------------------
# host-side wrappers
# ---------------------------------------------------------------------------
def prepare_params(g1, b1, w1_oihw, g2, b2, w2_oihw, k_steps):
    """One-time weight layout transforms / padding / bf16 casts (hoisted)."""
    c_pad = channel_pad_for(k_steps)
    g1p = jnp.pad(g1, (0, c_pad - C_IN)).reshape(1, c_pad).astype(jnp.float32)
    b1p = jnp.pad(b1, (0, c_pad - C_IN)).reshape(1, c_pad).astype(jnp.float32)
    w1 = jnp.transpose(w1_oihw[:, :, 0, 0], (1, 0))                   # (1248, 192)
    w1p = jnp.pad(w1, ((0, c_pad - C_IN), (0, 0))).astype(jnp.bfloat16)
    g2r = g2.reshape(1, C_MID).astype(jnp.float32)
    b2r = b2.reshape(1, C_MID).astype(jnp.float32)
    # OIHW -> (Cin, ky, kx, Cout) -> (Cin, 9*Cout); column block t = tap ky*3+kx
    w2p = jnp.transpose(w2_oihw, (1, 2, 3, 0)).reshape(C_MID, NTAP * C_OUT)
    w2p = w2p.astype(jnp.bfloat16)
    maskp = jnp.asarray(_tap_row_mask())                              # (49, 432) f32
    return g1p, b1p, w1p, g2r, b2r, w2p, maskp


def make_forward(k_steps):
    c_pad = channel_pad_for(k_steps)
    ck = c_pad // k_steps

    if k_steps == 1:
        kernel = _kernel_single
        scratch = []
    else:
        kernel = _kernel_multi
        scratch = [pltpu.VMEM((HW, C_MID), jnp.float32)]   # resident f32 1x1 acc

    grid_spec = pltpu.PrefetchScalarGridSpec(
        num_scalar_prefetch=0,
        grid=(k_steps,),
        in_specs=[
            pl.BlockSpec((HW, ck), lambda k: (0, k)),               # x cols
            pl.BlockSpec((1, ck), lambda k: (0, k)),                # gamma1
            pl.BlockSpec((1, ck), lambda k: (0, k)),                # beta1
            pl.BlockSpec((ck, C_MID), lambda k: (k, 0)),            # w1 rows
            pl.BlockSpec((1, C_MID), lambda k: (0, 0)),             # gamma2
            pl.BlockSpec((1, C_MID), lambda k: (0, 0)),             # beta2
            pl.BlockSpec((C_MID, NTAP * C_OUT), lambda k: (0, 0)),  # w2 fused taps
            pl.BlockSpec((HW, NTAP * C_OUT), lambda k: (0, 0)),     # tap row mask
        ],
        out_specs=pl.BlockSpec((HW, OUT_PAD), lambda k: (0, 0)),
        scratch_shapes=scratch,
    )

    call = pl.pallas_call(
        kernel,
        out_shape=jax.ShapeDtypeStruct((HW, OUT_PAD), jnp.float32),
        grid_spec=grid_spec,
        compiler_params=pltpu.CompilerParams(
            dimension_semantics=("arbitrary",)),
    )

    @jax.jit
    def forward(x_nchw, g1p, b1p, w1p, g2r, b2r, w2p, maskp):
        # Single fused XLA copy: NCHW -> lane-dense (HW, C) (+ channel pad on v5e).
        x2d = jnp.transpose(x_nchw, (0, 2, 3, 1)).reshape(HW, C_IN)
        if c_pad != C_IN:
            x2d = jnp.pad(x2d, ((0, 0), (0, c_pad - C_IN)))
        out2d = call(x2d, g1p, b1p, w1p, g2r, b2r, w2p, maskp)
        # slice off the lane padding; fuses with the tiny (9 KB) NCHW transpose
        return jnp.transpose(out2d[:, :C_OUT].reshape(1, H, W, C_OUT), (0, 3, 1, 2))

    return forward


def reference(x_nchw, g1, b1, w1_oihw, g2, b2, w2_oihw):
    def bn_relu(x, g, b):
        m = x.mean(axis=(0, 2, 3), keepdims=True)
        v = ((x - m) ** 2).mean(axis=(0, 2, 3), keepdims=True)
        return jnp.maximum((x - m) / jnp.sqrt(v + EPS) * g.reshape(1, -1, 1, 1)
                           + b.reshape(1, -1, 1, 1), 0.0)

    h = bn_relu(x_nchw, g1, b1)
    y = lax.conv_general_dilated(h, w1_oihw, (1, 1), 'VALID',
                                 dimension_numbers=('NCHW', 'OIHW', 'NCHW'))
    h2 = bn_relu(y, g2, b2)
    return lax.conv_general_dilated(h2, w2_oihw, (1, 1), ((1, 1), (1, 1)),
                                    dimension_numbers=('NCHW', 'OIHW', 'NCHW'))


if __name__ == "__main__":
    k_steps = pick_k_steps()

    key = jax.random.PRNGKey(0)
    kx, kg1, kb1, kw1, kg2, kb2, kw2 = jax.random.split(key, 7)

    # Deterministic parameter init (shapes from the PyTorch module __init__).
    x = jax.random.normal(kx, (1, C_IN, H, W), jnp.float32)
    g1 = 1.0 + 0.1 * jax.random.normal(kg1, (C_IN,), jnp.float32)
    b1 = 0.1 * jax.random.normal(kb1, (C_IN,), jnp.float32)
    w1 = jax.random.normal(kw1, (C_MID, C_IN, 1, 1), jnp.float32) / np.sqrt(C_IN)
    g2 = 1.0 + 0.1 * jax.random.normal(kg2, (C_MID,), jnp.float32)
    b2 = 0.1 * jax.random.normal(kb2, (C_MID,), jnp.float32)
    w2 = jax.random.normal(kw2, (C_OUT, C_MID, 3, 3), jnp.float32) / np.sqrt(C_MID * 9)

    # One-time layout prep (hoisted out of the per-call path), then run.
    params = jax.block_until_ready(prepare_params(g1, b1, w1, g2, b2, w2, k_steps))
    forward = make_forward(k_steps)
    out = jax.block_until_ready(forward(x, *params))
    ref = jax.block_until_ready(reference(x, g1, b1, w1, g2, b2, w2))

    assert out.shape == (1, C_OUT, H, W), out.shape
    # bf16 MXU operands (f32 accumulation) -> widen the gate vs a pure-f32 run.
    if not np.allclose(np.asarray(out), np.asarray(ref), rtol=1e-2, atol=1e-2):
        err = float(np.max(np.abs(np.asarray(out) - np.asarray(ref))))
        raise AssertionError(f"Pallas kernel does not match reference (max abs err {err})")
    print("KERNEL_OK")
</pallas_src>

<mosaic_0001>
module attributes {stable_mosaic.version = 11 : i64} {
  func.func @_kernel_single(%arg0: i32, %arg1: memref<49x1248xf32, #tpu.memory_space<vmem>>, %arg2: memref<1x1248xf32, #tpu.memory_space<vmem>>, %arg3: memref<1x1248xf32, #tpu.memory_space<vmem>>, %arg4: memref<1248x192xbf16, #tpu.memory_space<vmem>>, %arg5: memref<1x192xf32, #tpu.memory_space<vmem>>, %arg6: memref<1x192xf32, #tpu.memory_space<vmem>>, %arg7: memref<192x432xbf16, #tpu.memory_space<vmem>>, %arg8: memref<49x432xf32, #tpu.memory_space<vmem>>, %arg9: memref<49x128xf32, #tpu.memory_space<vmem>>) attributes {dimension_semantics = [#tpu.dimension_semantics<arbitrary>], iteration_bounds = array<i64: 1>, scalar_prefetch = 0 : i64, scratch_operands = 0 : i64, tpu.core_type = #tpu.core_type<tc>, window_params = [{transform_indices = @transform_0, window_bounds = array<i64: 49, 1248>}, {transform_indices = @transform_1, window_bounds = array<i64: 1, 1248>}, {transform_indices = @transform_2, window_bounds = array<i64: 1, 1248>}, {transform_indices = @transform_3, window_bounds = array<i64: 1248, 192>}, {pipeline_mode = #tpu.pipeline_mode<synchronous>, transform_indices = @transform_4, window_bounds = array<i64: 1, 192>}, {pipeline_mode = #tpu.pipeline_mode<synchronous>, transform_indices = @transform_5, window_bounds = array<i64: 1, 192>}, {pipeline_mode = #tpu.pipeline_mode<synchronous>, transform_indices = @transform_6, window_bounds = array<i64: 192, 432>}, {pipeline_mode = #tpu.pipeline_mode<synchronous>, transform_indices = @transform_7, window_bounds = array<i64: 49, 432>}, {pipeline_mode = #tpu.pipeline_mode<synchronous>, transform_indices = @transform_8, window_bounds = array<i64: 49, 128>}]} {
    %c0 = arith.constant 0 : index
    %c0_0 = arith.constant 0 : index
    %0 = vector.load %arg1[%c0, %c0_0] : memref<49x1248xf32, #tpu.memory_space<vmem>>, vector<49x1248xf32>
    %cst = arith.constant dense<0.000000e+00> : vector<1248xf32>
    %1 = vector.multi_reduction <add>, %0, %cst [0] : vector<49x1248xf32> to vector<1248xf32>
    %2 = vector.shape_cast %1 : vector<1248xf32> to vector<1x1248xf32>
    %cst_1 = arith.constant 0.0204081628 : f32
    %3 = vector.broadcast %cst_1 : f32 to vector<1x1248xf32>
    %4 = arith.mulf %2, %3 : vector<1x1248xf32>
    %5 = vector.broadcast %4 : vector<1x1248xf32> to vector<49x1248xf32>
    %6 = arith.subf %0, %5 : vector<49x1248xf32>
    %7 = arith.mulf %6, %6 : vector<49x1248xf32>
    %cst_2 = arith.constant dense<0.000000e+00> : vector<1248xf32>
    %8 = vector.multi_reduction <add>, %7, %cst_2 [0] : vector<49x1248xf32> to vector<1248xf32>
    %9 = vector.shape_cast %8 : vector<1248xf32> to vector<1x1248xf32>
    %cst_3 = arith.constant 0.0204081628 : f32
    %10 = vector.broadcast %cst_3 : f32 to vector<1x1248xf32>
    %11 = arith.mulf %9, %10 : vector<1x1248xf32>
    %c0_4 = arith.constant 0 : index
    %c0_5 = arith.constant 0 : index
    %12 = vector.load %arg2[%c0_4, %c0_5] : memref<1x1248xf32, #tpu.memory_space<vmem>>, vector<1x1248xf32>
    %cst_6 = arith.constant 9.99999974E-6 : f32
    %13 = vector.broadcast %cst_6 : f32 to vector<1x1248xf32>
    %14 = arith.addf %11, %13 : vector<1x1248xf32>
    %15 = math.rsqrt %14 : vector<1x1248xf32>
    %16 = arith.mulf %12, %15 : vector<1x1248xf32>
    %17 = vector.broadcast %16 : vector<1x1248xf32> to vector<49x1248xf32>
    %18 = arith.mulf %6, %17 : vector<49x1248xf32>
    %c0_7 = arith.constant 0 : index
    %c0_8 = arith.constant 0 : index
    %19 = vector.load %arg3[%c0_7, %c0_8] : memref<1x1248xf32, #tpu.memory_space<vmem>>, vector<1x1248xf32>
    %20 = vector.broadcast %19 : vector<1x1248xf32> to vector<49x1248xf32>
    %21 = arith.addf %18, %20 : vector<49x1248xf32>
    %cst_9 = arith.constant 0.000000e+00 : f32
    %22 = vector.broadcast %cst_9 : f32 to vector<49x1248xf32>
    %23 = arith.maximumf %21, %22 : vector<49x1248xf32>
    %24 = arith.truncf %23 : vector<49x1248xf32> to vector<49x1248xbf16>
    %c0_10 = arith.constant 0 : index
    %c0_11 = arith.constant 0 : index
    %25 = vector.load %arg4[%c0_10, %c0_11] : memref<1248x192xbf16, #tpu.memory_space<vmem>>, vector<1248x192xbf16>
    %cst_12 = arith.constant dense<0.000000e+00> : vector<49x192xf32>
    %26 = tpu.matmul %24, %25, %cst_12 {dimension_numbers = #tpu.dot_dimension_numbers<[1], [0], [0], [1], [0, 0, 1, 1], [], []>} : vector<49x1248xbf16>, vector<1248x192xbf16>, vector<49x192xf32> -> vector<49x192xf32>
    %cst_13 = arith.constant dense<0.000000e+00> : vector<192xf32>
    %27 = vector.multi_reduction <add>, %26, %cst_13 [0] : vector<49x192xf32> to vector<192xf32>
    %28 = vector.shape_cast %27 : vector<192xf32> to vector<1x192xf32>
    %cst_14 = arith.constant 0.0204081628 : f32
    %29 = vector.broadcast %cst_14 : f32 to vector<1x192xf32>
    %30 = arith.mulf %28, %29 : vector<1x192xf32>
    %31 = vector.broadcast %30 : vector<1x192xf32> to vector<49x192xf32>
    %32 = arith.subf %26, %31 : vector<49x192xf32>
    %33 = arith.mulf %32, %32 : vector<49x192xf32>
    %cst_15 = arith.constant dense<0.000000e+00> : vector<192xf32>
    %34 = vector.multi_reduction <add>, %33, %cst_15 [0] : vector<49x192xf32> to vector<192xf32>
    %35 = vector.shape_cast %34 : vector<192xf32> to vector<1x192xf32>
    %cst_16 = arith.constant 0.0204081628 : f32
    %36 = vector.broadcast %cst_16 : f32 to vector<1x192xf32>
    %37 = arith.mulf %35, %36 : vector<1x192xf32>
    %c0_17 = arith.constant 0 : index
    %c0_18 = arith.constant 0 : index
    %38 = vector.load %arg5[%c0_17, %c0_18] : memref<1x192xf32, #tpu.memory_space<vmem>>, vector<1x192xf32>
    %cst_19 = arith.constant 9.99999974E-6 : f32
    %39 = vector.broadcast %cst_19 : f32 to vector<1x192xf32>
    %40 = arith.addf %37, %39 : vector<1x192xf32>
    %41 = math.rsqrt %40 : vector<1x192xf32>
    %42 = arith.mulf %38, %41 : vector<1x192xf32>
    %43 = vector.broadcast %42 : vector<1x192xf32> to vector<49x192xf32>
    %44 = arith.mulf %32, %43 : vector<49x192xf32>
    %c0_20 = arith.constant 0 : index
    %c0_21 = arith.constant 0 : index
    %45 = vector.load %arg6[%c0_20, %c0_21] : memref<1x192xf32, #tpu.memory_space<vmem>>, vector<1x192xf32>
    %46 = vector.broadcast %45 : vector<1x192xf32> to vector<49x192xf32>
    %47 = arith.addf %44, %46 : vector<49x192xf32>
    %cst_22 = arith.constant 0.000000e+00 : f32
    %48 = vector.broadcast %cst_22 : f32 to vector<49x192xf32>
    %49 = arith.maximumf %47, %48 : vector<49x192xf32>
    %50 = arith.truncf %49 : vector<49x192xf32> to vector<49x192xbf16>
    %c0_23 = arith.constant 0 : index
    %c0_24 = arith.constant 0 : index
    %51 = vector.load %arg7[%c0_23, %c0_24] : memref<192x432xbf16, #tpu.memory_space<vmem>>, vector<192x432xbf16>
    %cst_25 = arith.constant dense<0.000000e+00> : vector<49x432xf32>
    %52 = tpu.matmul %50, %51, %cst_25 {dimension_numbers = #tpu.dot_dimension_numbers<[1], [0], [0], [1], [0, 0, 1, 1], [], []>} : vector<49x192xbf16>, vector<192x432xbf16>, vector<49x432xf32> -> vector<49x432xf32>
    %c0_26 = arith.constant 0 : index
    %c0_27 = arith.constant 0 : index
    %53 = vector.load %arg8[%c0_26, %c0_27] : memref<49x432xf32, #tpu.memory_space<vmem>>, vector<49x432xf32>
    %54 = arith.mulf %52, %53 : vector<49x432xf32>
    %cst_28 = arith.constant 0.000000e+00 : f32
    %55 = vector.broadcast %cst_28 : f32 to vector<49x128xf32>
    %c0_29 = arith.constant 0 : index
    %c0_30 = arith.constant 0 : index
    %56 = vector.load %arg9[%c0_29, %c0_30] : memref<49x128xf32, #tpu.memory_space<vmem>>, vector<49x128xf32>
    tpu.vector_store %arg9[%c0_29, %c0_30], %55 {strides = array<i32>} : memref<49x128xf32, #tpu.memory_space<vmem>>, vector<49x128xf32>,
    %57 = vector.extract_strided_slice %54 {offsets = [0, 192], sizes = [49, 48], strides = [1, 1]} : vector<49x432xf32> to vector<49x48xf32>
    %c0_31 = arith.constant 0 : index
    %c0_32 = arith.constant 0 : index
    %58 = vector.load %arg9[%c0_31, %c0_32] : memref<49x128xf32, #tpu.memory_space<vmem>>, vector<49x48xf32>
    tpu.vector_store %arg9[%c0_31, %c0_32], %57 {strides = array<i32>} : memref<49x128xf32, #tpu.memory_space<vmem>>, vector<49x48xf32>,
    %c8 = arith.constant 8 : index
    %c0_33 = arith.constant 0 : index
    %59 = vector.load %arg9[%c8, %c0_33] : memref<49x128xf32, #tpu.memory_space<vmem>>, vector<41x48xf32>
    %60 = vector.extract_strided_slice %54 {offsets = [0, 0], sizes = [41, 48], strides = [1, 1]} : vector<49x432xf32> to vector<41x48xf32>
    %61 = arith.addf %59, %60 : vector<41x48xf32>
    %c8_34 = arith.constant 8 : index
    %c0_35 = arith.constant 0 : index
    %62 = vector.load %arg9[%c8_34, %c0_35] : memref<49x128xf32, #tpu.memory_space<vmem>>, vector<41x48xf32>
    tpu.vector_store %arg9[%c8_34, %c0_35], %61 {strides = array<i32>} : memref<49x128xf32, #tpu.memory_space<vmem>>, vector<41x48xf32>,
    %c7 = arith.constant 7 : index
    %c0_36 = arith.constant 0 : index
    %63 = vector.load %arg9[%c7, %c0_36] : memref<49x128xf32, #tpu.memory_space<vmem>>, vector<42x48xf32>
    %64 = vector.extract_strided_slice %54 {offsets = [0, 48], sizes = [42, 48], strides = [1, 1]} : vector<49x432xf32> to vector<42x48xf32>
    %65 = arith.addf %63, %64 : vector<42x48xf32>
    %c7_37 = arith.constant 7 : index
    %c0_38 = arith.constant 0 : index
    %66 = vector.load %arg9[%c7_37, %c0_38] : memref<49x128xf32, #tpu.memory_space<vmem>>, vector<42x48xf32>
    tpu.vector_store %arg9[%c7_37, %c0_38], %65 {strides = array<i32>} : memref<49x128xf32, #tpu.memory_space<vmem>>, vector<42x48xf32>,
    %c6 = arith.constant 6 : index
    %c0_39 = arith.constant 0 : index
    %67 = vector.load %arg9[%c6, %c0_39] : memref<49x128xf32, #tpu.memory_space<vmem>>, vector<43x48xf32>
    %68 = vector.extract_strided_slice %54 {offsets = [0, 96], sizes = [43, 48], strides = [1, 1]} : vector<49x432xf32> to vector<43x48xf32>
    %69 = arith.addf %67, %68 : vector<43x48xf32>
    %c6_40 = arith.constant 6 : index
    %c0_41 = arith.constant 0 : index
    %70 = vector.load %arg9[%c6_40, %c0_41] : memref<49x128xf32, #tpu.memory_space<vmem>>, vector<43x48xf32>
    tpu.vector_store %arg9[%c6_40, %c0_41], %69 {strides = array<i32>} : memref<49x128xf32, #tpu.memory_space<vmem>>, vector<43x48xf32>,
    %c1 = arith.constant 1 : index
    %c0_42 = arith.constant 0 : index
    %71 = vector.load %arg9[%c1, %c0_42] : memref<49x128xf32, #tpu.memory_space<vmem>>, vector<48x48xf32>
    %72 = vector.extract_strided_slice %54 {offsets = [0, 144], sizes = [48, 48], strides = [1, 1]} : vector<49x432xf32> to vector<48x48xf32>
    %73 = arith.addf %71, %72 : vector<48x48xf32>
    %c1_43 = arith.constant 1 : index
    %c0_44 = arith.constant 0 : index
    %74 = vector.load %arg9[%c1_43, %c0_44] : memref<49x128xf32, #tpu.memory_space<vmem>>, vector<48x48xf32>
    tpu.vector_store %arg9[%c1_43, %c0_44], %73 {strides = array<i32>} : memref<49x128xf32, #tpu.memory_space<vmem>>, vector<48x48xf32>,
    %c0_45 = arith.constant 0 : index
    %c0_46 = arith.constant 0 : index
    %75 = vector.load %arg9[%c0_45, %c0_46] : memref<49x128xf32, #tpu.memory_space<vmem>>, vector<48x48xf32>
    %76 = vector.extract_strided_slice %54 {offsets = [1, 240], sizes = [48, 48], strides = [1, 1]} : vector<49x432xf32> to vector<48x48xf32>
    %77 = arith.addf %75, %76 : vector<48x48xf32>
    %c0_47 = arith.constant 0 : index
    %c0_48 = arith.constant 0 : index
    %78 = vector.load %arg9[%c0_47, %c0_48] : memref<49x128xf32, #tpu.memory_space<vmem>>, vector<48x48xf32>
    tpu.vector_store %arg9[%c0_47, %c0_48], %77 {strides = array<i32>} : memref<49x128xf32, #tpu.memory_space<vmem>>, vector<48x48xf32>,
    %c0_49 = arith.constant 0 : index
    %c0_50 = arith.constant 0 : index
    %79 = vector.load %arg9[%c0_49, %c0_50] : memref<49x128xf32, #tpu.memory_space<vmem>>, vector<43x48xf32>
    %80 = vector.extract_strided_slice %54 {offsets = [6, 288], sizes = [43, 48], strides = [1, 1]} : vector<49x432xf32> to vector<43x48xf32>
    %81 = arith.addf %79, %80 : vector<43x48xf32>
    %c0_51 = arith.constant 0 : index
    %c0_52 = arith.constant 0 : index
    %82 = vector.load %arg9[%c0_51, %c0_52] : memref<49x128xf32, #tpu.memory_space<vmem>>, vector<43x48xf32>
    tpu.vector_store %arg9[%c0_51, %c0_52], %81 {strides = array<i32>} : memref<49x128xf32, #tpu.memory_space<vmem>>, vector<43x48xf32>,
    %c0_53 = arith.constant 0 : index
    %c0_54 = arith.constant 0 : index
    %83 = vector.load %arg9[%c0_53, %c0_54] : memref<49x128xf32, #tpu.memory_space<vmem>>, vector<42x48xf32>
    %84 = vector.extract_strided_slice %54 {offsets = [7, 336], sizes = [42, 48], strides = [1, 1]} : vector<49x432xf32> to vector<42x48xf32>
    %85 = arith.addf %83, %84 : vector<42x48xf32>
    %c0_55 = arith.constant 0 : index
    %c0_56 = arith.constant 0 : index
    %86 = vector.load %arg9[%c0_55, %c0_56] : memref<49x128xf32, #tpu.memory_space<vmem>>, vector<42x48xf32>
    tpu.vector_store %arg9[%c0_55, %c0_56], %85 {strides = array<i32>} : memref<49x128xf32, #tpu.memory_space<vmem>>, vector<42x48xf32>,
    %c0_57 = arith.constant 0 : index
    %c0_58 = arith.constant 0 : index
    %87 = vector.load %arg9[%c0_57, %c0_58] : memref<49x128xf32, #tpu.memory_space<vmem>>, vector<41x48xf32>
    %88 = vector.extract_strided_slice %54 {offsets = [8, 384], sizes = [41, 48], strides = [1, 1]} : vector<49x432xf32> to vector<41x48xf32>
    %89 = arith.addf %87, %88 : vector<41x48xf32>
    %c0_59 = arith.constant 0 : index
    %c0_60 = arith.constant 0 : index
    %90 = vector.load %arg9[%c0_59, %c0_60] : memref<49x128xf32, #tpu.memory_space<vmem>>, vector<41x48xf32>
    tpu.vector_store %arg9[%c0_59, %c0_60], %89 {strides = array<i32>} : memref<49x128xf32, #tpu.memory_space<vmem>>, vector<41x48xf32>,
    return
  }
  func.func @transform_0(%arg0: i32) -> (i32, i32) {
    %c0_i32 = arith.constant 0 : i32
    %c0_i32_0 = arith.constant 0 : i32
    return %c0_i32, %arg0 : i32, i32
  }
  func.func @transform_1(%arg0: i32) -> (i32, i32) {
    %c0_i32 = arith.constant 0 : i32
    %c0_i32_0 = arith.constant 0 : i32
    return %c0_i32, %arg0 : i32, i32
  }
  func.func @transform_2(%arg0: i32) -> (i32, i32) {
    %c0_i32 = arith.constant 0 : i32
    %c0_i32_0 = arith.constant 0 : i32
    return %c0_i32, %arg0 : i32, i32
  }
  func.func @transform_3(%arg0: i32) -> (i32, i32) {
    %c0_i32 = arith.constant 0 : i32
    %c0_i32_0 = arith.constant 0 : i32
    return %arg0, %c0_i32 : i32, i32
  }
  func.func @transform_4(%arg0: i32) -> (i32, i32) {
    %c0_i32 = arith.constant 0 : i32
    %c0_i32_0 = arith.constant 0 : i32
    %c0_i32_1 = arith.constant 0 : i32
    return %c0_i32, %c0_i32_0 : i32, i32
  }
  func.func @transform_5(%arg0: i32) -> (i32, i32) {
    %c0_i32 = arith.constant 0 : i32
    %c0_i32_0 = arith.constant 0 : i32
    %c0_i32_1 = arith.constant 0 : i32
    return %c0_i32, %c0_i32_0 : i32, i32
  }
  func.func @transform_6(%arg0: i32) -> (i32, i32) {
    %c0_i32 = arith.constant 0 : i32
    %c0_i32_0 = arith.constant 0 : i32
    %c0_i32_1 = arith.constant 0 : i32
    return %c0_i32, %c0_i32_0 : i32, i32
  }
  func.func @transform_7(%arg0: i32) -> (i32, i32) {
    %c0_i32 = arith.constant 0 : i32
    %c0_i32_0 = arith.constant 0 : i32
    %c0_i32_1 = arith.constant 0 : i32
    return %c0_i32, %c0_i32_0 : i32, i32
  }
  func.func @transform_8(%arg0: i32) -> (i32, i32) {
    %c0_i32 = arith.constant 0 : i32
    %c0_i32_0 = arith.constant 0 : i32
    %c0_i32_1 = arith.constant 0 : i32
    return %c0_i32, %c0_i32_0 : i32, i32
  }
}

</mosaic_0001>

<bundles_post_ra>
// kernel: forward.1
= control target key start
LH: loop header
LB: loop body
LE: loop exit
PB: predicated region body
PF: predicated region fallthrough
CT: control target
= control target key end

     0   :  { %vm105_vm0 = vcmask 1040384   ;;  %vm218_vm1 = vcmask 785408   ;;  %vm230_vm2 = vcmask 778240   ;;  %vm2307_vm3 = vcmask 523264   ;;  %s3969_s23 = smov 80   ;;  %s3971_s26 = smov 32   ;;  %s6806_s3 = inlined_call_operand.vmem [shape: bf16[1248,192], index: 3, kind: input, shape index: {}]   ;;  %s6807_s0 = inlined_call_operand.vmem [shape: f32[49,1248], index: 0, kind: input, shape index: {}]   ;;  %s6808_s1 = inlined_call_operand.vmem [shape: f32[1,1248], index: 1, kind: input, shape index: {}]   ;;  %s6809_s2 = inlined_call_operand.vmem [shape: f32[1,1248], index: 2, kind: input, shape index: {}]   ;;  %s6810_s6 = inlined_call_operand.vmem [shape: bf16[192,432], index: 6, kind: input, shape index: {}]   ;;  %s6811_s4 = inlined_call_operand.vmem [shape: f32[1,192], index: 4, kind: input, shape index: {}]   ;;  %s6812_s5 = inlined_call_operand.vmem [shape: f32[1,192], index: 5, kind: input, shape index: {}]   ;;  %s6813_s8 = inlined_call_operand.vmem [shape: f32[49,128], index: 8, kind: output, shape index: {}]   ;;  %s6814_s7 = inlined_call_operand.vmem [shape: f32[49,432], index: 7, kind: input, shape index: {}]  }
   0x1   :  { %v3637_v0 = vld [vmem:[%s6806_s3 + $0x74] ss:$8 sps:$4 sm:$0xff]   ;;  %v3639_v1 = vld [vmem:[%s6806_s3 + $0x70] ss:$8 sps:$4 sm:$0xff]   ;;  %v3643_v4 = vld [vmem:[%s6806_s3 + $0x64] ss:$8 sps:$4 sm:$0xff]  }
   0x2   :  { %1939 = vmatprep.subr.bf16.mxu0 %v3637_v0  ;;  %v3640_v2 = vld [vmem:[%s6806_s3 + $0x174] ss:$8 sps:$4 sm:$0xff]   ;;  %v3642_v3 = vld [vmem:[%s6806_s3 + $0x170] ss:$8 sps:$4 sm:$0xff]   ;;  %v3645_v5 = vld [vmem:[%s6806_s3 + $0x60] ss:$8 sps:$4 sm:$0xff]  }
   0x3   :  { %1940 = vmatpush1.bf16.msra.mxu0 %v3639_v1  ;;  %2010 = vmatprep.subr.bf16.mxu1 %v3640_v2  ;;  %v3646_v6 = vld [vmem:[%s6806_s3 + $0x164] ss:$8 sps:$4 sm:$0xff]   ;;  %v3648_v7 = vld [vmem:[%s6806_s3 + $0x160] ss:$8 sps:$4 sm:$0xff]   ;;  %v3649_v8 = vld [vmem:[%s6806_s3 + $0x54] ss:$8 sps:$4 sm:$0xff]  }
   0x4   :  { %2011 = vmatpush1.bf16.msra.mxu1 %v3642_v3  ;;  %1941 = vmatprep.subr.bf16.mxu0 %v3643_v4  ;;  %v3651_v9 = vld [vmem:[%s6806_s3 + $0x50] ss:$8 sps:$4 sm:$0xff]   ;;  %v3652_v10 = vld [vmem:[%s6806_s3 + $0x154] ss:$8 sps:$4 sm:$0xff]   ;;  %v3655_v11 = vld [vmem:[%s6806_s3 + $0x44] ss:$8 sps:$4 sm:$0xff]  }
   0x5   :  { %2012 = vmatprep.subr.bf16.mxu1 %v3646_v6  ;;  %v3654_v12 = vld [vmem:[%s6806_s3 + $0x150] ss:$8 sps:$4 sm:$0xff]   ;;  %v3658_v13 = vld [vmem:[%s6806_s3 + $0x144] ss:$8 sps:$4 sm:$0xff]   ;;  %v3657_v14 = vld [vmem:[%s6806_s3 + $0x40] ss:$8 sps:$4 sm:$0xff]  }
   0x6   :  { %v3661_v15 = vld [vmem:[%s6806_s3 + $0x34] ss:$8 sps:$4 sm:$0xff]   ;;  %v3660_v16 = vld [vmem:[%s6806_s3 + $0x140] ss:$8 sps:$4 sm:$0xff]   ;;  %v3663_v18 = vld [vmem:[%s6806_s3 + $0x30] ss:$8 sps:$4 sm:$0xff]  }
   0x7   :  { %1942 = vmatpush1.bf16.msra.mxu0 %v3645_v5  ;;  %v3664_v17 = vld [vmem:[%s6806_s3 + $0x134] ss:$8 sps:$4 sm:$0xff]   ;;  %v3667_v19 = vld [vmem:[%s6806_s3 + $0x24] ss:$8 sps:$4 sm:$0xff]   ;;  %v3666_v20 = vld [vmem:[%s6806_s3 + $0x130] ss:$8 sps:$4 sm:$0xff]  }
   0x8   :  { %1943 = vmatprep.subr.bf16.mxu0 %v3649_v8  ;;  %2013 = vmatpush1.bf16.msra.mxu1 %v3648_v7  ;;  %v3670_v21 = vld [vmem:[%s6806_s3 + $0x124] ss:$8 sps:$4 sm:$0xff]   ;;  %v3669_v22 = vld [vmem:[%s6806_s3 + $0x20] ss:$8 sps:$4 sm:$0xff]   ;;  %v3673_v23 = vld [vmem:[%s6806_s3 + $0x14] ss:$8 sps:$4 sm:$0xff]  }
   0x9   :  { %2014 = vmatprep.subr.bf16.mxu1 %v3652_v10  ;;  %v3672_v24 = vld [vmem:[%s6806_s3 + $0x120] ss:$8 sps:$4 sm:$0xff]   ;;  %v3676_v25 = vld [vmem:[%s6806_s3 + $0x114] ss:$8 sps:$4 sm:$0xff]   ;;  %v3675_v26 = vld [vmem:[%s6806_s3 + $0x10] ss:$8 sps:$4 sm:$0xff]  }
   0xa   :  { %v3679_v27 = vld [vmem:[%s6806_s3 + $0x4] ss:$8 sps:$4 sm:$0xff]   ;;  %v3678_v28 = vld [vmem:[%s6806_s3 + $0x110] ss:$8 sps:$4 sm:$0xff]   ;;  %v3681_v30 = vld [vmem:[%s6806_s3] ss:$8 sps:$4 sm:$0xff]  }
   0xb   :  { %1944 = vmatpush1.bf16.msra.mxu0 %v3651_v9  ;;  %v3682_v29 = vld [vmem:[%s6806_s3 + $0x104] ss:$8 sps:$4 sm:$0xff]   ;;  %v3685_v31 = vld [vmem:[%s6806_s3 + $0xf4] ss:$8 sps:$4 sm:$0xff]   ;;  %v3684_v32 = vld [vmem:[%s6806_s3 + $0x100] ss:$8 sps:$4 sm:$0xff]  }
   0xc   :  { %1945 = vmatprep.subr.bf16.mxu0 %v3655_v11  ;;  %2015 = vmatpush1.bf16.msra.mxu1 %v3654_v12  ;;  %v3688_v33 = vld [vmem:[%s6806_s3 + $0x1f4] ss:$8 sps:$4 sm:$0xff]   ;;  %v3687_v34 = vld [vmem:[%s6806_s3 + $0xf0] ss:$8 sps:$4 sm:$0xff]   ;;  %v3691_v35 = vld [vmem:[%s6806_s3 + $0xe4] ss:$8 sps:$4 sm:$0xff]  }
   0xd   :  { %2016 = vmatprep.subr.bf16.mxu1 %v3658_v13  ;;  %v3690_v36 = vld [vmem:[%s6806_s3 + $0x1f0] ss:$8 sps:$4 sm:$0xff]   ;;  %v3694_v37 = vld [vmem:[%s6806_s3 + $0x1e4] ss:$8 sps:$4 sm:$0xff]   ;;  %v3693_v38 = vld [vmem:[%s6806_s3 + $0xe0] ss:$8 sps:$4 sm:$0xff]  }
   0xe   :  { %v3697_v39 = vld [vmem:[%s6806_s3 + $0xd4] ss:$8 sps:$4 sm:$0xff]   ;;  %v3696_v40 = vld [vmem:[%s6806_s3 + $0x1e0] ss:$8 sps:$4 sm:$0xff]   ;;  %v3699_v42 = vld [vmem:[%s6806_s3 + $0xd0] ss:$8 sps:$4 sm:$0xff]  }
   0xf   :  { %1946 = vmatpush1.bf16.msra.mxu0 %v3657_v14  ;;  %v3700_v41 = vld [vmem:[%s6806_s3 + $0x1d4] ss:$8 sps:$4 sm:$0xff]   ;;  %v3702_v43 = vld [vmem:[%s6806_s3 + $0x1d0] ss:$8 sps:$4 sm:$0xff]   ;;  %v3703_v44 = vld [vmem:[%s6806_s3 + $0xc4] ss:$8 sps:$4 sm:$0xff]  }
  0x10   :  { %1947 = vmatprep.subr.bf16.mxu0 %v3661_v15  ;;  %2017 = vmatpush1.bf16.msra.mxu1 %v3660_v16  ;;  %v3705_v45 = vld [vmem:[%s6806_s3 + $0xc0] ss:$8 sps:$4 sm:$0xff]   ;;  %v3706_v46 = vld [vmem:[%s6806_s3 + $0x1c4] ss:$8 sps:$4 sm:$0xff]   ;;  %v3709_v47 = vld [vmem:[%s6806_s3 + $0xb4] ss:$8 sps:$4 sm:$0xff]  }
  0x11   :  { %2018 = vmatprep.subr.bf16.mxu1 %v3664_v17  ;;  %v4168_v48 = vld [vmem:[%s6807_s0] sm:$0xff]  ;;  %v4176_v50 = vld [vmem:[%s6807_s0 + $0x8] sm:$0xff]  ;;  %v4181_v51 = vld [vmem:[%s6807_s0 + $0x10] sm:$0xff]  ;;  %vm2319_vm4 = vcmask 516096   ;;  %s3972_s20 = smov 112   ;;  %vm3191_vm5 = vcmask 1046528  }
  0x12   :  { %v3708_v49 = vld [vmem:[%s6806_s3 + $0x1c0] ss:$8 sps:$4 sm:$0xff]   ;;  %v4186_v52 = vld [vmem:[%s6807_s0 + $0x18] sm:$0xff]  ;;  %v4204_v56 = vld [vmem:[%s6807_s0 + $0x30] sm:$0xff]  ;;  %s3973_s25 = smov 16   ;;  %vm3273_vm6 = vcmask 1041408  }
  0x13   :  { %1948 = vmatpush1.bf16.msra.mxu0 %v3663_v18  ;;  %v3712_v53 = vld [vmem:[%s6806_s3 + $0x1b4] ss:$8 sps:$4 sm:$0xff]   ;;  %v4194_v54 = vld [vmem:[%s6807_s0 + $0x20] sm:$0xff]  ;;  %v4199_v55 = vld [vmem:[%s6807_s0 + $0x28] sm:$0xff]  ;;  %s3975_s10 = smov 48   ;;  %vm3016_vm7 = vcmask 392192  }
  0x14   :  { %1949 = vmatprep.subr.bf16.mxu0 %v3667_v19  ;;  %2019 = vmatpush1.bf16.msra.mxu1 %v3666_v20  ;;  %v3711_v57 = vld [vmem:[%s6806_s3 + $0xb0] ss:$8 sps:$4 sm:$0xff]   ;;  %v3715_v61 = vld [vmem:[%s6806_s3 + $0xa4] ss:$8 sps:$4 sm:$0xff]   ;;  %v3717_v17 = vld [vmem:[%s6806_s3 + $0xa0] ss:$8 sps:$4 sm:$0xff]  }
  0x15   :  { %2020 = vmatprep.subr.bf16.mxu1 %v3670_v21  ;;  %v4212_v58 = vld [vmem:[%s6807_s0 + $0x38] sm:$0xff]  ;;  %v4217_v59 = vld [vmem:[%s6807_s0 + $0x50] sm:$0xff]  ;;  %v4230_v62 = vld [vmem:[%s6807_s0 + $0x60] sm:$0xff]  ;;  %vm3023_vm8 = vcmask 385024   ;;  %vm3116_vm9 = vcmask 261120   ;;  %vm3084_vm10 = vcmask 386048  }
  0x16   :  { %v4222_v60 = vld [vmem:[%s6807_s0 + $0x58] sm:$0xff]  ;;  %v4235_v63 = vld [vmem:[%s6807_s0 + $0x68] sm:$0xff]  ;;  %v4240_v0 = vld [vmem:[%s6807_s0 + $0x70] sm:$0xff]  ;;  %v100_v1 = vadd.f32 %v4217_v59, %v4168_v48  ;;  %v127_v7 = vadd.f32 %v4230_v62, %v4181_v51  ;;  %vm3242_vm11 = vcmask 130048   ;;  %vm3140_vm12 = vcmask 387072  }
  0x17   :  { %1950 = vmatpush1.bf16.msra.mxu0 %v3669_v22  ;;  %v114_v2 = vadd.f32 %v4222_v60, %v4176_v50  ;;  %v3714_v3 = vld [vmem:[%s6806_s3 + $0x1b0] ss:$8 sps:$4 sm:$0xff]   ;;  %v4257_v5 = vld [vmem:[%s6807_s0 + $0x80] sm:$0xff]  ;;  %v4262_v6 = vld [vmem:[%s6807_s0 + $0x88] sm:$0xff]  ;;  %v140_v8 = vadd.f32 %v4235_v63, %v4186_v52  ;;  %v153_v9 = vadd.f32 %v4240_v0, %v4194_v54 }
  0x18   :  { %1951 = vmatprep.subr.bf16.mxu0 %v3673_v23  ;;  %2021 = vmatpush1.bf16.msra.mxu1 %v3672_v24  ;;  %v4252_v4 = vld [vmem:[%s6807_s0 + $0x78] sm:$0xff]  ;;  %v3718_v10 = vld [vmem:[%s6806_s3 + $0x1a4] ss:$8 sps:$4 sm:$0xff]   ;;  %v4286_v13 = vld [vmem:[%s6807_s0 + $0xb0] sm:$0xff]  ;;  %v179_v15 = vadd.f32 %v4257_v5, %v4204_v56  ;;  %v192_v16 = vadd.f32 %v4262_v6, %v4212_v58 }
  0x19   :  { %2022 = vmatprep.subr.bf16.mxu1 %v3676_v25  ;;  %v4276_v11 = vld [vmem:[%s6807_s0 + $0xa0] sm:$0xff]  ;;  %v4281_v12 = vld [vmem:[%s6807_s0 + $0xa8] sm:$0xff]  ;;  %v166_v14 = vadd.f32 %v4252_v4, %v4199_v55  ;;  %v4300_v18 = vld [vmem:[%s6807_s0 + $0xb8] sm:$0xff]  ;;  %v128_v23 = vadd.f32 %v127_v7, %v4286_v13 }
  0x1a   :  { %v4305_v19 = vld [vmem:[%s6807_s0 + $0xc0] sm:$0xff]  ;;  %v4310_v20 = vld [vmem:[%s6807_s0 + $0xc8] sm:$0xff]  ;;  %v101_v21 = vadd.f32 %v100_v1, %v4276_v11  ;;  %v115_v22 = vadd.f32 %v114_v2, %v4281_v12  ;;  %v3721_v24 = vld [vmem:[%s6806_s3 + $0x94] ss:$8 sps:$4 sm:$0xff]  }
  0x1b   :  { %1952 = vmatpush1.bf16.msra.mxu0 %v3675_v26  ;;  %v4321_v25 = vld [vmem:[%s6807_s0 + $0xd0] sm:$0xff]  ;;  %v4326_v26 = vld [vmem:[%s6807_s0 + $0xd8] sm:$0xff]  ;;  %v3727_v1 = vld [vmem:[%s6806_s3 + $0x84] ss:$8 sps:$4 sm:$0xff]  }
  0x1c   :  { %1953 = vmatprep.subr.bf16.mxu0 %v3679_v27  ;;  %2023 = vmatpush1.bf16.msra.mxu1 %v3678_v28  ;;  %v4331_v27 = vld [vmem:[%s6807_s0 + $0xf0] sm:$0xff]  ;;  %v141_v28 = vadd.f32 %v140_v8, %v4300_v18  ;;  %v4415_v7 = vld [vmem:[%s6807_s0 + $0x160] sm:$0xff] }
  0x1d   :  { %2024 = vmatprep.subr.bf16.mxu1 %v3682_v29  ;;  %v154_v29 = vadd.f32 %v153_v9, %v4305_v19  ;;  %v4405_v2 = vld [vmem:[%s6807_s0 + $0x150] sm:$0xff]  ;;  %6908 = vst [vmem:[#allocation10_spill] sm:$0xff] %v4415_v7 }
  0x1e   :  { %6906 = vst [vmem:[#allocation8_spill] sm:$0xff] %v4405_v2 }
  0x1f   :  { %1954 = vmatpush1.bf16.msra.mxu0 %v3681_v30  ;;  %v167_v30 = vadd.f32 %v166_v14, %v4310_v20  ;;  %v3726_v14 = vld [vmem:[%s6806_s3 + $0x190] ss:$8 sps:$4 sm:$0xff]  }
  0x20   :  { %1955 = vmatprep.subr.bf16.mxu0 %v3685_v31  ;;  %2025 = vmatpush1.bf16.msra.mxu1 %v3684_v32  ;;  %v3720_v31 = vld [vmem:[%s6806_s3 + $0x1a0] ss:$8 sps:$4 sm:$0xff]   ;;  %v4342_v32 = vld [vmem:[%s6807_s0 + $0xf8] sm:$0xff] }
  0x21   :  { %2026 = vmatprep.subr.bf16.mxu1 %v3688_v33  ;;  %v4347_v33 = vld [vmem:[%s6807_s0 + $0x100] sm:$0xff] }
  0x23   :  { %1956 = vmatpush2.bf16.msra.mxu0 %v3687_v34  ;;  %v4352_v34 = vld [vmem:[%s6807_s0 + $0x108] sm:$0xff] }
  0x24   :  { %1957 = vmatprep.subr.bf16.mxu0 %v3691_v35  ;;  %2027 = vmatpush2.bf16.msra.mxu1 %v3690_v36  ;;  %v102_v35 = vadd.f32 %v101_v21, %v4331_v27  ;;  %v180_v36 = vadd.f32 %v179_v15, %v4321_v25  ;;  %v4426_v15 = vld [vmem:[%s6807_s0 + $0x168] sm:$0xff]  ;;  %v4436_v21 = vld [vmem:[%s6807_s0 + $0x178] sm:$0xff] }
  0x25   :  { %2028 = vmatprep.subr.bf16.mxu1 %v3694_v37  ;;  %v193_v37 = vadd.f32 %v192_v16, %v4326_v26  ;;  %6909 = vst [vmem:[#allocation11_spill] sm:$0xff] %v4426_v15  ;;  %v4431_v16 = vld [vmem:[%s6807_s0 + $0x170] sm:$0xff]  ;;  %6911 = vst [vmem:[#allocation13_spill] sm:$0xff] %v4436_v21 }
  0x26   :  { %6910 = vst [vmem:[#allocation12_spill] sm:$0xff] %v4431_v16 }
  0x27   :  { %1958 = vmatpush2.bf16.msra.mxu0 %v3693_v38  ;;  %v3724_v38 = vld [vmem:[%s6806_s3 + $0x194] ss:$8 sps:$4 sm:$0xff]  }
  0x28   :  { %1959 = vmatprep.subr.bf16.mxu0 %v3697_v39  ;;  %2029 = vmatpush2.bf16.msra.mxu1 %v3696_v40  ;;  %v4363_v39 = vld [vmem:[%s6807_s0 + $0x110] sm:$0xff]  ;;  %v4368_v40 = vld [vmem:[%s6807_s0 + $0x118] sm:$0xff] }
  0x29   :  { %2030 = vmatprep.subr.bf16.mxu1 %v3700_v41  ;;  %6900 = vst [vmem:[#allocation2_spill] sm:$0xff] %v4363_v39  ;;  %6901 = vst [vmem:[#allocation3_spill] sm:$0xff] %v4368_v40  ;;  %v4373_v41 = vld [vmem:[%s6807_s0 + $0x120] sm:$0xff] }
  0x2a   :  { %6902 = vst [vmem:[#allocation4_spill] sm:$0xff] %v4373_v41 }
  0x2b   :  { %1960 = vmatpush2.bf16.msra.mxu0 %v3699_v42  ;;  %v116_v42 = vadd.f32 %v115_v22, %v4342_v32 }
  0x2c   :  { %1961 = vmatprep.subr.bf16.mxu0 %v3703_v44  ;;  %2031 = vmatpush2.bf16.msra.mxu1 %v3702_v43  ;;  %v129_v43 = vadd.f32 %v128_v23, %v4347_v33  ;;  %v142_v44 = vadd.f32 %v141_v28, %v4352_v34  ;;  %v3730_v23 = vld [vmem:[%s6806_s3 + $0x184] ss:$8 sps:$4 sm:$0xff]   ;;  %v4446_v28 = vld [vmem:[%s6807_s0 + $0x190] sm:$0xff] }
  0x2d   :  { %2032 = vmatprep.subr.bf16.mxu1 %v3706_v46  ;;  %v4384_v46 = vld [vmem:[%s6807_s0 + $0x128] sm:$0xff]  ;;  %6912 = vst [vmem:[#allocation14_spill] sm:$0xff] %v4446_v28 }
  0x2e   :  { %6903 = vst [vmem:[#allocation5_spill] sm:$0xff] %v4384_v46 }
  0x2f   :  { %1962 = vmatpush2.bf16.msra.mxu0 %v3705_v45  ;;  %v3723_v45 = vld [vmem:[%s6806_s3 + $0x90] ss:$8 sps:$4 sm:$0xff]  }
  0x30   :  { %1963 = vmatprep.subr.bf16.mxu0 %v3709_v47  ;;  %2033 = vmatpush2.bf16.msra.mxu1 %v3708_v49  ;;  %v4389_v47 = vld [vmem:[%s6807_s0 + $0x140] sm:$0xff]  ;;  %v4394_v49 = vld [vmem:[%s6807_s0 + $0x148] sm:$0xff] }
  0x31   :  { %2034 = vmatprep.subr.bf16.mxu1 %v3712_v53  ;;  %6904 = vst [vmem:[#allocation6_spill] sm:$0xff] %v4389_v47  ;;  %6905 = vst [vmem:[#allocation7_spill] sm:$0xff] %v4394_v49  ;;  %v155_v53 = vadd.f32 %v154_v29, %v4363_v39  ;;  %v103_v8 = vadd.f32 %v102_v35, %v4389_v47  ;;  %v117_v9 = vadd.f32 %v116_v42, %v4394_v49  ;;  %v4451_v29 = vld [vmem:[%s6807_s0 + $0x198] sm:$0xff]  ;;  %v3729_v42 = vld [vmem:[%s6806_s3 + $0x80] ss:$8 sps:$4 sm:$0xff]  }
  0x32   :  { %6913 = vst [vmem:[#allocation15_spill] sm:$0xff] %v4451_v29 }
  0x33   :  { %1964 = vmatpush2.bf16.msra.mxu0 %v3711_v57  ;;  %v168_v57 = vadd.f32 %v167_v30, %v4368_v40  ;;  %v4456_v30 = vld [vmem:[%s6807_s0 + $0x1a0] sm:$0xff] }
  0x34   :  { %1965 = vmatprep.subr.bf16.mxu0 %v3715_v61  ;;  %2035 = vmatpush2.bf16.msra.mxu1 %v3714_v3  ;;  %v181_v61 = vadd.f32 %v180_v36, %v4373_v41  ;;  %v4410_v3 = vld [vmem:[%s6807_s0 + $0x158] sm:$0xff]  ;;  %6914 = vst [vmem:[#allocation16_spill] sm:$0xff] %v4456_v30 }
  0x35   :  { %2036 = vmatprep.subr.bf16.mxu1 %v3718_v10  ;;  %6907 = vst [vmem:[#allocation9_spill] sm:$0xff] %v4410_v3  ;;  %v194_v10 = vadd.f32 %v193_v37, %v4384_v46  ;;  %v143_v22 = vadd.f32 %v142_v44, %v4410_v3  ;;  %v169_v35 = vadd.f32 %v168_v57, %v4426_v15  ;;  %v4473_v44 = vld [vmem:[%s6807_s0 + $0x1b0] sm:$0xff]  ;;  %v4488_v57 = vld [vmem:[%s6807_s0 + $0x1c8] sm:$0xff] }
  0x36   :  { %v182_v36 = vadd.f32 %v181_v61, %v4431_v16  ;;  %6916 = vst [vmem:[#allocation18_spill] sm:$0xff] %v4473_v44  ;;  %6919 = vst [vmem:[#allocation21_spill] sm:$0xff] %v4488_v57  ;;  %v4493_v61 = vld [vmem:[%s6807_s0 + $0x1e0] sm:$0x1] }
  0x37   :  { %1966 = vmatpush2.bf16.msra.mxu0 %v3717_v17  ;;  %v130_v17 = vadd.f32 %v129_v43, %v4405_v2  ;;  %v195_v37 = vadd.f32 %v194_v10, %v4436_v21  ;;  %v4468_v43 = vld [vmem:[%s6807_s0 + $0x1a8] sm:$0xff]  ;;  %6920 = vst [vmem:[#allocation22_spill] sm:$0xff] %v4493_v61  ;;  %v104_v10 = vadd.f32 %v103_v8, %v4446_v28  ;;  %v4510_v8 = vld [vmem:[%s6807_s0 + $0x1f0] sm:$0x1]  ;;  %v4539_v28 = vld [vmem:[%s6807_s0 + $0x218] sm:$0x1] }
  0x38   :  { %1967 = vmatprep.subr.bf16.mxu0 %v3721_v24  ;;  %v156_v24 = vadd.f32 %v155_v53, %v4415_v7  ;;  %2037 = vmatpush2.bf16.msra.mxu1 %v3720_v31  ;;  %6915 = vst [vmem:[#allocation17_spill] sm:$0xff] %v4468_v43  ;;  %v4478_v53 = vld [vmem:[%s6807_s0 + $0x1b8] sm:$0xff]  ;;  %v4483_v31 = vld [vmem:[%s6807_s0 + $0x1c0] sm:$0xff]  ;;  %v118_v21 = vadd.f32 %v117_v9, %v4451_v29  ;;  %v4505_v7 = vld [vmem:[%s6807_s0 + $0x1e8] sm:$0x1]  ;;  %v106_v3 = vsel %vm105_vm0, %v4493_v61, 0.0 }
  0x39   :  { %6917 = vst [vmem:[#allocation19_spill] sm:$0xff] %v4478_v53  ;;  %2038 = vmatprep.subr.bf16.mxu1 %v3724_v38  ;;  %6918 = vst [vmem:[#allocation20_spill] sm:$0xff] %v4483_v31  ;;  %v131_v38 = vadd.f32 %v130_v17, %v4456_v30  ;;  %v144_v16 = vadd.f32 %v143_v22, %v4468_v43  ;;  %v3732_v15 = vld [vmem:[%s6806_s3 + $0x180] ss:$8 sps:$4 sm:$0xff]   ;;  %v4515_v9 = vld [vmem:[%s6807_s0 + $0x1f8] sm:$0x1]  ;;  %v170_v30 = vadd.f32 %v169_v35, %v4478_v53 }
  0x3a   :  { %6921 = vst [vmem:[#allocation23_spill] sm:$0xff] %v4505_v7  ;;  %6922 = vst [vmem:[#allocation24_spill] sm:$0xff] %v4510_v8  ;;  %v4525_v17 = vld [vmem:[%s6807_s0 + $0x208] sm:$0x1]  ;;  %v4530_v22 = vld [vmem:[%s6807_s0 + $0x210] sm:$0x1]  ;;  %v157_v43 = vadd.f32 %v156_v24, %v4473_v44  ;;  %v196_v29 = vadd.f32 %v195_v37, %v4488_v57 }
  0x3b   :  { %1968 = vmatpush2.bf16.msra.mxu0 %v3723_v45  ;;  %6923 = vst [vmem:[#allocation25_spill] sm:$0xff] %v4515_v9  ;;  %v4520_v45 = vld [vmem:[%s6807_s0 + $0x200] sm:$0x1]  ;;  %6925 = vst [vmem:[#allocation27_spill] sm:$0xff] %v4525_v17  ;;  %v119_v2 = vsel %vm105_vm0, %v4505_v7, 0.0  ;;  %v132_v24 = vsel %vm105_vm0, %v4510_v8, 0.0 }
  0x3c   :  { %1969 = vmatprep.subr.bf16.mxu0 %v3727_v1  ;;  %6924 = vst [vmem:[#allocation26_spill] sm:$0xff] %v4520_v45  ;;  %6926 = vst [vmem:[#allocation28_spill] sm:$0xff] %v4530_v22  ;;  %v183_v1 = vadd.f32 %v182_v36, %v4483_v31  ;;  %2039 = vmatpush2.bf16.msra.mxu1 %v3726_v14  ;;  %v145_v35 = vsel %vm105_vm0, %v4515_v9, 0.0  ;;  %v107_v36 = vadd.f32 %v106_v3, %v104_v10  ;;  %v3735_v10 = vld [vmem:[%s6806_s3 + $0x274] ss:$8 sps:$4 sm:$0xff]  }
  0x3d   :  { %6927 = vst [vmem:[#allocation29_spill] sm:$0xff] %v4539_v28  ;;  %2040 = vmatprep.subr.bf16.mxu1 %v3730_v23  ;;  %v120_v14 = vadd.f32 %v119_v2, %v118_v21  ;;  %v133_v37 = vadd.f32 %v132_v24, %v131_v38  ;;  %v146_v57 = vadd.f32 %v145_v35, %v144_v16  ;;  %v158_v31 = vsel %vm105_vm0, %v4520_v45, 0.0 }
  0x3e   :  { %v171_v61 = vsel %vm105_vm0, %v4525_v17, 0.0  ;;  %v184_v7 = vsel %vm105_vm0, %v4530_v22, 0.0  ;;  %v197_v8 = vsel %vm105_vm0, %v4539_v28, 0.0  ;;  %v108_v53 = vrot.slane %v107_v36, 4  ;;  %v3738_v28 = vld [vmem:[%s6806_s3 + $0x374] ss:$8 sps:$4 sm:$0xff]  }
  0x3f   :  { %1970 = vmatpush2.bf16.msra.mxu0 %v3729_v42  ;;  %v121_v9 = vrot.slane %v120_v14, 4  ;;  %v134_v23 = vrot.slane %v133_v37, 4  ;;  %v147_v3 = vrot.slane %v146_v57, 4  ;;  %v159_v2 = vadd.f32 %v158_v31, %v157_v43 }
  0x40   :  { %2041 = vmatpush2.bf16.msra.mxu1 %v3732_v15  ;;  %v172_v16 = vadd.f32 %v171_v61, %v170_v30  ;;  %v185_v21 = vadd.f32 %v184_v7, %v183_v1  ;;  %v198_v42 = vadd.f32 %v197_v8, %v196_v29  ;;  %v109_v38 = vadd.f32 %v108_v53, %v107_v36 }
  0x41   :  { %v122_v24 = vadd.f32 %v121_v9, %v120_v14  ;;  %v135_v35 = vadd.f32 %v134_v23, %v133_v37  ;;  %v148_v22 = vadd.f32 %v147_v3, %v146_v57  ;;  %v160_v17 = vrot.slane %v159_v2, 4  ;;  %2081 = vmatprep.subr.bf16.mxu0 %v3735_v10  ;;  %2152 = vmatprep.subr.bf16.mxu1 %v3738_v28 }
  0x42   :  { %v173_v45 = vrot.slane %v172_v16, 4  ;;  %v186_v44 = vrot.slane %v185_v21, 4  ;;  %v199_v15 = vrot.slane %v198_v42, 4  ;;  %v110_v30 = vrot.slane %v109_v38, 2 }
  0x43   :  { %v123_v7 = vrot.slane %v122_v24, 2  ;;  %v136_v29 = vrot.slane %v135_v35, 2  ;;  %v149_v43 = vrot.slane %v148_v22, 2  ;;  %v161_v31 = vadd.f32 %v160_v17, %v159_v2 }
  0x44   :  { %v174_v61 = vadd.f32 %v173_v45, %v172_v16  ;;  %v187_v53 = vadd.f32 %v186_v44, %v185_v21  ;;  %v200_v8 = vadd.f32 %v199_v15, %v198_v42  ;;  %v111_v9 = vadd.f32 %v110_v30, %v109_v38 }
  0x45   :  { %v124_v57 = vadd.f32 %v123_v7, %v122_v24  ;;  %v137_v1 = vadd.f32 %v136_v29, %v135_v35  ;;  %v150_v36 = vadd.f32 %v149_v43, %v148_v22  ;;  %v162_v14 = vrot.slane %v161_v31, 2 }
  0x46   :  { %v175_v37 = vrot.slane %v174_v61, 2  ;;  %v188_v23 = vrot.slane %v187_v53, 2  ;;  %v201_v3 = vrot.slane %v200_v8, 2  ;;  %v112_v49 = vrot.slane %v111_v9, 1 }
  0x47   :  { %v125_v47 = vrot.slane %v124_v57, 1  ;;  %v138_v10 = vrot.slane %v137_v1, 1  ;;  %v151_v46 = vrot.slane %v150_v36, 1  ;;  %v163_v41 = vadd.f32 %v162_v14, %v161_v31 }
  0x48   :  { %v176_v40 = vadd.f32 %v175_v37, %v174_v61  ;;  %v189_v39 = vadd.f32 %v188_v23, %v187_v53  ;;  %v202_v28 = vadd.f32 %v201_v3, %v200_v8  ;;  %v113_v17 = vadd.f32 %v112_v49, %v111_v9 }
  0x49   :  { %v126_v45 = vadd.f32 %v125_v47, %v124_v57  ;;  %v139_v44 = vadd.f32 %v138_v10, %v137_v1  ;;  %v152_v2 = vadd.f32 %v151_v46, %v150_v36  ;;  %v164_v16 = vrot.slane %v163_v41, 1  ;;  %v6970_v10 = vld [vmem:[#allocation9_spill] sm:$0xff] }
  0x4a   :  { %v177_v21 = vrot.slane %v176_v40, 1  ;;  %v190_v42 = vrot.slane %v189_v39, 1  ;;  %v203_v22 = vrot.slane %v202_v28, 1  ;;  %v239_v38 = vmul.f32 0.020408163, %v113_v17  ;;  %v6972_v17 = vld [vmem:[#allocation10_spill] sm:$0xff] }
  0x4b   :  { %v240_v24 = vmul.f32 0.020408163, %v126_v45  ;;  %v241_v35 = vmul.f32 0.020408163, %v139_v44  ;;  %v165_v15 = vadd.f32 %v164_v16, %v163_v41  ;;  %v242_v43 = vmul.f32 0.020408163, %v152_v2 }
  0x4c   :  { %v178_v30 = vadd.f32 %v177_v21, %v176_v40  ;;  %v191_v7 = vadd.f32 %v190_v42, %v189_v39  ;;  %v204_v29 = vadd.f32 %v203_v22, %v202_v28  ;;  %v4564_v31 = vsub.f32 %v4168_v48, %v239_v38  ;;  %v6974_v44 = vld [vmem:[#allocation11_spill] sm:$0xff]  ;;  %v6976_v16 = vld [vmem:[#allocation12_spill] sm:$0xff]  ;;  %v6978_v42 = vld [vmem:[#allocation13_spill] sm:$0xff] }
  0x4d   :  { %v4567_v49 = vsub.f32 %v4176_v50, %v240_v24  ;;  %v4570_v46 = vsub.f32 %v4181_v51, %v241_v35  ;;  %v243_v47 = vmul.f32 0.020408163, %v165_v15  ;;  %v4573_v8 = vsub.f32 %v4217_v59, %v239_v38  ;;  %v6980_v15 = vld [vmem:[#allocation14_spill] sm:$0xff] }
  0x4e   :  { %6928 = vst [vmem:[#allocation30_spill] sm:$0xff] %v4564_v31  ;;  %v244_v61 = vmul.f32 0.020408163, %v178_v30  ;;  %v245_v53 = vmul.f32 0.020408163, %v191_v7  ;;  %v4576_v39 = vsub.f32 %v4186_v52, %v242_v43  ;;  %v4579_v40 = vsub.f32 %v4222_v60, %v240_v24  ;;  %v6982_v7 = vld [vmem:[#allocation15_spill] sm:$0xff] }
  0x4f   :  { %6929 = vst [vmem:[#allocation31_spill] sm:$0xff] %v4567_v49  ;;  %6930 = vst [vmem:[#allocation32_spill] sm:$0xff] %v4570_v46  ;;  %v246_v41 = vmul.f32 0.020408163, %v204_v29  ;;  %v4582_v48 = vsub.f32 %v4230_v62, %v241_v35  ;;  %v4585_v50 = vsub.f32 %v4194_v54, %v243_v47  ;;  %v4594_v59 = vsub.f32 %v4235_v63, %v242_v43 }
  0x50   :  { %6931 = vst [vmem:[#allocation33_spill] sm:$0xff] %v4573_v8  ;;  %6932 = vst [vmem:[#allocation34_spill] sm:$0xff] %v4576_v39  ;;  %v4588_v51 = vsub.f32 %v4199_v55, %v244_v61  ;;  %v4591_v9 = vsub.f32 %v4204_v56, %v245_v53  ;;  %v4600_v60 = vsub.f32 %v4240_v0, %v243_v47 }
  0x51   :  { %6933 = vst [vmem:[#allocation35_spill] sm:$0xff] %v4579_v40  ;;  %6934 = vst [vmem:[#allocation36_spill] sm:$0xff] %v4582_v48  ;;  %v4597_v52 = vsub.f32 %v4212_v58, %v246_v41  ;;  %v4603_v62 = vsub.f32 %v4252_v4, %v244_v61  ;;  %v4606_v54 = vsub.f32 %v4257_v5, %v245_v53 }
  0x52   :  { %6935 = vst [vmem:[#allocation37_spill] sm:$0xff] %v4585_v50  ;;  %6936 = vst [vmem:[#allocation38_spill] sm:$0xff] %v4588_v51  ;;  %v4609_v55 = vsub.f32 %v4262_v6, %v246_v41  ;;  %v4612_v56 = vsub.f32 %v4276_v11, %v239_v38  ;;  %v4615_v63 = vsub.f32 %v4281_v12, %v240_v24 }
  0x53   :  { %6937 = vst [vmem:[#allocation39_spill] sm:$0xff] %v4591_v9  ;;  %6938 = vst [vmem:[#allocation40_spill] sm:$0xff] %v4594_v59  ;;  %v4618_v58 = vsub.f32 %v4286_v13, %v241_v35  ;;  %v4621_v0 = vsub.f32 %v4300_v18, %v242_v43  ;;  %v4624_v4 = vsub.f32 %v4305_v19, %v243_v47 }
  0x54   :  { %6939 = vst [vmem:[#allocation41_spill] sm:$0xff] %v4597_v52  ;;  %6940 = vst [vmem:[#allocation42_spill] sm:$0xff] %v4600_v60  ;;  %v4627_v5 = vsub.f32 %v4310_v20, %v244_v61  ;;  %v4630_v6 = vsub.f32 %v4321_v25, %v245_v53  ;;  %v4633_v11 = vsub.f32 %v4326_v26, %v246_v41  ;;  %v6956_v20 = vld [vmem:[#allocation2_spill] sm:$0xff]  ;;  %v6958_v25 = vld [vmem:[#allocation3_spill] sm:$0xff] }
  0x55   :  { %6941 = vst [vmem:[#allocation43_spill] sm:$0xff] %v4603_v62  ;;  %6942 = vst [vmem:[#allocation44_spill] sm:$0xff] %v4606_v54  ;;  %v4636_v12 = vsub.f32 %v4331_v27, %v239_v38  ;;  %v4639_v13 = vsub.f32 %v4342_v32, %v240_v24  ;;  %v4642_v18 = vsub.f32 %v4347_v33, %v241_v35  ;;  %v6960_v26 = vld [vmem:[#allocation4_spill] sm:$0xff]  ;;  %v6962_v27 = vld [vmem:[#allocation5_spill] sm:$0xff] }
  0x56   :  { %6943 = vst [vmem:[#allocation45_spill] sm:$0xff] %v4609_v55  ;;  %6944 = vst [vmem:[#allocation46_spill] sm:$0xff] %v4612_v56  ;;  %v4645_v19 = vsub.f32 %v4352_v34, %v242_v43  ;;  %v4648_v57 = vsub.f32 %v6956_v20, %v243_v47  ;;  %v4651_v1 = vsub.f32 %v6958_v25, %v244_v61  ;;  %v6964_v32 = vld [vmem:[#allocation6_spill] sm:$0xff]  ;;  %v6966_v33 = vld [vmem:[#allocation7_spill] sm:$0xff] }
  0x57   :  { %6945 = vst [vmem:[#allocation47_spill] sm:$0xff] %v4615_v63  ;;  %6946 = vst [vmem:[#allocation48_spill] sm:$0xff] %v4618_v58  ;;  %v4654_v36 = vsub.f32 %v6960_v26, %v245_v53  ;;  %v4657_v14 = vsub.f32 %v6962_v27, %v246_v41  ;;  %v4660_v37 = vsub.f32 %v6964_v32, %v239_v38  ;;  %v6968_v34 = vld [vmem:[#allocation8_spill] sm:$0xff]  ;;  %v6986_v26 = vld [vmem:[#allocation17_spill] sm:$0xff] }
  0x58   :  { %6947 = vst [vmem:[#allocation49_spill] sm:$0xff] %v4621_v0  ;;  %6948 = vst [vmem:[#allocation50_spill] sm:$0xff] %v4624_v4  ;;  %v4663_v23 = vsub.f32 %v6966_v33, %v240_v24  ;;  %v4666_v3 = vsub.f32 %v6968_v34, %v241_v35  ;;  %v4669_v28 = vsub.f32 %v6970_v10, %v242_v43  ;;  %v6984_v20 = vld [vmem:[#allocation16_spill] sm:$0xff]  ;;  %v6988_v32 = vld [vmem:[#allocation18_spill] sm:$0xff] }
  0x59   :  { %6949 = vst [vmem:[#allocation51_spill] sm:$0xff] %v4627_v5  ;;  %6950 = vst [vmem:[#allocation52_spill] sm:$0xff] %v4630_v6  ;;  %v4672_v45 = vsub.f32 %v6972_v17, %v243_v47  ;;  %v4675_v2 = vsub.f32 %v6974_v44, %v244_v61  ;;  %v4678_v21 = vsub.f32 %v6976_v16, %v245_v53  ;;  %v6990_v34 = vld [vmem:[#allocation19_spill] sm:$0xff]  ;;  %v6992_v17 = vld [vmem:[#allocation20_spill] sm:$0xff] }
  0x5a   :  { %6951 = vst [vmem:[#allocation53_spill] sm:$0xff] %v4633_v11  ;;  %6952 = vst [vmem:[#allocation54_spill] sm:$0xff] %v4636_v12  ;;  %v4681_v22 = vsub.f32 %v6978_v42, %v246_v41  ;;  %v4684_v30 = vsub.f32 %v6980_v15, %v239_v38  ;;  %v4687_v29 = vsub.f32 %v6982_v7, %v240_v24  ;;  %v6994_v16 = vld [vmem:[#allocation21_spill] sm:$0xff]  ;;  %v6996_v15 = vld [vmem:[#allocation22_spill] sm:$0xff] }
  0x5b   :  { %6953 = vst [vmem:[#allocation55_spill] sm:$0xff] %v4639_v13  ;;  %6954 = vst [vmem:[#allocation56_spill] sm:$0xff] %v4642_v18  ;;  %v4690_v25 = vsub.f32 %v6984_v20, %v241_v35  ;;  %v4693_v27 = vsub.f32 %v6986_v26, %v242_v43  ;;  %v4696_v33 = vsub.f32 %v6988_v32, %v243_v47  ;;  %v6998_v20 = vld [vmem:[#allocation23_spill] sm:$0xff]  ;;  %v7000_v26 = vld [vmem:[#allocation24_spill] sm:$0xff] }
  0x5c   :  { %6955 = vst [vmem:[#allocation57_spill] sm:$0xff] %v4645_v19  ;;  %6957 = vst [vmem:[#allocation2_spill] sm:$0xff] %v4648_v57  ;;  %v4699_v10 = vsub.f32 %v6990_v34, %v244_v61  ;;  %v4702_v44 = vsub.f32 %v6992_v17, %v245_v53  ;;  %v4705_v42 = vsub.f32 %v6994_v16, %v246_v41  ;;  %v7002_v32 = vld [vmem:[#allocation25_spill] sm:$0xff]  ;;  %v7004_v34 = vld [vmem:[#allocation26_spill] sm:$0xff] }
  0x5d   :  { %6959 = vst [vmem:[#allocation3_spill] sm:$0xff] %v4651_v1  ;;  %6961 = vst [vmem:[#allocation4_spill] sm:$0xff] %v4654_v36  ;;  %v4708_v7 = vsub.f32 %v6996_v15, %v239_v38  ;;  %v7006_v17 = vld [vmem:[#allocation27_spill] sm:$0xff]  ;;  %v7008_v16 = vld [vmem:[#allocation28_spill] sm:$0xff] }
  0x5e   :  { %6963 = vst [vmem:[#allocation5_spill] sm:$0xff] %v4657_v14  ;;  %6965 = vst [vmem:[#allocation6_spill] sm:$0xff] %v4660_v37  ;;  %v7010_v38 = vld [vmem:[#allocation29_spill] sm:$0xff] }
  0x5f   :  { %6967 = vst [vmem:[#allocation7_spill] sm:$0xff] %v4663_v23  ;;  %6969 = vst [vmem:[#allocation8_spill] sm:$0xff] %v4666_v3  ;;  %v4729_v15 = vsub.f32 %v7010_v38, %v246_v41  ;;  %v4747_v41 = vmul.f32 %v4591_v9, %v4591_v9  ;;  %v334_v38 = vmul.f32 %v4603_v62, %v4603_v62 }
  0x60   :  { %6971 = vst [vmem:[#allocation9_spill] sm:$0xff] %v4669_v28  ;;  %6973 = vst [vmem:[#allocation10_spill] sm:$0xff] %v4672_v45  ;;  %v4767_v9 = vmul.f32 %v4606_v54, %v4606_v54  ;;  %v342_v62 = vmul.f32 %v4621_v0, %v4621_v0  ;;  %v343_v54 = vmul.f32 %v4624_v4, %v4624_v4 }
  0x61   :  { %6975 = vst [vmem:[#allocation11_spill] sm:$0xff] %v4675_v2  ;;  %6977 = vst [vmem:[#allocation12_spill] sm:$0xff] %v4678_v21  ;;  %v350_v0 = vmul.f32 %v4639_v13, %v4639_v13  ;;  %v351_v4 = vmul.f32 %v4642_v18, %v4642_v18  ;;  %v359_v18 = vmul.f32 %v4660_v37, %v4660_v37 }
  0x62   :  { %6979 = vst [vmem:[#allocation13_spill] sm:$0xff] %v4681_v22  ;;  %6981 = vst [vmem:[#allocation14_spill] sm:$0xff] %v4684_v30  ;;  %v364_v13 = vmul.f32 %v4675_v2, %v4675_v2  ;;  %v4831_v37 = vmul.f32 %v4681_v22, %v4681_v22 }
  0x63   :  { %6983 = vst [vmem:[#allocation15_spill] sm:$0xff] %v4687_v29  ;;  %6985 = vst [vmem:[#allocation16_spill] sm:$0xff] %v4690_v25  ;;  %v4711_v25 = vsub.f32 %v6998_v20, %v240_v24  ;;  %v319_v24 = vmul.f32 %v4564_v31, %v4564_v31  ;;  %v4751_v20 = vmul.f32 %v4597_v52, %v4597_v52 }
  0x64   :  { %6987 = vst [vmem:[#allocation17_spill] sm:$0xff] %v4693_v27  ;;  %6989 = vst [vmem:[#allocation18_spill] sm:$0xff] %v4696_v33  ;;  %v4714_v27 = vsub.f32 %v7000_v26, %v241_v35  ;;  %v4717_v33 = vsub.f32 %v7002_v32, %v242_v43  ;;  %v320_v35 = vmul.f32 %v4567_v49, %v4567_v49 }
  0x65   :  { %6991 = vst [vmem:[#allocation19_spill] sm:$0xff] %v4699_v10  ;;  %6993 = vst [vmem:[#allocation20_spill] sm:$0xff] %v4702_v44  ;;  %v4720_v10 = vsub.f32 %v7004_v34, %v243_v47  ;;  %v4723_v44 = vsub.f32 %v7006_v17, %v244_v61  ;;  %v321_v43 = vmul.f32 %v4570_v46, %v4570_v46 }
  0x66   :  { %6995 = vst [vmem:[#allocation21_spill] sm:$0xff] %v4705_v42  ;;  %6997 = vst [vmem:[#allocation22_spill] sm:$0xff] %v4708_v7  ;;  %v4726_v42 = vsub.f32 %v7008_v16, %v245_v53  ;;  %v322_v47 = vmul.f32 %v4576_v39, %v4576_v39  ;;  %v323_v61 = vmul.f32 %v4585_v50, %v4585_v50 }
  0x67   :  { %6999 = vst [vmem:[#allocation23_spill] sm:$0xff] %v4711_v25  ;;  %7001 = vst [vmem:[#allocation24_spill] sm:$0xff] %v4714_v27  ;;  %v4743_v53 = vmul.f32 %v4588_v51, %v4588_v51  ;;  %v329_v26 = vmul.f32 %v4573_v8, %v4573_v8  ;;  %v330_v32 = vmul.f32 %v4579_v40, %v4579_v40 }
  0x68   :  { %7003 = vst [vmem:[#allocation25_spill] sm:$0xff] %v4717_v33  ;;  %7005 = vst [vmem:[#allocation26_spill] sm:$0xff] %v4720_v10  ;;  %v331_v34 = vmul.f32 %v4582_v48, %v4582_v48  ;;  %v332_v17 = vmul.f32 %v4594_v59, %v4594_v59  ;;  %v333_v16 = vmul.f32 %v4600_v60, %v4600_v60 }
  0x69   :  { %7007 = vst [vmem:[#allocation27_spill] sm:$0xff] %v4723_v44  ;;  %7009 = vst [vmem:[#allocation28_spill] sm:$0xff] %v4726_v42  ;;  %v4771_v50 = vmul.f32 %v4609_v55, %v4609_v55  ;;  %v339_v52 = vmul.f32 %v4612_v56, %v4612_v56  ;;  %v340_v51 = vmul.f32 %v4615_v63, %v4615_v63 }
  0x6a   :  { %7011 = vst [vmem:[#allocation29_spill] sm:$0xff] %v4729_v15  ;;  %v341_v60 = vmul.f32 %v4618_v58, %v4618_v58  ;;  %v344_v48 = vmul.f32 %v4627_v5, %v4627_v5  ;;  %v4787_v55 = vmul.f32 %v4630_v6, %v4630_v6  ;;  %v4791_v56 = vmul.f32 %v4633_v11, %v4633_v11 }
  0x6b   :  { %v349_v58 = vmul.f32 %v4636_v12, %v4636_v12  ;;  %v352_v5 = vmul.f32 %v4645_v19, %v4645_v19  ;;  %v353_v6 = vmul.f32 %v4648_v57, %v4648_v57  ;;  %v354_v63 = vmul.f32 %v4651_v1, %v4651_v1  ;;  %7015 = vst [vmem:[#allocation61_spill] sm:$0xff] %v4831_v37  ;;  %v7017_v46 = vld [vmem:[#allocation17_spill] sm:$0xff]  ;;  %v7018_v8 = vld [vmem:[#allocation18_spill] sm:$0xff] }
  0x6c   :  { %7012 = vst [vmem:[#allocation58_spill] sm:$0xff] %v4791_v56  ;;  %v4807_v11 = vmul.f32 %v4654_v36, %v4654_v36  ;;  %v4811_v12 = vmul.f32 %v4657_v14, %v4657_v14  ;;  %v360_v19 = vmul.f32 %v4663_v23, %v4663_v23  ;;  %v361_v57 = vmul.f32 %v4666_v3, %v4666_v3  ;;  %v7016_v23 = vld [vmem:[#allocation16_spill] sm:$0xff]  ;;  %v7019_v31 = vld [vmem:[#allocation19_spill] sm:$0xff] }
  0x6d   :  { %v362_v1 = vmul.f32 %v4669_v28, %v4669_v28  ;;  %v363_v36 = vmul.f32 %v4672_v45, %v4672_v45  ;;  %v4827_v14 = vmul.f32 %v4678_v21, %v4678_v21  ;;  %v369_v3 = vmul.f32 %v4684_v30, %v4684_v30  ;;  %v7020_v22 = vld [vmem:[#allocation20_spill] sm:$0xff]  ;;  %v7022_v30 = vld [vmem:[#allocation21_spill] sm:$0xff] }
  0x6e   :  { %7013 = vst [vmem:[#allocation59_spill] sm:$0xff] %v4811_v12  ;;  %v370_v28 = vmul.f32 %v4687_v29, %v4687_v29  ;;  %v371_v45 = vmul.f32 %v7016_v23, %v7016_v23  ;;  %v372_v2 = vmul.f32 %v7017_v46, %v7017_v46  ;;  %v373_v21 = vmul.f32 %v7018_v8, %v7018_v8 }
  0x6f   :  { %7014 = vst [vmem:[#allocation60_spill] sm:$0xff] %v4827_v14  ;;  %v374_v59 = vmul.f32 %v7019_v31, %v7019_v31  ;;  %v4847_v39 = vmul.f32 %v7020_v22, %v7020_v22  ;;  %v4851_v40 = vmul.f32 %v7022_v30, %v7022_v30  ;;  %v379_v23 = vmul.f32 %v4708_v7, %v4708_v7 }
  0x70   :  { %v380_v46 = vmul.f32 %v4711_v25, %v4711_v25  ;;  %v381_v8 = vmul.f32 %v4714_v27, %v4714_v27  ;;  %v382_v31 = vmul.f32 %v4717_v33, %v4717_v33  ;;  %v383_v22 = vmul.f32 %v4720_v10, %v4720_v10 }
  0x71   :  { %7021 = vst [vmem:[#allocation62_spill] sm:$0xff] %v4847_v39  ;;  %7023 = vst [vmem:[#allocation63_spill] sm:$0xff] %v4851_v40  ;;  %v384_v29 = vmul.f32 %v4723_v44, %v4723_v44  ;;  %v385_v30 = vmul.f32 %v4726_v42, %v4726_v42  ;;  %v4869_v7 = vmul.f32 %v4729_v15, %v4729_v15  ;;  %v394_v49 = vsel %vm105_vm0, %v379_v23, 0.0 }
  0x72   :  { %v389_v25 = vadd.f32 %v329_v26, %v319_v24  ;;  %v402_v27 = vadd.f32 %v330_v32, %v320_v35  ;;  %v407_v40 = vsel %vm105_vm0, %v380_v46, 0.0  ;;  %v415_v33 = vadd.f32 %v331_v34, %v321_v43 }
  0x73   :  { %v420_v37 = vsel %vm105_vm0, %v381_v8, 0.0  ;;  %v428_v10 = vadd.f32 %v332_v17, %v322_v47  ;;  %v433_v44 = vsel %vm105_vm0, %v382_v31, 0.0  ;;  %v441_v14 = vadd.f32 %v333_v16, %v323_v61 }
  0x74   :  { %v390_v39 = vadd.f32 %v389_v25, %v339_v52  ;;  %v403_v12 = vadd.f32 %v402_v27, %v340_v51  ;;  %v416_v42 = vadd.f32 %v415_v33, %v341_v60  ;;  %v446_v15 = vsel %vm105_vm0, %v383_v22, 0.0 }
  0x75   :  { %v429_v56 = vadd.f32 %v428_v10, %v342_v62  ;;  %v454_v24 = vadd.f32 %v334_v38, %v4743_v53  ;;  %v442_v35 = vadd.f32 %v441_v14, %v343_v54  ;;  %v459_v46 = vsel %vm105_vm0, %v384_v29, 0.0  ;;  %v7026_v29 = vld [vmem:[#allocation59_spill] sm:$0xff]  ;;  %v7028_v10 = vld [vmem:[#allocation61_spill] sm:$0xff] }
  0x76   :  { %v391_v26 = vadd.f32 %v390_v39, %v349_v58  ;;  %v404_v23 = vadd.f32 %v403_v12, %v350_v0  ;;  %v417_v43 = vadd.f32 %v416_v42, %v351_v4  ;;  %v467_v51 = vadd.f32 %v4767_v9, %v4747_v41 }
  0x77   :  { %v430_v32 = vadd.f32 %v429_v56, %v352_v5  ;;  %v455_v8 = vadd.f32 %v454_v24, %v344_v48  ;;  %v443_v25 = vadd.f32 %v442_v35, %v353_v6  ;;  %v472_v60 = vsel %vm105_vm0, %v385_v30, 0.0 }
  0x78   :  { %v392_v52 = vadd.f32 %v391_v26, %v359_v18  ;;  %v405_v31 = vadd.f32 %v404_v23, %v360_v19  ;;  %v418_v62 = vadd.f32 %v417_v43, %v361_v57  ;;  %v468_v39 = vadd.f32 %v467_v51, %v4787_v55  ;;  %v7024_v19 = vld [vmem:[#allocation58_spill] sm:$0xff]  ;;  %v7025_v55 = vld [vmem:[#allocation60_spill] sm:$0xff] }
  0x79   :  { %v431_v22 = vadd.f32 %v430_v32, %v362_v1  ;;  %v456_v27 = vadd.f32 %v455_v8, %v354_v63  ;;  %v444_v0 = vadd.f32 %v443_v25, %v363_v36  ;;  %v480_v56 = vadd.f32 %v4771_v50, %v4751_v20  ;;  %v7027_v33 = vld [vmem:[#allocation62_spill] sm:$0xff] }
  0x7a   :  { %v393_v58 = vadd.f32 %v392_v52, %v369_v3  ;;  %v406_v54 = vadd.f32 %v405_v31, %v370_v28  ;;  %v419_v48 = vadd.f32 %v418_v62, %v371_v45  ;;  %v469_v9 = vadd.f32 %v468_v39, %v4807_v11 }
  0x7b   :  { %v432_v4 = vadd.f32 %v431_v22, %v372_v2  ;;  %v457_v5 = vadd.f32 %v456_v27, %v364_v13  ;;  %v445_v18 = vadd.f32 %v444_v0, %v373_v21  ;;  %v481_v57 = vadd.f32 %v480_v56, %v7024_v19 }
  0x7c   :  { %v395_v12 = vadd.f32 %v394_v49, %v393_v58  ;;  %v408_v6 = vadd.f32 %v407_v40, %v406_v54  ;;  %v421_v1 = vadd.f32 %v420_v37, %v419_v48  ;;  %v470_v3 = vadd.f32 %v469_v9, %v7025_v55 }
  0x7d   :  { %v434_v63 = vadd.f32 %v433_v44, %v432_v4  ;;  %v458_v14 = vadd.f32 %v457_v5, %v374_v59  ;;  %v447_v30 = vadd.f32 %v446_v15, %v445_v18  ;;  %v482_v50 = vadd.f32 %v481_v57, %v7026_v29  ;;  %v7029_v15 = vld [vmem:[#allocation63_spill] sm:$0xff] }
  0x7e   :  { %v396_v28 = vrot.slane %v395_v12, 4  ;;  %v409_v36 = vrot.slane %v408_v6, 4  ;;  %v422_v45 = vrot.slane %v421_v1, 4  ;;  %v471_v11 = vadd.f32 %v470_v3, %v7027_v33 }
  0x7f   :  { %v435_v2 = vrot.slane %v434_v63, 4  ;;  %v460_v13 = vadd.f32 %v459_v46, %v458_v14  ;;  %v448_v21 = vrot.slane %v447_v30, 4  ;;  %v483_v42 = vadd.f32 %v482_v50, %v7028_v10  ;;  %v4901_v10 = vld [vmem:[%s6807_s0 + $0x90] sm:$0xff] }
  0x80   :  { %v397_v49 = vadd.f32 %v396_v28, %v395_v12  ;;  %v410_v40 = vadd.f32 %v409_v36, %v408_v6  ;;  %v423_v37 = vadd.f32 %v422_v45, %v421_v1  ;;  %v473_v47 = vadd.f32 %v472_v60, %v471_v11 }
  0x81   :  { %v436_v44 = vadd.f32 %v435_v2, %v434_v63  ;;  %v461_v59 = vrot.slane %v460_v13, 4  ;;  %v449_v41 = vadd.f32 %v448_v21, %v447_v30  ;;  %v484_v20 = vadd.f32 %v483_v42, %v7029_v15  ;;  %v4896_v21 = vld [vmem:[%s6807_s0 + $0x40] sm:$0xff] }
  0x82   :  { %v398_v61 = vrot.slane %v397_v49, 2  ;;  %v411_v53 = vrot.slane %v410_v40, 2  ;;  %v424_v34 = vrot.slane %v423_v37, 2  ;;  %v474_v38 = vrot.slane %v473_v47, 4 }
  0x83   :  { %v437_v17 = vrot.slane %v436_v44, 2  ;;  %v462_v16 = vadd.f32 %v461_v59, %v460_v13  ;;  %v450_v23 = vrot.slane %v449_v41, 2  ;;  %v485_v35 = vsel %vm105_vm0, %v4869_v7, 0.0 }
  0x84   :  { %v399_v24 = vadd.f32 %v398_v61, %v397_v49  ;;  %v412_v26 = vadd.f32 %v411_v53, %v410_v40  ;;  %v425_v46 = vadd.f32 %v424_v34, %v423_v37  ;;  %v475_v8 = vadd.f32 %v474_v38, %v473_v47  ;;  %v4908_v61 = vld [vmem:[%s6807_s0 + $0xe0] sm:$0xff]  ;;  %v4913_v53 = vld [vmem:[%s6807_s0 + $0x48] sm:$0xff]  ;;  %v4926_v38 = vld [vmem:[%s6807_s0 + $0x130] sm:$0xff] }
  0x85   :  { %v438_v43 = vadd.f32 %v437_v17, %v436_v44  ;;  %v463_v32 = vrot.slane %v462_v16, 2  ;;  %v451_v31 = vadd.f32 %v450_v23, %v449_v41  ;;  %v486_v25 = vadd.f32 %v485_v35, %v484_v20  ;;  %v4918_v41 = vld [vmem:[%s6807_s0 + $0x98] sm:$0xff]  ;;  %v4935_v35 = vld [vmem:[%s6807_s0 + $0xe8] sm:$0xff] }
  0x86   :  { %v400_v51 = vrot.slane %v399_v24, 1  ;;  %v413_v52 = vrot.slane %v412_v26, 1  ;;  %v426_v60 = vrot.slane %v425_v46, 1  ;;  %v476_v27 = vrot.slane %v475_v8, 2 }
  0x87   :  { %v439_v62 = vrot.slane %v438_v43, 1  ;;  %v464_v22 = vadd.f32 %v463_v32, %v462_v16  ;;  %v452_v54 = vrot.slane %v451_v31, 1  ;;  %v487_v0 = vrot.slane %v486_v25, 4 }
  0x88   :  { %v401_v39 = vadd.f32 %v400_v51, %v399_v24  ;;  %v414_v58 = vadd.f32 %v413_v52, %v412_v26  ;;  %v427_v56 = vadd.f32 %v426_v60, %v425_v46  ;;  %v477_v7 = vadd.f32 %v476_v27, %v475_v8  ;;  %v4944_v60 = vld [vmem:[%s6807_s0 + $0x180] sm:$0xff] }
  0x89   :  { %v440_v48 = vadd.f32 %v439_v62, %v438_v43  ;;  %v465_v4 = vrot.slane %v464_v22, 1  ;;  %v453_v5 = vadd.f32 %v452_v54, %v451_v31  ;;  %v488_v9 = vadd.f32 %v487_v0, %v486_v25 }
  0x8a   :  { %v525_v12 = vmul.f32 0.020408163, %v401_v39  ;;  %v526_v6 = vmul.f32 0.020408163, %v414_v58  ;;  %v478_v19 = vrot.slane %v477_v7, 1  ;;  %v574_v59 = vlaneseq }
  0x8b   :  { %v466_v18 = vadd.f32 %v465_v4, %v464_v22  ;;  %v527_v57 = vmul.f32 0.020408163, %v427_v56  ;;  %v528_v1 = vmul.f32 0.020408163, %v440_v48  ;;  %v489_v63 = vrot.slane %v488_v9, 2  ;;  %v4951_v22 = vld [vmem:[%s6807_s0 + $0x138] sm:$0xff] }
  0x8c   :  { %v529_v14 = vmul.f32 0.020408163, %v453_v5  ;;  %v537_v55 = vadd.f32 1e-05, %v525_v12  ;;  %v479_v3 = vadd.f32 %v478_v19, %v477_v7  ;;  %v538_v36 = vadd.f32 1e-05, %v526_v6 }
  0x8d   :  { %v530_v28 = vmul.f32 0.020408163, %v466_v18  ;;  %v539_v30 = vadd.f32 1e-05, %v527_v57  ;;  %v490_v29 = vadd.f32 %v489_v63, %v488_v9  ;;  %v540_v50 = vadd.f32 1e-05, %v528_v1 }
  0x8e   :  { %v541_v45 = vadd.f32 1e-05, %v529_v14  ;;  %3943 = vrsqrt.f32 %v537_v55  ;;  %v531_v2 = vmul.f32 0.020408163, %v479_v3  ;;  %v3967_v37 = vmov 1966171168  }
  0x8f   :  { %v542_v13 = vadd.f32 1e-05, %v530_v28  ;;  %3945 = vrsqrt.f32 %v538_v36  ;;  %v491_v33 = vrot.slane %v490_v29, 1  ;;  %v572_v44 = vunpack.c.l.s4 %v3967_v37  ;;  %v4959_v48 = vld [vmem:[%s6807_s0 + $0x1d0] sm:$0xff]  ;;  %v4966_v5 = vld [vmem:[%s6807_s0 + $0x188] sm:$0xff]  ;;  %v4983_v55 = vld [vmem:[%s6807_s0 + $0x1d8] sm:$0xff] }
  0x90   :  { %3947 = vrsqrt.f32 %v539_v30  ;;  %v543_v49 = vadd.f32 1e-05, %v531_v2  ;;  %v205_v47 = vadd.f32 %v4901_v10, %v4896_v21  ;;  %v4920_v20 = vshrl.u32 %v574_v59, 7  ;;  %v4971_v9 = vld [vmem:[%s6807_s0 + $0x220] sm:$0x1] }
  0x91   :  { %3949 = vrsqrt.f32 %v540_v50  ;;  %v492_v11 = vadd.f32 %v491_v33, %v490_v29  ;;  %v573_v15 = vunpack.c.0.s8 %v572_v44  ;;  %v219_v24 = vsel %vm218_vm1, %v4913_v53, 0.0  ;;  %v5003_v33 = vld [vmem:[%s6807_s0 + $0x228] sm:$0x1] }
  0x92   :  { %3951 = vrsqrt.f32 %v541_v45  ;;  %v206_v17 = vadd.f32 %v205_v47, %v4908_v61  ;;  %v220_v26 = vsel %vm218_vm1, %v4918_v41, 0.0  ;;  %v222_v62 = vsel %vm218_vm1, %v4935_v35, 0.0  ;;  %v535_v45 = vld [vmem:[%s6808_s1] sm:$0xff] }
  0x93   :  { %3953 = vrsqrt.f32 %v542_v13  ;;  %v532_v40 = vmul.f32 0.020408163, %v492_v11  ;;  %v4938_v32 = vsub.s32 %v573_v15, %v4920_v20  ;;  %v221_v31 = vadd.f32 %v220_v26, %v219_v24  ;;  %v4998_v13 = vld [vmem:[%s6809_s2] sm:$0xff] }
  0x94   :  { %3955 = vrsqrt.f32 %v543_v49  ;;  %v207_v52 = vadd.f32 %v206_v17, %v4926_v38  ;;  %v224_v4 = vsel %vm218_vm1, %v4951_v22, 0.0  ;;  %v210_v63 = vsel %vm105_vm0, %v4971_v9, 0.0 }
  0x95   :  { %v544_v42 = vadd.f32 1e-05, %v532_v40  ;;  %v223_v56 = vadd.f32 %v222_v62, %v221_v31  ;;  %v226_v14 = vsel %vm218_vm1, %v4966_v5, 0.0  ;;  %v228_v50 = vsel %vm218_vm1, %v4983_v55, 0.0 }
  0x96   :  { %v208_v0 = vadd.f32 %v207_v52, %v4944_v60  ;;  %v4993_v2 = vsub.s32 1, %v4920_v20  ;;  %v651_v49 = vsub.s32 3, %v4920_v20  ;;  %v5007_v40 = vsub.s32 0, %v4920_v20 }
  0x97   :  { %3957 = vrsqrt.f32 %v544_v42  ;;  %v225_v57 = vadd.f32 %v224_v4, %v223_v56  ;;  %v647_v42 = vsub.s32 2, %v4920_v20  ;;  %v659_v37 = vsub.s32 5, %v4920_v20  ;;  %v7033_v4 = vld [vmem:[#allocation40_spill] sm:$0xff] }
  0x98   :  { %v209_v19 = vadd.f32 %v208_v0, %v4959_v48  ;;  %v5015_v15 = vrot.slane %v4998_v13, %v4993_v2  ;;  %v231_v17 = vsel %vm230_vm2, %v5003_v33, 0.0  ;;  %v7032_v0 = vld [vmem:[#allocation34_spill] sm:$0xff] }
  0x99   :  { %v227_v30 = vadd.f32 %v226_v14, %v225_v57  ;;  %v5027_v24 = vrot.slane %v4998_v13, %v647_v42  ;;  %v5030_v26 = vrot.slane %v4998_v13, %v659_v37  ;;  %v7036_v57 = vld [vmem:[#allocation32_spill] sm:$0xff] }
  0x9a   :  { %v211_v36 = vadd.f32 %v210_v63, %v209_v19  ;;  %v7037_v63 = vld [vmem:[#allocation36_spill] sm:$0xff] }
  0x9b   :  { %v3944_v34 = vpop.eup %3943  ;;  %v229_v59 = vadd.f32 %v228_v50, %v227_v30 }
  0x9c   :  { %v3946_v16 = vpop.eup %3945  ;;  %v212_v44 = vrot.slane %v211_v36, 4 }
  0x9d   :  { %v3948_v23 = vpop.eup %3947  ;;  %v567_v43 = vcombine.low %v3944_v34, %v3946_v16  ;;  %v5018_v34 = vrot.slane %v4998_v13, %v651_v49  ;;  %v5024_v16 = vrot.slane %v4998_v13, %v5007_v40  ;;  %v5057_v62 = vadd.f32 %v231_v17, %v229_v59 }
  0x9e   :  { %v3950_v46 = vpop.eup %3949 }
  0x9f   :  { %v3952_v8 = vpop.eup %3951  ;;  %v568_v51 = vcombine.low %v3948_v23, %v3950_v46  ;;  %v577_v39 = vrot.slane %v567_v43, %v4938_v32  ;;  %v667_v23 = vsub.s32 7, %v4920_v20 }
  0xa0   :  { %v3954_v25 = vpop.eup %3953 }
  0xa1   :  { %v569_v27 = vcombine.low %v3952_v8, %v3954_v25  ;;  %v584_v58 = vrot.slane %v568_v51, %v4938_v32  ;;  %v3956_v54 = vpop.eup %3955  ;;  %v5053_v31 = vrot.slane %v4998_v13, %v667_v23  ;;  %v5055_v25 = vadd.f32 %v212_v44, %v211_v36 }
  0xa3   :  { %v591_v6 = vrot.slane %v569_v27, %v4938_v32  ;;  %v599_v18 = vcombine.low %v577_v39, %v584_v58  ;;  %v7030_v27 = vld [vmem:[#allocation31_spill] sm:$0xff] }
  0xa4   :  { %v3958_v7 = vpop.eup %3957  ;;  %v7031_v58 = vld [vmem:[#allocation35_spill] sm:$0xff] }
  0xa5   :  { %v570_v12 = vcombine.low %v3956_v54, %v3958_v7  ;;  %v607_v28 = vrot.slane %v599_v18, %v4938_v32  ;;  %v7035_v18 = vld [vmem:[#allocation33_spill] sm:$0xff] }
  0xa7   :  { %v598_v1 = vrot.slane %v570_v12, %v4938_v32  ;;  %v7034_v12 = vld [vmem:[#allocation30_spill] sm:$0xff] }
  0xa9   :  { %v600_v3 = vcombine.low %v591_v6, %v598_v1 }
  0xab   :  { %v614_v29 = vrot.slane %v600_v3, %v4938_v32 }
  0xad   :  { %v615_v11 = vcombine.low %v607_v28, %v614_v29 }
  0xaf   :  { %v5011_v47 = vmul.f32 %v615_v11, %v535_v45 }
  0xb1   :  { %v5035_v46 = vrot.slane %v5011_v47, %v4993_v2  ;;  %v5038_v43 = vrot.slane %v5011_v47, %v651_v49  ;;  %v5042_v8 = vrot.slane %v5011_v47, %v5007_v40  ;;  %v5045_v51 = vrot.slane %v5011_v47, %v647_v42 }
  0xb2   :  { %v5048_v52 = vrot.slane %v5011_v47, %v659_v37 }
  0xb3   :  { %v688_v39 = vmul.f32 %v5035_v46, %v7030_v27  ;;  %v698_v54 = vmul.f32 %v5035_v46, %v7031_v58  ;;  %v690_v56 = vmul.f32 %v5038_v43, %v7032_v0  ;;  %v700_v7 = vmul.f32 %v5038_v43, %v7033_v4  ;;  %v3733_v0 = vld [vmem:[%s6806_s3 + $0x270] ss:$8 sps:$4 sm:$0xff]   ;;  %v7038_v4 = vld [vmem:[#allocation47_spill] sm:$0xff] }
  0xb4   :  { %v687_v6 = vmul.f32 %v5042_v8, %v7034_v12  ;;  %v697_v19 = vmul.f32 %v5042_v8, %v7035_v18  ;;  %v689_v1 = vmul.f32 %v5045_v51, %v7036_v57  ;;  %v699_v14 = vmul.f32 %v5045_v51, %v7037_v63  ;;  %v7039_v12 = vld [vmem:[#allocation55_spill] sm:$0xff]  ;;  %v7040_v63 = vld [vmem:[#allocation49_spill] sm:$0xff] }
  0xb5   :  { %v812_v3 = vadd.f32 %v5015_v15, %v688_v39  ;;  %v822_v28 = vadd.f32 %v5015_v15, %v698_v54  ;;  %v814_v36 = vadd.f32 %v5018_v34, %v690_v56  ;;  %v824_v30 = vadd.f32 %v5018_v34, %v700_v7  ;;  %v3736_v56 = vld [vmem:[%s6806_s3 + $0x370] ss:$8 sps:$4 sm:$0xff]   ;;  %v3741_v57 = vld [vmem:[%s6806_s3 + $0x264] ss:$8 sps:$4 sm:$0xff]  }
  0xb6   :  { %v811_v29 = vadd.f32 %v5024_v16, %v687_v6  ;;  %v821_v50 = vadd.f32 %v5024_v16, %v697_v19  ;;  %v813_v45 = vadd.f32 %v5027_v24, %v689_v1  ;;  %v823_v11 = vadd.f32 %v5027_v24, %v699_v14  ;;  %v3744_v1 = vld [vmem:[%s6806_s3 + $0x364] ss:$8 sps:$4 sm:$0xff]  }
  0xb7   :  { %v882_v49 = vmax.f32 %v812_v3, 0.0  ;;  %v892_v42 = vmax.f32 %v822_v28, 0.0  ;;  %v884_v37 = vmax.f32 %v814_v36, 0.0  ;;  %v894_v44 = vmax.f32 %v824_v30, 0.0  ;;  %v7041_v3 = vld [vmem:[#allocation57_spill] sm:$0xff] }
  0xb8   :  { %v881_v59 = vmax.f32 %v811_v29, 0.0  ;;  %v891_v17 = vmax.f32 %v821_v50, 0.0  ;;  %v883_v27 = vmax.f32 %v813_v45, 0.0  ;;  %v893_v39 = vmax.f32 %v823_v11, 0.0  ;;  %v7042_v29 = vld [vmem:[#allocation46_spill] sm:$0xff] }
  0xb9   :  { %v952_v58 = vpack.c.bf16 %v892_v42, %v882_v49  ;;  %v954_v54 = vpack.c.bf16 %v894_v44, %v884_v37  ;;  %v708_v7 = vmul.f32 %v5035_v46, %v7038_v4  ;;  %v718_v6 = vmul.f32 %v5035_v46, %v7039_v12  ;;  %v7043_v42 = vld [vmem:[#allocation54_spill] sm:$0xff] }
  0xba   :  { %v951_v18 = vpack.c.bf16 %v891_v17, %v881_v59  ;;  %v953_v19 = vpack.c.bf16 %v893_v39, %v883_v27  ;;  %v710_v14 = vmul.f32 %v5038_v43, %v7040_v63  ;;  %v720_v28 = vmul.f32 %v5038_v43, %v7041_v3  ;;  %v3739_v59 = vld [vmem:[%s6806_s3 + $0x260] ss:$8 sps:$4 sm:$0xff]  }
  0xbb   :  { %1971 = vmatprep.mubr.bf16.mxu0 %v952_v58  ;;  %2042 = vmatprep.mubr.bf16.mxu1 %v954_v54  ;;  %v832_v36 = vadd.f32 %v5015_v15, %v708_v7  ;;  %v842_v30 = vadd.f32 %v5015_v15, %v718_v6  ;;  %v707_v50 = vmul.f32 %v5042_v8, %v7042_v29  ;;  %v214_v45 = vrot.slane %v5055_v25, 2  ;;  %v3742_v17 = vld [vmem:[%s6806_s3 + $0x360] ss:$8 sps:$4 sm:$0xff]   ;;  %v7044_v54 = vld [vmem:[#allocation48_spill] sm:$0xff] }
  0xbc   :  { %1972 = vmatmul.mubr.bf16.vlgmr.msra.gmra.mxu0 %v951_v18  ;;  %2043 = vmatmul.mubr.bf16.vlgmr.msra.gmra.mxu1 %v953_v19  ;;  %v834_v11 = vadd.f32 %v5018_v34, %v710_v14  ;;  %v844_v49 = vadd.f32 %v5018_v34, %v720_v28  ;;  %v717_v37 = vmul.f32 %v5042_v8, %v7043_v42  ;;  %v233_v44 = vrot.slane %v5057_v62, 4  ;;  %v7045_v18 = vld [vmem:[#allocation56_spill] sm:$0xff]  ;;  %v7047_v29 = vld [vmem:[#allocation15_spill] sm:$0xff] }
  0xbd   :  { %2082 = vmatpush1.bf16.msra.mxu0 %v3733_v0  ;;  %2153 = vmatpush1.bf16.msra.mxu1 %v3736_v56  ;;  %v902_v27 = vmax.f32 %v832_v36, 0.0  ;;  %v912_v39 = vmax.f32 %v842_v30, 0.0  ;;  %v831_v58 = vadd.f32 %v5024_v16, %v707_v50  ;;  %v709_v4 = vmul.f32 %v5045_v51, %v7044_v54  ;;  %v3747_v0 = vld [vmem:[%s6806_s3 + $0x254] ss:$8 sps:$4 sm:$0xff]  }
  0xbe   :  { %2083 = vmatprep.subr.bf16.mxu0 %v3741_v57  ;;  %2154 = vmatprep.subr.bf16.mxu1 %v3744_v1  ;;  %v3750_v56 = vld [vmem:[%s6806_s3 + $0x354] ss:$8 sps:$4 sm:$0xff]   ;;  %v904_v7 = vmax.f32 %v834_v11, 0.0  ;;  %v914_v12 = vmax.f32 %v844_v49, 0.0  ;;  %v841_v6 = vadd.f32 %v5024_v16, %v717_v37  ;;  %v719_v19 = vmul.f32 %v5045_v51, %v7045_v18  ;;  %v7046_v1 = vld [vmem:[#allocation7_spill] sm:$0xff] }
  0xbf   :  { %v962_v63 = vpack.c.bf16 %v912_v39, %v902_v27  ;;  %v901_v14 = vmax.f32 %v831_v58, 0.0  ;;  %v833_v57 = vadd.f32 %v5027_v24, %v709_v4  ;;  %v728_v3 = vmul.f32 %v5035_v46, %v7046_v1  ;;  %v3745_v11 = vld [vmem:[%s6806_s3 + $0x250] ss:$8 sps:$4 sm:$0xff]  }
  0xc0   :  { %v964_v28 = vpack.c.bf16 %v914_v12, %v904_v7  ;;  %v911_v36 = vmax.f32 %v841_v6, 0.0  ;;  %v843_v30 = vadd.f32 %v5027_v24, %v719_v19  ;;  %v738_v50 = vmul.f32 %v5035_v46, %v7047_v29  ;;  %v3748_v49 = vld [vmem:[%s6806_s3 + $0x350] ss:$8 sps:$4 sm:$0xff]   ;;  %v7050_v6 = vld [vmem:[#allocation6_spill] sm:$0xff] }
  0xc1   :  { %2084 = vmatpush1.bf16.msra.mxu0 %v3739_v59  ;;  %2155 = vmatpush1.bf16.msra.mxu1 %v3742_v17  ;;  %v903_v42 = vmax.f32 %v833_v57, 0.0  ;;  %v852_v37 = vadd.f32 %v5015_v15, %v728_v3  ;;  %v7048_v27 = vld [vmem:[#allocation9_spill] sm:$0xff]  ;;  %v3753_v59 = vld [vmem:[%s6806_s3 + $0x244] ss:$8 sps:$4 sm:$0xff]   ;;  %v727_v18 = vmul.f32 %v5042_v8, %v7050_v6 }
  0xc2   :  { %v730_v39 = vmul.f32 %v5038_v43, %v7048_v27  ;;  %v7049_v58 = vld [vmem:[#allocation17_spill] sm:$0xff]  ;;  %2085 = vmatprep.subr.bf16.mxu0 %v3747_v0  ;;  %2156 = vmatprep.subr.bf16.mxu1 %v3750_v56  ;;  %v3756_v17 = vld [vmem:[%s6806_s3 + $0x344] ss:$8 sps:$4 sm:$0xff]   ;;  %v961_v4 = vpack.c.bf16 %v911_v36, %v901_v14  ;;  %v913_v7 = vmax.f32 %v843_v30, 0.0  ;;  %v862_v12 = vadd.f32 %v5015_v15, %v738_v50  ;;  %v7052_v36 = vld [vmem:[#allocation8_spill] sm:$0xff] }
  0xc3   :  { %v740_v54 = vmul.f32 %v5038_v43, %v7049_v58  ;;  %1981 = vmatprep.mubr.bf16.mxu0 %v962_v63  ;;  %2052 = vmatprep.mubr.bf16.mxu1 %v964_v28  ;;  %v922_v19 = vmax.f32 %v852_v37, 0.0  ;;  %v7051_v57 = vld [vmem:[#allocation14_spill] sm:$0xff]  ;;  %v851_v14 = vadd.f32 %v5024_v16, %v727_v18  ;;  %v729_v30 = vmul.f32 %v5045_v51, %v7052_v36  ;;  %v7053_v27 = vld [vmem:[#allocation16_spill] sm:$0xff] }
  0xc4   :  { %v854_v0 = vadd.f32 %v5018_v34, %v730_v39  ;;  %v737_v1 = vmul.f32 %v5042_v8, %v7051_v57  ;;  %1982 = vmatmul.mubr.bf16.gmra.mxu0 %v961_v4  ;;  %v963_v3 = vpack.c.bf16 %v913_v7, %v903_v42  ;;  %v932_v29 = vmax.f32 %v862_v12, 0.0  ;;  %v3751_v63 = vld [vmem:[%s6806_s3 + $0x240] ss:$8 sps:$4 sm:$0xff]  }
  0xc5   :  { %v864_v56 = vadd.f32 %v5018_v34, %v740_v54  ;;  %2086 = vmatpush1.bf16.msra.mxu0 %v3745_v11  ;;  %2157 = vmatpush1.bf16.msra.mxu1 %v3748_v49  ;;  %v3754_v28 = vld [vmem:[%s6806_s3 + $0x340] ss:$8 sps:$4 sm:$0xff]   ;;  %v739_v39 = vmul.f32 %v5045_v51, %v7053_v27  ;;  %v3759_v11 = vld [vmem:[%s6806_s3 + $0x234] ss:$8 sps:$4 sm:$0xff]   ;;  %v921_v54 = vmax.f32 %v851_v14, 0.0  ;;  %v853_v4 = vadd.f32 %v5027_v24, %v729_v30 }
  0xc6   :  { %v924_v50 = vmax.f32 %v854_v0, 0.0  ;;  %v861_v42 = vadd.f32 %v5024_v16, %v737_v1  ;;  %2087 = vmatprep.subr.bf16.mxu0 %v3753_v59  ;;  %2158 = vmatprep.subr.bf16.mxu1 %v3756_v17  ;;  %v3762_v49 = vld [vmem:[%s6806_s3 + $0x334] ss:$8 sps:$4 sm:$0xff]   ;;  %v972_v58 = vpack.c.bf16 %v932_v29, %v922_v19  ;;  %v7054_v7 = vld [vmem:[#allocation23_spill] sm:$0xff]  ;;  %v7055_v17 = vld [vmem:[#allocation22_spill] sm:$0xff] }
  0xc7   :  { %v934_v37 = vmax.f32 %v864_v56, 0.0  ;;  %v748_v12 = vmul.f32 %v5035_v46, %v7054_v7  ;;  %2053 = vmatmul.mubr.bf16.gmra.mxu1 %v963_v3  ;;  %v863_v59 = vadd.f32 %v5027_v24, %v739_v39  ;;  %v747_v0 = vmul.f32 %v5042_v8, %v7055_v17  ;;  %v7056_v1 = vld [vmem:[#allocation25_spill] sm:$0xff]  ;;  %v7057_v29 = vld [vmem:[#allocation24_spill] sm:$0xff]  ;;  %v7058_v30 = vld [vmem:[#allocation38_spill] sm:$0xff] }
  0xc8   :  { %v931_v18 = vmax.f32 %v861_v42, 0.0  ;;  %1991 = vmatprep.mubr.bf16.mxu0 %v972_v58  ;;  %v923_v56 = vmax.f32 %v853_v4, 0.0  ;;  %v750_v19 = vmul.f32 %v5038_v43, %v7056_v1  ;;  %v749_v14 = vmul.f32 %v5045_v51, %v7057_v29  ;;  %v3757_v46 = vld [vmem:[%s6806_s3 + $0x230] ss:$8 sps:$4 sm:$0xff]   ;;  %v3765_v51 = vld [vmem:[%s6806_s3 + $0x224] ss:$8 sps:$4 sm:$0xff]  }
  0xc9   :  { %v974_v6 = vpack.c.bf16 %v934_v37, %v924_v50  ;;  %v872_v57 = vadd.f32 %v5015_v15, %v748_v12  ;;  %2088 = vmatpush1.bf16.msra.mxu0 %v3751_v63  ;;  %2159 = vmatpush1.bf16.msra.mxu1 %v3754_v28  ;;  %v3760_v8 = vld [vmem:[%s6806_s3 + $0x330] ss:$8 sps:$4 sm:$0xff]   ;;  %v933_v36 = vmax.f32 %v863_v59, 0.0  ;;  %v871_v15 = vadd.f32 %v5024_v16, %v747_v0  ;;  %v3768_v63 = vld [vmem:[%s6806_s3 + $0x324] ss:$8 sps:$4 sm:$0xff]  }
  0xca   :  { %v971_v3 = vpack.c.bf16 %v931_v18, %v921_v54  ;;  %v692_v43 = vmul.f32 %v5048_v52, %v7058_v30  ;;  %2089 = vmatprep.subr.bf16.mxu0 %v3759_v11  ;;  %2160 = vmatprep.subr.bf16.mxu1 %v3762_v49  ;;  %v874_v50 = vadd.f32 %v5018_v34, %v750_v19  ;;  %v7059_v37 = vld [vmem:[#allocation43_spill] sm:$0xff]  ;;  %v7060_v12 = vld [vmem:[#allocation41_spill] sm:$0xff] }
  0xcb   :  { %v942_v28 = vmax.f32 %v872_v57, 0.0  ;;  %v702_v42 = vmul.f32 %v5048_v52, %v7059_v37  ;;  %v5211_v16 = vrot.slane %v5011_v47, %v667_v23  ;;  %2062 = vmatprep.mubr.bf16.mxu1 %v974_v6  ;;  %v973_v27 = vpack.c.bf16 %v933_v36, %v923_v56  ;;  %v3763_v23 = vld [vmem:[%s6806_s3 + $0x220] ss:$8 sps:$4 sm:$0xff]   ;;  %v7061_v56 = vld [vmem:[#allocation45_spill] sm:$0xff] }
  0xcc   :  { %v873_v39 = vadd.f32 %v5027_v24, %v749_v14  ;;  %v816_v11 = vadd.f32 %v5030_v26, %v692_v43  ;;  %v234_v49 = vadd.f32 %v233_v44, %v5057_v62  ;;  %1992 = vmatmul.mubr.bf16.gmra.mxu0 %v971_v3  ;;  %v941_v58 = vmax.f32 %v871_v15, 0.0  ;;  %v3766_v24 = vld [vmem:[%s6806_s3 + $0x320] ss:$8 sps:$4 sm:$0xff]   ;;  %v3771_v62 = vld [vmem:[%s6806_s3 + $0x214] ss:$8 sps:$4 sm:$0xff]  }
  0xcd   :  { %v982_v34 = vpack.c.bf16 %v942_v28, %v942_v28  ;;  %v944_v54 = vmax.f32 %v874_v50, 0.0  ;;  %v826_v4 = vadd.f32 %v5030_v26, %v702_v42  ;;  %2090 = vmatpush1.bf16.msra.mxu0 %v3757_v46  ;;  %2161 = vmatpush1.bf16.msra.mxu1 %v3760_v8  ;;  %v3774_v44 = vld [vmem:[%s6806_s3 + $0x314] ss:$8 sps:$4 sm:$0xff]   ;;  %v694_v6 = vmul.f32 %v5211_v16, %v7060_v12  ;;  %v3769_v14 = vld [vmem:[%s6806_s3 + $0x210] ss:$8 sps:$4 sm:$0xff]  }
  0xce   :  { %2091 = vmatprep.subr.bf16.mxu0 %v3765_v51  ;;  %2162 = vmatprep.subr.bf16.mxu1 %v3768_v63  ;;  %v215_v18 = vadd.f32 %v214_v45, %v5055_v25  ;;  %v943_v59 = vmax.f32 %v873_v39, 0.0  ;;  %v886_v17 = vmax.f32 %v816_v11, 0.0  ;;  %v704_v57 = vmul.f32 %v5211_v16, %v7061_v56  ;;  %v3772_v25 = vld [vmem:[%s6806_s3 + $0x310] ss:$8 sps:$4 sm:$0xff]   ;;  %v3777_v46 = vld [vmem:[%s6806_s3 + $0x204] ss:$8 sps:$4 sm:$0xff]  }
  0xcf   :  { %v984_v7 = vpack.c.bf16 %v944_v54, %v944_v54  ;;  %2063 = vmatmul.mubr.bf16.gmra.mxu1 %v973_v27  ;;  %2001 = vmatprep.mubr.bf16.mxu0 %v982_v34  ;;  %v896_v0 = vmax.f32 %v826_v4, 0.0  ;;  %v981_v1 = vpack.c.bf16 %v941_v58, %v941_v58  ;;  %v818_v19 = vadd.f32 %v5053_v31, %v694_v6  ;;  %v3780_v8 = vld [vmem:[%s6806_s3 + $0x304] ss:$8 sps:$4 sm:$0xff]   ;;  %v3775_v63 = vld [vmem:[%s6806_s3 + $0x200] ss:$8 sps:$4 sm:$0xff]  }
  0xd0   :  { %v235_v29 = vrot.slane %v234_v49, 2  ;;  %v828_v45 = vadd.f32 %v5053_v31, %v704_v57  ;;  %v216_v36 = vrot.slane %v215_v18, 1  ;;  %v983_v15 = vpack.c.bf16 %v943_v59, %v943_v59  ;;  %v3778_v28 = vld [vmem:[%s6806_s3 + $0x300] ss:$8 sps:$4 sm:$0xff]   ;;  %v3783_v37 = vld [vmem:[%s6806_s3 + $0x2f4] ss:$8 sps:$4 sm:$0xff]  }
  0xd1   :  { %2072 = vmatprep.mubr.bf16.mxu1 %v984_v7  ;;  %2092 = vmatpush1.bf16.msra.mxu0 %v3763_v23  ;;  %v888_v3 = vmax.f32 %v818_v19, 0.0  ;;  %v956_v30 = vpack.c.bf16 %v896_v0, %v886_v17  ;;  %v3786_v42 = vld [vmem:[%s6806_s3 + $0x3f4] ss:$8 sps:$4 sm:$0xff]   ;;  %v3781_v11 = vld [vmem:[%s6806_s3 + $0x2f0] ss:$8 sps:$4 sm:$0xff]   ;;  %v655_v4 = vsub.s32 4, %v4920_v20 }
  0xd2   :  { %2163 = vmatpush1.bf16.msra.mxu1 %v3766_v24  ;;  %2093 = vmatprep.subr.bf16.mxu0 %v3771_v62  ;;  %v898_v43 = vmax.f32 %v828_v45, 0.0  ;;  %v236_v51 = vadd.f32 %v235_v29, %v234_v49  ;;  %v217_v27 = vadd.f32 %v216_v36, %v215_v18  ;;  %v3784_v49 = vld [vmem:[%s6806_s3 + $0x3f0] ss:$8 sps:$4 sm:$0xff]   ;;  %v3789_v34 = vld [vmem:[%s6806_s3 + $0x2e4] ss:$8 sps:$4 sm:$0xff]   ;;  %v663_v59 = vsub.s32 6, %v4920_v20 }
  0xd3   :  { %2164 = vmatprep.subr.bf16.mxu1 %v3774_v44  ;;  %v3792_v58 = vld [vmem:[%s6806_s3 + $0x3e4] ss:$8 sps:$4 sm:$0xff]   ;;  %v3787_v24 = vld [vmem:[%s6806_s3 + $0x2e0] ss:$8 sps:$4 sm:$0xff]   ;;  %v3795_v44 = vld [vmem:[%s6806_s3 + $0x2d4] ss:$8 sps:$4 sm:$0xff]   ;;  %v5296_v18 = vrot.slane %v5011_v47, %v655_v4  ;;  %v5312_v57 = vrot.slane %v4998_v13, %v655_v4 }
  0xd4   :  { %2002 = vmatmul.mubr.bf16.gmra.mxu0 %v981_v1  ;;  %v958_v50 = vpack.c.bf16 %v898_v43, %v888_v3  ;;  %v237_v39 = vrot.slane %v236_v51, 1  ;;  %v247_v54 = vmul.f32 0.020408163, %v217_v27  ;;  %v3790_v62 = vld [vmem:[%s6806_s3 + $0x3e0] ss:$8 sps:$4 sm:$0xff]   ;;  %v7062_v29 = vld [vmem:[#allocation37_spill] sm:$0xff] }
  0xd5   :  { %2094 = vmatpush1.bf16.msra.mxu0 %v3769_v14  ;;  %2113 = vmatprep.mubr.bf16.mxu0 %v956_v30  ;;  %v3798_v7 = vld [vmem:[%s6806_s3 + $0x3d4] ss:$8 sps:$4 sm:$0xff]   ;;  %v3804_v1 = vld [vmem:[%s6806_s3 + $0x3c4] ss:$8 sps:$4 sm:$0xff]   ;;  %v691_v14 = vmul.f32 %v5296_v18, %v7062_v29 }
  0xd6   :  { %2165 = vmatpush1.bf16.msra.mxu1 %v3772_v25  ;;  %2095 = vmatprep.subr.bf16.mxu0 %v3777_v46  ;;  %v238_v23 = vadd.f32 %v237_v39, %v236_v51  ;;  %v5290_v12 = vsub.f32 %v4896_v21, %v247_v54  ;;  %v5293_v6 = vsub.f32 %v4901_v10, %v247_v54  ;;  %v3793_v21 = vld [vmem:[%s6806_s3 + $0x2d0] ss:$8 sps:$4 sm:$0xff]   ;;  %v3807_v30 = vld [vmem:[%s6806_s3 + $0x2b4] ss:$8 sps:$4 sm:$0xff]  }
  0xd7   :  { %2166 = vmatprep.subr.bf16.mxu1 %v3780_v8  ;;  %2073 = vmatmul.mubr.bf16.gmra.mxu1 %v983_v15  ;;  %v5300_v17 = vsub.f32 %v4908_v61, %v247_v54  ;;  %v5303_v56 = vsub.f32 %v4926_v38, %v247_v54  ;;  %v3796_v10 = vld [vmem:[%s6806_s3 + $0x3d0] ss:$8 sps:$4 sm:$0xff]   ;;  %v5315_v61 = vrot.slane %v4998_v13, %v663_v59  ;;  %v3801_v38 = vld [vmem:[%s6806_s3 + $0x2c4] ss:$8 sps:$4 sm:$0xff]   ;;  %v3810_v43 = vld [vmem:[%s6806_s3 + $0x3b4] ss:$8 sps:$4 sm:$0xff]  }
  0xd8   :  { %2184 = vmatprep.mubr.bf16.mxu1 %v958_v50  ;;  %v248_v0 = vmul.f32 0.020408163, %v238_v23  ;;  %v5318_v20 = vsub.f32 %v4944_v60, %v247_v54  ;;  %v5327_v19 = vsub.f32 %v4959_v48, %v247_v54  ;;  %v327_v13 = vmul.f32 %v5290_v12, %v5290_v12  ;;  %v7064_v50 = vld [vmem:[#allocation39_spill] sm:$0xff] }
  0xd9   :  { %2096 = vmatpush1.bf16.msra.mxu0 %v3775_v63  ;;  %v337_v60 = vmul.f32 %v5293_v6, %v5293_v6  ;;  %v5336_v25 = vrot.slane %v5011_v47, %v663_v59  ;;  %v5339_v45 = vsub.f32 %v4971_v9, %v247_v54  ;;  %v347_v46 = vmul.f32 %v5300_v17, %v5300_v17  ;;  %v3799_v9 = vld [vmem:[%s6806_s3 + $0x2c0] ss:$8 sps:$4 sm:$0xff]   ;;  %v7065_v54 = vld [vmem:[#allocation44_spill] sm:$0xff] }
  0xda   :  { %2167 = vmatpush1.bf16.msra.mxu1 %v3778_v28  ;;  %2097 = vmatprep.subr.bf16.mxu0 %v3783_v37  ;;  %v5344_v48 = vsub.f32 %v4913_v53, %v248_v0  ;;  %v5347_v8 = vsub.f32 %v4918_v41, %v248_v0  ;;  %v5350_v3 = vsub.f32 %v4935_v35, %v248_v0  ;;  %v3802_v53 = vld [vmem:[%s6806_s3 + $0x3c0] ss:$8 sps:$4 sm:$0xff]  }
  0xdb   :  { %2168 = vmatprep.subr.bf16.mxu1 %v3786_v42  ;;  %v357_v36 = vmul.f32 %v5303_v56, %v5303_v56  ;;  %v7063_v47 = vld [vmem:[#allocation42_spill] sm:$0xff]  ;;  %v5363_v15 = vsub.f32 %v4951_v22, %v248_v0  ;;  %v367_v35 = vmul.f32 %v5318_v20, %v5318_v20  ;;  %v5374_v51 = vsub.f32 %v4966_v5, %v248_v0 }
  0xdc   :  { %v701_v41 = vmul.f32 %v5296_v18, %v7063_v47  ;;  %v377_v22 = vmul.f32 %v5327_v19, %v5327_v19  ;;  %v493_v63 = vadd.f32 %v337_v60, %v327_v13  ;;  %v5379_v28 = vadd.f32 %v5312_v57, %v691_v14  ;;  %v7067_v13 = vld [vmem:[#allocation3_spill] sm:$0xff] }
  0xdd   :  { %2098 = vmatpush2.bf16.msra.mxu0 %v3781_v11  ;;  %v693_v37 = vmul.f32 %v5336_v25, %v7064_v50  ;;  %v5384_v42 = vsub.f32 %v4983_v55, %v248_v0  ;;  %v387_v27 = vmul.f32 %v5339_v45, %v5339_v45  ;;  %v328_v5 = vmul.f32 %v5344_v48, %v5344_v48  ;;  %v3805_v55 = vld [vmem:[%s6806_s3 + $0x2b0] ss:$8 sps:$4 sm:$0xff]   ;;  %v3822_v50 = vld [vmem:[%s6806_s3 + $0x394] ss:$8 sps:$4 sm:$0xff]  }
  0xde   :  { %2169 = vmatpush2.bf16.msra.mxu1 %v3784_v49  ;;  %2099 = vmatprep.subr.bf16.mxu0 %v3789_v34  ;;  %v338_v39 = vmul.f32 %v5347_v8, %v5347_v8  ;;  %v348_v11 = vmul.f32 %v5350_v3, %v5350_v3  ;;  %v358_v49 = vmul.f32 %v5363_v15, %v5363_v15  ;;  %v3808_v34 = vld [vmem:[%s6806_s3 + $0x3b0] ss:$8 sps:$4 sm:$0xff]  }
  0xdf   :  { %2170 = vmatprep.subr.bf16.mxu1 %v3792_v58  ;;  %v5403_v58 = vadd.f32 %v5312_v57, %v701_v41  ;;  %v703_v4 = vmul.f32 %v5336_v25, %v7065_v54  ;;  %v5408_v23 = vsub.f32 %v5003_v33, %v248_v0  ;;  %v506_v59 = vsel %vm218_vm1, %v328_v5, 0.0  ;;  %v7066_v0 = vld [vmem:[#allocation51_spill] sm:$0xff]  ;;  %v7068_v41 = vld [vmem:[#allocation53_spill] sm:$0xff] }
  0xe0   :  { %v5421_v33 = vadd.f32 %v5315_v61, %v693_v37  ;;  %v722_v60 = vmul.f32 %v5048_v52, %v7067_v13  ;;  %v378_v29 = vmul.f32 %v5384_v42, %v5384_v42  ;;  %v7069_v37 = vld [vmem:[#allocation5_spill] sm:$0xff] }
  0xe1   :  { %2100 = vmatpush2.bf16.msra.mxu0 %v3787_v24  ;;  %v3813_v24 = vld [vmem:[%s6806_s3 + $0x2a4] ss:$8 sps:$4 sm:$0xff]   ;;  %v827_v47 = vadd.f32 %v5315_v61, %v703_v4  ;;  %v724_v5 = vmul.f32 %v5211_v16, %v7069_v37 }
  0xe2   :  { %2171 = vmatpush2.bf16.msra.mxu1 %v3790_v62  ;;  %2101 = vmatprep.subr.bf16.mxu0 %v3795_v44  ;;  %v3816_v62 = vld [vmem:[%s6806_s3 + $0x3a4] ss:$8 sps:$4 sm:$0xff]   ;;  %v368_v44 = vmul.f32 %v5374_v51, %v5374_v51 }
  0xe3   :  { %2172 = vmatprep.subr.bf16.mxu1 %v3798_v7  ;;  %v494_v7 = vadd.f32 %v493_v63, %v347_v46  ;;  %v511_v46 = vsel %vm218_vm1, %v358_v49, 0.0  ;;  %v3819_v63 = vld [vmem:[%s6806_s3 + $0x294] ss:$8 sps:$4 sm:$0xff]   ;;  %v885_v49 = vmax.f32 %v5379_v28, 0.0  ;;  %v3820_v28 = vld [vmem:[%s6806_s3 + $0x390] ss:$8 sps:$4 sm:$0xff]  }
  0xe4   :  { %v897_v13 = vmax.f32 %v827_v47, 0.0 }
  0xe5   :  { %2102 = vmatpush2.bf16.msra.mxu0 %v3793_v21  ;;  %v507_v21 = vsel %vm218_vm1, %v338_v39, 0.0  ;;  %v495_v14 = vadd.f32 %v494_v7, %v357_v36  ;;  %v388_v39 = vmul.f32 %v5408_v23, %v5408_v23 }
  0xe6   :  { %2173 = vmatpush2.bf16.msra.mxu1 %v3796_v10  ;;  %2103 = vmatprep.subr.bf16.mxu0 %v3801_v38  ;;  %v712_v10 = vmul.f32 %v5048_v52, %v7066_v0  ;;  %v508_v38 = vadd.f32 %v507_v21, %v506_v59  ;;  %v515_v21 = vsel %vm218_vm1, %v378_v29, 0.0  ;;  %v887_v0 = vmax.f32 %v5421_v33, 0.0 }
  0xe7   :  { %2174 = vmatprep.subr.bf16.mxu1 %v3804_v1  ;;  %v509_v1 = vsel %vm218_vm1, %v348_v11, 0.0  ;;  %v496_v11 = vadd.f32 %v495_v14, %v367_v35  ;;  %v3817_v35 = vld [vmem:[%s6806_s3 + $0x290] ss:$8 sps:$4 sm:$0xff]  }
  0xe8   :  { %v510_v36 = vadd.f32 %v509_v1, %v508_v38  ;;  %v3828_v1 = vld [vmem:[%s6806_s3 + $0x384] ss:$8 sps:$4 sm:$0xff]  }
  0xe9   :  { %2104 = vmatpush2.bf16.msra.mxu0 %v3799_v9  ;;  %v3811_v9 = vld [vmem:[%s6806_s3 + $0x2a0] ss:$8 sps:$4 sm:$0xff]   ;;  %v497_v59 = vadd.f32 %v496_v11, %v377_v22  ;;  %v3825_v22 = vld [vmem:[%s6806_s3 + $0x284] ss:$8 sps:$4 sm:$0xff]  }
  0xea   :  { %2175 = vmatpush2.bf16.msra.mxu1 %v3802_v53  ;;  %2105 = vmatprep.subr.bf16.mxu0 %v3807_v30  ;;  %v3814_v53 = vld [vmem:[%s6806_s3 + $0x3a0] ss:$8 sps:$4 sm:$0xff]   ;;  %v714_v30 = vmul.f32 %v5211_v16, %v7068_v41  ;;  %v512_v4 = vadd.f32 %v511_v46, %v510_v36  ;;  %v7072_v46 = vld [vmem:[#allocation52_spill] sm:$0xff] }
  0xeb   :  { %2176 = vmatprep.subr.bf16.mxu1 %v3810_v43  ;;  %v498_v43 = vsel %vm105_vm0, %v387_v27, 0.0  ;;  %v513_v27 = vsel %vm218_vm1, %v368_v44, 0.0  ;;  %v895_v44 = vmax.f32 %v5403_v58, 0.0  ;;  %v517_v58 = vsel %vm230_vm2, %v388_v39, 0.0  ;;  %v7073_v36 = vld [vmem:[#allocation4_spill] sm:$0xff]  ;;  %v7075_v11 = vld [vmem:[#allocation19_spill] sm:$0xff] }
  0xec   :  { %v514_v38 = vadd.f32 %v513_v27, %v512_v4  ;;  %v499_v29 = vadd.f32 %v498_v43, %v497_v59  ;;  %v723_v47 = vmul.f32 %v5336_v25, %v7073_v36  ;;  %v3823_v43 = vld [vmem:[%s6806_s3 + $0x280] ss:$8 sps:$4 sm:$0xff]   ;;  %v742_v27 = vmul.f32 %v5048_v52, %v7075_v11  ;;  %v7076_v4 = vld [vmem:[#allocation13_spill] sm:$0xff] }
  0xed   :  { %2106 = vmatpush2.bf16.msra.mxu0 %v3805_v55  ;;  %v836_v55 = vadd.f32 %v5030_v26, %v712_v10  ;;  %v838_v10 = vadd.f32 %v5053_v31, %v714_v30  ;;  %v7079_v36 = vld [vmem:[#allocation18_spill] sm:$0xff] }
  0xee   :  { %2177 = vmatpush2.bf16.msra.mxu1 %v3808_v34  ;;  %2107 = vmatprep.subr.bf16.mxu0 %v3813_v24  ;;  %v7070_v34 = vld [vmem:[#allocation50_spill] sm:$0xff]  ;;  %v846_v24 = vadd.f32 %v5030_v26, %v722_v60  ;;  %v848_v60 = vadd.f32 %v5053_v31, %v724_v5  ;;  %v7074_v5 = vld [vmem:[#allocation11_spill] sm:$0xff] }
  0xef   :  { %2178 = vmatprep.subr.bf16.mxu1 %v3816_v62  ;;  %v711_v54 = vmul.f32 %v5296_v18, %v7070_v34  ;;  %v7071_v62 = vld [vmem:[#allocation2_spill] sm:$0xff]  ;;  %v906_v33 = vmax.f32 %v836_v55, 0.0  ;;  %v908_v37 = vmax.f32 %v838_v10, 0.0  ;;  %v732_v39 = vmul.f32 %v5048_v52, %v7074_v5  ;;  %v3831_v34 = vld [vmem:[%s6806_s3 + $0x474] ss:$8 sps:$4 sm:$0xff]  }
  0xf0   :  { %v721_v7 = vmul.f32 %v5296_v18, %v7071_v62  ;;  %v916_v41 = vmax.f32 %v846_v24, 0.0  ;;  %v734_v24 = vmul.f32 %v5211_v16, %v7076_v4  ;;  %v7077_v62 = vld [vmem:[#allocation21_spill] sm:$0xff] }
  0xf1   :  { %2108 = vmatpush2.bf16.msra.mxu0 %v3811_v9  ;;  %v5478_v14 = vadd.f32 %v5312_v57, %v711_v54  ;;  %v713_v9 = vmul.f32 %v5336_v25, %v7072_v46  ;;  %v918_v54 = vmax.f32 %v848_v60, 0.0  ;;  %v3829_v60 = vld [vmem:[%s6806_s3 + $0x470] ss:$8 sps:$4 sm:$0xff]  }
  0xf2   :  { %2179 = vmatpush2.bf16.msra.mxu1 %v3814_v53  ;;  %2109 = vmatprep.subr.bf16.mxu0 %v3819_v63  ;;  %v516_v53 = vadd.f32 %v515_v21, %v514_v38  ;;  %v5483_v30 = vadd.f32 %v5312_v57, %v721_v7  ;;  %v500_v63 = vrot.slane %v499_v29, 4  ;;  %v744_v7 = vmul.f32 %v5211_v16, %v7077_v62  ;;  %v3837_v62 = vld [vmem:[%s6806_s3 + $0x454] ss:$8 sps:$4 sm:$0xff]  }
  0xf3   :  { %2180 = vmatprep.subr.bf16.mxu1 %v3822_v50  ;;  %v3826_v50 = vld [vmem:[%s6806_s3 + $0x380] ss:$8 sps:$4 sm:$0xff]   ;;  %v955_v21 = vpack.c.bf16 %v895_v44, %v885_v49  ;;  %v966_v38 = vpack.c.bf16 %v916_v41, %v906_v33  ;;  %v856_v49 = vadd.f32 %v5030_v26, %v732_v39  ;;  %v866_v44 = vadd.f32 %v5030_v26, %v742_v27 }
  0xf4   :  { %v518_v55 = vadd.f32 %v517_v58, %v516_v53  ;;  %v501_v59 = vadd.f32 %v500_v63, %v499_v29  ;;  %v915_v46 = vmax.f32 %v5483_v30, 0.0  ;;  %v968_v29 = vpack.c.bf16 %v918_v54, %v908_v37  ;;  %v7078_v41 = vld [vmem:[#allocation10_spill] sm:$0xff]  ;;  %v7081_v37 = vld [vmem:[#allocation20_spill] sm:$0xff]  ;;  %v7082_v54 = vld [vmem:[#allocation27_spill] sm:$0xff] }
  0xf5   :  { %2110 = vmatpush2.bf16.msra.mxu0 %v3817_v35  ;;  %v957_v35 = vpack.c.bf16 %v897_v13, %v887_v0  ;;  %v3834_v13 = vld [vmem:[%s6806_s3 + $0x464] ss:$8 sps:$4 sm:$0xff]   ;;  %v858_v33 = vadd.f32 %v5053_v31, %v734_v24  ;;  %v731_v30 = vmul.f32 %v5296_v18, %v7078_v41  ;;  %v743_v39 = vmul.f32 %v5336_v25, %v7081_v37  ;;  %v3832_v27 = vld [vmem:[%s6806_s3 + $0x460] ss:$8 sps:$4 sm:$0xff]   ;;  %v3843_v37 = vld [vmem:[%s6806_s3 + $0x434] ss:$8 sps:$4 sm:$0xff]  }
  0xf6   :  { %2181 = vmatpush2.bf16.msra.mxu1 %v3820_v28  ;;  %2111 = vmatprep.subr.bf16.mxu0 %v3825_v22  ;;  %v837_v28 = vadd.f32 %v5315_v61, %v713_v9  ;;  %v519_v10 = vrot.slane %v518_v55, 4  ;;  %v905_v22 = vmax.f32 %v5478_v14, 0.0  ;;  %v502_v58 = vrot.slane %v501_v59, 2 }
  0xf7   :  { %2182 = vmatprep.subr.bf16.mxu1 %v3828_v1  ;;  %v847_v1 = vadd.f32 %v5315_v61, %v723_v47  ;;  %v868_v14 = vadd.f32 %v5053_v31, %v744_v7  ;;  %v741_v47 = vmul.f32 %v5296_v18, %v7079_v36  ;;  %v752_v4 = vmul.f32 %v5048_v52, %v7082_v54  ;;  %v3846_v54 = vld [vmem:[%s6806_s3 + $0x424] ss:$8 sps:$4 sm:$0xff]  }
  0xf8   :  { %v520_v0 = vadd.f32 %v519_v10, %v518_v55  ;;  %v503_v9 = vadd.f32 %v502_v58, %v501_v59  ;;  %v907_v53 = vmax.f32 %v837_v28, 0.0  ;;  %v926_v55 = vmax.f32 %v856_v49, 0.0 }
  0xf9   :  { %2112 = vmatpush2.bf16.msra.mxu0 %v3823_v43  ;;  %v917_v43 = vmax.f32 %v847_v1, 0.0  ;;  %v928_v7 = vmax.f32 %v858_v33, 0.0  ;;  %v938_v59 = vmax.f32 %v868_v14, 0.0  ;;  %v965_v10 = vpack.c.bf16 %v915_v46, %v905_v22  ;;  %v3840_v46 = vld [vmem:[%s6806_s3 + $0x444] ss:$8 sps:$4 sm:$0xff]  }
  0xfa   :  { %2183 = vmatpush2.bf16.msra.mxu1 %v3826_v50  ;;  %2223 = vmatprep.subr.bf16.mxu0 %v3831_v34  ;;  %v521_v63 = vrot.slane %v520_v0, 2  ;;  %v7080_v50 = vld [vmem:[#allocation12_spill] sm:$0xff]  ;;  %v504_v11 = vrot.slane %v503_v9, 1  ;;  %v936_v34 = vmax.f32 %v866_v44, 0.0  ;;  %v865_v1 = vadd.f32 %v5312_v57, %v741_v47  ;;  %v7084_v47 = vld [vmem:[#allocation26_spill] sm:$0xff] }
  0xfb   :  { %v733_v5 = vmul.f32 %v5336_v25, %v7080_v50  ;;  %v967_v52 = vpack.c.bf16 %v917_v43, %v907_v53  ;;  %v867_v49 = vadd.f32 %v5315_v61, %v743_v39  ;;  %v3838_v50 = vld [vmem:[%s6806_s3 + $0x440] ss:$8 sps:$4 sm:$0xff]  }
  0xfc   :  { %2114 = vmatmul.mubr.bf16.vlgmr.msra.gmra.mxu0 %v955_v21  ;;  %v522_v24 = vadd.f32 %v521_v63, %v520_v0  ;;  %v7083_v21 = vld [vmem:[#allocation29_spill] sm:$0xff]  ;;  %v505_v28 = vadd.f32 %v504_v11, %v503_v9  ;;  %v935_v53 = vmax.f32 %v865_v1, 0.0  ;;  %v7085_v63 = vld [vmem:[#allocation28_spill] sm:$0xff] }
  0xfd   :  { %2185 = vmatmul.mubr.bf16.vlgmr.msra.gmra.mxu1 %v957_v35  ;;  %2224 = vmatpush1.bf16.msra.mxu0 %v3829_v60  ;;  %v754_v35 = vmul.f32 %v5211_v16, %v7083_v21  ;;  %v857_v60 = vadd.f32 %v5315_v61, %v733_v5  ;;  %v3835_v0 = vld [vmem:[%s6806_s3 + $0x450] ss:$8 sps:$4 sm:$0xff]   ;;  %v876_v16 = vadd.f32 %v5030_v26, %v752_v4  ;;  %v937_v36 = vmax.f32 %v867_v49, 0.0 }
  0xfe   :  { %2123 = vmatprep.mubr.bf16.mxu0 %v966_v38  ;;  %2225 = vmatprep.subr.bf16.mxu0 %v3834_v13  ;;  %v855_v38 = vadd.f32 %v5312_v57, %v731_v30  ;;  %v523_v58 = vrot.slane %v522_v24, 1  ;;  %v533_v44 = vmul.f32 0.020408163, %v505_v28  ;;  %v976_v13 = vpack.c.bf16 %v936_v34, %v926_v55  ;;  %v3841_v55 = vld [vmem:[%s6806_s3 + $0x430] ss:$8 sps:$4 sm:$0xff]  }
  0xff   :  { %2194 = vmatprep.mubr.bf16.mxu1 %v968_v29  ;;  %v978_v29 = vpack.c.bf16 %v938_v59, %v928_v7  ;;  %v878_v33 = vadd.f32 %v5053_v31, %v754_v35  ;;  %v927_v30 = vmax.f32 %v857_v60, 0.0  ;;  %v751_v26 = vmul.f32 %v5296_v18, %v7084_v47  ;;  %v3847_v21 = vld [vmem:[%s6806_s3 + $0x410] ss:$8 sps:$4 sm:$0xff]   ;;  %v3852_v28 = vld [vmem:[%s6806_s3 + $0x404] ss:$8 sps:$4 sm:$0xff]  }
 0x100   :  { %v524_v22 = vadd.f32 %v523_v58, %v522_v24  ;;  %v545_v14 = vadd.f32 1e-05, %v533_v44  ;;  %v925_v9 = vmax.f32 %v855_v38, 0.0  ;;  %v753_v43 = vmul.f32 %v5336_v25, %v7085_v63  ;;  %v3850_v38 = vld [vmem:[%s6806_s3 + $0x400] ss:$8 sps:$4 sm:$0xff]  }
 0x101   :  { %2226 = vmatpush1.bf16.msra.mxu0 %v3832_v27  ;;  %v946_v31 = vmax.f32 %v876_v16, 0.0  ;;  %v948_v39 = vmax.f32 %v878_v33, 0.0  ;;  %v977_v11 = vpack.c.bf16 %v937_v36, %v927_v30  ;;  %v875_v25 = vadd.f32 %v5312_v57, %v751_v26  ;;  %v3844_v57 = vld [vmem:[%s6806_s3 + $0x420] ss:$8 sps:$4 sm:$0xff]   ;;  %v3855_v58 = vld [vmem:[%s6806_s3 + $0x4d4] ss:$8 sps:$4 sm:$0xff]  }
 0x102   :  { %2227 = vmatprep.subr.bf16.mxu0 %v3837_v62  ;;  %v534_v41 = vmul.f32 0.020408163, %v524_v22  ;;  %3959 = vrsqrt.f32 %v545_v14  ;;  %v975_v18 = vpack.c.bf16 %v935_v53, %v925_v9  ;;  %v877_v27 = vadd.f32 %v5315_v61, %v753_v43  ;;  %v3849_v61 = vld [vmem:[%s6806_s3 + $0x414] ss:$8 sps:$4 sm:$0xff]   ;;  %v536_v60 = vld [vmem:[%s6808_s1 + $0x8] sm:$0x3] }
 0x103   :  { %v986_v34 = vpack.c.bf16 %v946_v31, %v946_v31  ;;  %v988_v4 = vpack.c.bf16 %v948_v39, %v948_v39  ;;  %v945_v24 = vmax.f32 %v875_v25, 0.0  ;;  %v3853_v49 = vld [vmem:[%s6806_s3 + $0x4d0] ss:$8 sps:$4 sm:$0xff]   ;;  %v3856_v22 = vld [vmem:[%s6806_s3 + $0x4c0] ss:$8 sps:$4 sm:$0xff]  }
 0x104   :  { %2124 = vmatmul.mubr.bf16.gmra.mxu0 %v965_v10  ;;  %v546_v5 = vadd.f32 1e-05, %v534_v41  ;;  %v947_v62 = vmax.f32 %v877_v27, 0.0  ;;  %v3861_v33 = vld [vmem:[%s6806_s3 + $0x4b4] ss:$8 sps:$4 sm:$0xff]  }
 0x105   :  { %2195 = vmatmul.mubr.bf16.gmra.mxu1 %v967_v52  ;;  %2228 = vmatpush1.bf16.msra.mxu0 %v3835_v0  ;;  %v985_v7 = vpack.c.bf16 %v945_v24, %v945_v24  ;;  %v3858_v0 = vld [vmem:[%s6806_s3 + $0x4c4] ss:$8 sps:$4 sm:$0xff]   ;;  %v3859_v36 = vld [vmem:[%s6806_s3 + $0x4b0] ss:$8 sps:$4 sm:$0xff]   ;;  %v3862_v39 = vld [vmem:[%s6806_s3 + $0x4a0] ss:$8 sps:$4 sm:$0xff]  }
 0x106   :  { %2133 = vmatprep.mubr.bf16.mxu0 %v976_v13  ;;  %2229 = vmatprep.subr.bf16.mxu0 %v3840_v46  ;;  %3961 = vrsqrt.f32 %v546_v5  ;;  %v987_v59 = vpack.c.bf16 %v947_v62, %v947_v62  ;;  %v758_v13 = vld [vmem:[%s6809_s2 + $0x8] sm:$0x3]  ;;  %v3870_v24 = vld [vmem:[%s6806_s3 + $0x484] ss:$8 sps:$4 sm:$0xff]   ;;  %s3970_s2 = smov 64  }
 0x107   :  { %2204 = vmatprep.mubr.bf16.mxu1 %v978_v29  ;;  %v5603_v29 = vrot.slane %v758_v13, %v4993_v2 }
 0x109   :  { %2230 = vmatpush1.bf16.msra.mxu0 %v3838_v50 }
 0x10a   :  { %2231 = vmatprep.subr.bf16.mxu0 %v3843_v37 }
 0x10c   :  { %2134 = vmatmul.mubr.bf16.gmra.mxu0 %v975_v18 }
 0x10d   :  { %2205 = vmatmul.mubr.bf16.gmra.mxu1 %v977_v11  ;;  %2232 = vmatpush1.bf16.msra.mxu0 %v3841_v55 }
 0x10e   :  { %2143 = vmatprep.mubr.bf16.mxu0 %v986_v34  ;;  %2233 = vmatprep.subr.bf16.mxu0 %v3846_v54 }
 0x10f   :  { %2214 = vmatprep.mubr.bf16.mxu1 %v988_v4  ;;  %v3960_v35 = vpop.eup %3959 }
 0x111   :  { %2234 = vmatpush1.bf16.msra.mxu0 %v3844_v57 }
 0x112   :  { %2235 = vmatprep.subr.bf16.mxu0 %v3849_v61 }
 0x113   :  { %v3962_v10 = vpop.eup %3961 }
 0x114   :  { %2144 = vmatmul.mubr.bf16.gmra.mxu0 %v985_v7  ;;  %v616_v1 = vcombine.low %v3960_v35, %v3962_v10 }
 0x115   :  { %2215 = vmatmul.mubr.bf16.gmra.mxu1 %v987_v59  ;;  %2236 = vmatpush1.bf16.msra.mxu0 %v3847_v21  ;;  %v3868_v21 = vld [vmem:[%s6806_s3 + $0x480] ss:$8 sps:$4 sm:$0xff]  }
 0x116   :  { %2237 = vmatprep.subr.bf16.mxu0 %v3852_v28  ;;  %v623_v52 = vrot.slane %v616_v1, %v4938_v32 }
 0x118   :  { %v630_v44 = vrot.slane %v623_v52, %v4938_v32 }
 0x119   :  { %2238 = vmatpush1.bf16.msra.mxu0 %v3850_v38 }
 0x11a   :  { %2243 = vmatprep.subr.bf16.mxu0 %v3855_v58  ;;  %v634_v16 = vmul.f32 %v630_v44, %v536_v60 }
 0x11c   :  { %v676_v46 = vrot.slane %v634_v16, %v4993_v2  ;;  %v5611_v53 = vrot.slane %v634_v16, %v5007_v40 }
 0x11d   :  { %2244 = vmatpush2.bf16.msra.mxu0 %v3853_v49 }
 0x11e   :  { %2245 = vmatprep.subr.bf16.mxu0 %v3858_v0  ;;  %v696_v14 = vmul.f32 %v676_v46, %v5344_v48  ;;  %v706_v9 = vmul.f32 %v676_v46, %v5347_v8  ;;  %v716_v41 = vmul.f32 %v676_v46, %v5350_v3  ;;  %v726_v30 = vmul.f32 %v676_v46, %v5363_v15  ;;  %v3864_v48 = vld [vmem:[%s6806_s3 + $0x4a4] ss:$8 sps:$4 sm:$0xff]  }
 0x11f   :  { %v796_v15 = vrot.slane %v758_v13, %v5007_v40  ;;  %v695_v50 = vmul.f32 %v5611_v53, %v5290_v12  ;;  %v705_v31 = vmul.f32 %v5611_v53, %v5293_v6  ;;  %v736_v11 = vmul.f32 %v676_v46, %v5374_v51  ;;  %v3867_v12 = vld [vmem:[%s6806_s3 + $0x494] ss:$8 sps:$4 sm:$0xff]   ;;  %v3865_v51 = vld [vmem:[%s6806_s3 + $0x490] ss:$8 sps:$4 sm:$0xff]  }
 0x120   :  { %v820_v47 = vadd.f32 %v5603_v29, %v696_v14  ;;  %v830_v26 = vadd.f32 %v5603_v29, %v706_v9  ;;  %v840_v8 = vadd.f32 %v5603_v29, %v716_v41  ;;  %v850_v3 = vadd.f32 %v5603_v29, %v726_v30 }
 0x121   :  { %2246 = vmatpush2.bf16.msra.mxu0 %v3856_v22  ;;  %v746_v25 = vmul.f32 %v676_v46, %v5384_v42  ;;  %v860_v6 = vadd.f32 %v5603_v29, %v736_v11  ;;  %v819_v34 = vadd.f32 %v796_v15, %v695_v50  ;;  %v829_v54 = vadd.f32 %v796_v15, %v705_v31 }
 0x122   :  { %2247 = vmatprep.subr.bf16.mxu0 %v3861_v33  ;;  %v890_v63 = vmax.f32 %v820_v47, 0.0  ;;  %v900_v43 = vmax.f32 %v830_v26, 0.0  ;;  %v910_v5 = vmax.f32 %v840_v8, 0.0  ;;  %v920_v37 = vmax.f32 %v850_v3, 0.0 }
 0x123   :  { %v870_v55 = vadd.f32 %v5603_v29, %v746_v25  ;;  %v930_v42 = vmax.f32 %v860_v6, 0.0  ;;  %v889_v57 = vmax.f32 %v819_v34, 0.0  ;;  %v899_v61 = vmax.f32 %v829_v54, 0.0 }
 0x124   :  { %v960_v18 = vpack.c.bf16 %v900_v43, %v890_v63  ;;  %v970_v27 = vpack.c.bf16 %v920_v37, %v910_v5  ;;  %v715_v7 = vmul.f32 %v5611_v53, %v5300_v17  ;;  %v725_v59 = vmul.f32 %v5611_v53, %v5303_v56 }
 0x125   :  { %2248 = vmatpush2.bf16.msra.mxu0 %v3859_v36  ;;  %v940_v4 = vmax.f32 %v870_v55, 0.0  ;;  %v959_v35 = vpack.c.bf16 %v899_v61, %v889_v57  ;;  %v735_v58 = vmul.f32 %v5611_v53, %v5318_v20  ;;  %v745_v17 = vmul.f32 %v5611_v53, %v5327_v19 }
 0x126   :  { %2249 = vmatprep.subr.bf16.mxu0 %v3864_v48  ;;  %3544 = vmatprep.mubr.msk.bf16.mxu0 %vm218_vm1, %v960_v18  ;;  %v839_v28 = vadd.f32 %v796_v15, %v715_v7  ;;  %v849_v10 = vadd.f32 %v796_v15, %v725_v59  ;;  %v756_v56 = vmul.f32 %v676_v46, %v5408_v23 }
 0x127   :  { %v980_v62 = vpack.c.bf16 %v940_v4, %v930_v42  ;;  %v859_v60 = vadd.f32 %v796_v15, %v735_v58  ;;  %v869_v49 = vadd.f32 %v796_v15, %v745_v17  ;;  %v755_v16 = vmul.f32 %v5611_v53, %v5339_v45  ;;  %v3873_v17 = vld [vmem:[%s6810_s6 + $0xe4] ss:$16 sps:$4 sm:$0xff]  }
 0x128   :  { %v909_v38 = vmax.f32 %v839_v28, 0.0  ;;  %v919_v1 = vmax.f32 %v849_v10, 0.0  ;;  %v880_v44 = vadd.f32 %v5603_v29, %v756_v56  ;;  %v3871_v56 = vld [vmem:[%s6810_s6 + $0xe0] ss:$16 sps:$4 sm:$0xff]   ;;  %2789 = vmatprep.subr.bf16.mxu1 %v3873_v17 }
 0x129   :  { %2250 = vmatpush2.bf16.msra.mxu0 %v3862_v39  ;;  %v929_v0 = vmax.f32 %v859_v60, 0.0  ;;  %v939_v13 = vmax.f32 %v869_v49, 0.0  ;;  %v879_v19 = vadd.f32 %v796_v15, %v755_v16  ;;  %v5705_v60 = vld [vmem:[%s6810_s6 + $0xec] ss:$16 sps:$4 sm:$0xff]   ;;  %2790 = vmatpush1.bf16.msra.mxu1 %v3871_v56  ;;  %v3879_v49 = vld [vmem:[%s6810_s6 + $0xc4] ss:$16 sps:$4 sm:$0xff]  }
 0x12a   :  { %2251 = vmatprep.subr.bf16.mxu0 %v3867_v12  ;;  %v969_v52 = vpack.c.bf16 %v919_v1, %v909_v38  ;;  %v950_v20 = vmax.f32 %v880_v44, 0.0  ;;  %v3877_v44 = vld [vmem:[%s6810_s6 + $0xc0] ss:$16 sps:$4 sm:$0xff]   ;;  %2791 = vmatprep.subr.bf16.mxu1 %v3879_v49 }
 0x12b   :  { %v979_v22 = vpack.c.bf16 %v939_v13, %v929_v0  ;;  %v949_v14 = vmax.f32 %v879_v19, 0.0  ;;  %v5718_v0 = vld [vmem:[%s6810_s6 + $0xcc] ss:$16 sps:$4 sm:$0xff]   ;;  %v5723_v13 = vld [vmem:[%s6810_s6 + $0xc8] ss:$16 sps:$4 sm:$0xff]  }
 0x12c   :  { %v990_v33 = vpack.c.bf16 %v950_v20, %v950_v20  ;;  %v3885_v19 = vld [vmem:[%s6810_s6 + $0xa4] ss:$16 sps:$4 sm:$0xff]  }
 0x12d   :  { %2252 = vmatpush2.bf16.msra.mxu0 %v3865_v51  ;;  %v989_v23 = vpack.c.bf16 %v949_v14, %v949_v14  ;;  %2792 = vmatpush1.bf16.msra.mxu1 %v3877_v44  ;;  %v3909_v44 = vld [vmem:[%s6810_s6 + $0x24] ss:$16 sps:$4 sm:$0xff]  }
 0x12e   :  { %2253 = vmatprep.subr.bf16.mxu0 %v3870_v24  ;;  %2793 = vmatprep.subr.bf16.mxu1 %v3885_v19  ;;  %v5837_v19 = vld [vmem:[%s6810_s6 + $0x2c] ss:$16 sps:$4 sm:$0xff]  }
 0x131   :  { %2254 = vmatpush2.bf16.msra.mxu0 %v3868_v21 }
 0x132   :  { %2859 = vmatprep.subr.bf16.mxu0 %v5705_v60 }
 0x134   :  { %2256 = vmatmul.mubr.bf16.vlgmr.msra.gmra.mxu0 %v959_v35 }
 0x135   :  { %3545 = vmatprep.mubr.msk.bf16.mxu0 %vm218_vm1, %v970_v27 }
 0x13c   :  { %2266 = vmatmul.mubr.bf16.gmra.mxu0 %v969_v52  ;;  %v5700_v52 = vld [vmem:[%s6810_s6 + $0xe8] ss:$16 sps:$4 sm:$0xff]  }
 0x13d   :  { %3546 = vmatprep.mubr.msk.bf16.mxu0 %vm218_vm1, %v980_v62  ;;  %2860 = vmatpush1.bf16.msra.mxu0 %v5700_v52 }
 0x13e   :  { %2861 = vmatprep.subr.bf16.mxu0 %v5718_v0 }
 0x141   :  { %2862 = vmatpush1.bf16.msra.mxu0 %v5723_v13 }
 0x144   :  { %2276 = vmatmul.mubr.bf16.gmra.mxu0 %v979_v22 }
 0x145   :  { %3547 = vmatprep.mubr.msk.bf16.mxu0 %vm218_vm1, %v990_v33 }
 0x14c   :  { %2286 = vmatmul.mubr.bf16.gmra.mxu0 %v989_v23  ;;  %v3883_v23 = vld [vmem:[%s6810_s6 + $0xa0] ss:$16 sps:$4 sm:$0xff]  }
 0x14d   :  { %2794 = vmatpush1.bf16.msra.mxu1 %v3883_v23 }
 0x17c   :  { %v1973_v46 = vpop.f32.mrf.mxu0  ;;  %v2044_v29 = vpop.f32.mrf.mxu1 }
 0x17d   :  { %v2045_v9 = vadd.f32 %v2044_v29, %v1973_v46  ;;  %v5736_v46 = vld [vmem:[%s6810_s6 + $0xac] ss:$16 sps:$4 sm:$0xff]  }
 0x17e   :  { %v1975_v41 = vpop.f32.mrf.mxu0  ;;  %v2046_v30 = vpop.f32.mrf.mxu1  ;;  %2863 = vmatprep.subr.bf16.mxu0 %v5736_v46 }
 0x17f   :  { %v5665_v36 = vadd.f32 %v2046_v30, %v1975_v41  ;;  %v5744_v41 = vld [vmem:[%s6810_s6 + $0xa8] ss:$16 sps:$4 sm:$0xff]  }
 0x180   :  { %v1977_v45 = vpop.f32.mrf.mxu0  ;;  %v2048_v53 = vpop.f32.mrf.mxu1  ;;  %2864 = vmatpush1.bf16.msra.mxu0 %v5744_v41 }
 0x181   :  { %v5667_v47 = vadd.f32 %v2048_v53, %v1977_v45 }
 0x182   :  { %v1979_v26 = vpop.f32.mrf.mxu0  ;;  %v2050_v48 = vpop.f32.mrf.mxu1 }
 0x183   :  { %v5669_v8 = vadd.f32 %v2050_v48, %v1979_v26 }
 0x184   :  { %v1983_v3 = vpop.f32.mrf.mxu0 }
 0x186   :  { %v1985_v15 = vpop.f32.mrf.mxu0 }
 0x187   :  { %v2054_v63 = vpop.f32.mrf.mxu1 }
 0x188   :  { %v5671_v43 = vadd.f32 %v2054_v63, %v1983_v3  ;;  %v1987_v50 = vpop.f32.mrf.mxu0  ;;  %v5760_v63 = vld [vmem:[%s6810_s6 + $0x8c] ss:$16 sps:$4 sm:$0xff]  }
 0x189   :  { %v2056_v31 = vpop.f32.mrf.mxu1  ;;  %2865 = vmatprep.subr.bf16.mxu0 %v5760_v63 }
 0x18a   :  { %v5673_v5 = vadd.f32 %v2056_v31, %v1985_v15  ;;  %v1989_v37 = vpop.f32.mrf.mxu0  ;;  %v3889_v15 = vld [vmem:[%s6810_s6 + $0x80] ss:$16 sps:$4 sm:$0xff]   ;;  %v5768_v31 = vld [vmem:[%s6810_s6 + $0x88] ss:$16 sps:$4 sm:$0xff]  }
 0x18b   :  { %v2058_v39 = vpop.f32.mrf.mxu1  ;;  %2866 = vmatpush1.bf16.msra.mxu0 %v5768_v31 }
 0x18c   :  { %v5675_v18 = vadd.f32 %v2058_v39, %v1987_v50  ;;  %v1993_v11 = vpop.f32.mrf.mxu0 }
 0x18d   :  { %v2060_v25 = vpop.f32.mrf.mxu1 }
 0x18e   :  { %v5677_v12 = vadd.f32 %v2060_v25, %v1989_v37  ;;  %v1995_v27 = vpop.f32.mrf.mxu0 }
 0x18f   :  { %v2064_v6 = vpop.f32.mrf.mxu1 }
 0x190   :  { %v5679_v55 = vadd.f32 %v2064_v6, %v1993_v11  ;;  %v1997_v34 = vpop.f32.mrf.mxu0 }
 0x191   :  { %v2066_v54 = vpop.f32.mrf.mxu1 }
 0x192   :  { %v5681_v51 = vadd.f32 %v2066_v54, %v1995_v27  ;;  %v1999_v42 = vpop.f32.mrf.mxu0  ;;  %v5784_v54 = vld [vmem:[%s6810_s6 + $0x6c] ss:$16 sps:$4 sm:$0xff]  }
 0x193   :  { %v2068_v4 = vpop.f32.mrf.mxu1  ;;  %2867 = vmatprep.subr.bf16.mxu0 %v5784_v54 }
 0x194   :  { %v5683_v24 = vadd.f32 %v2068_v4, %v1997_v34  ;;  %v2003_v62 = vpop.f32.mrf.mxu0  ;;  %v3895_v34 = vld [vmem:[%s6810_s6 + $0x60] ss:$16 sps:$4 sm:$0xff]   ;;  %v5792_v4 = vld [vmem:[%s6810_s6 + $0x68] ss:$16 sps:$4 sm:$0xff]  }
 0x195   :  { %v2070_v57 = vpop.f32.mrf.mxu1  ;;  %2868 = vmatpush1.bf16.msra.mxu0 %v5792_v4 }
 0x196   :  { %v5685_v61 = vadd.f32 %v2070_v57, %v1999_v42  ;;  %v2005_v7 = vpop.f32.mrf.mxu0 }
 0x197   :  { %v2074_v59 = vpop.f32.mrf.mxu1 }
 0x198   :  { %v2007_v21 = vpop.f32.mrf.mxu0  ;;  %v5687_v35 = vadd.f32 %v2074_v59, %v2003_v62 }
 0x199   :  { %v2076_v28 = vpop.f32.mrf.mxu1 }
 0x19a   :  { %v2008_v10 = vpop.f32.mrf.mxu0  ;;  %v5689_v38 = vadd.f32 %v2076_v28, %v2005_v7 }
 0x19b   :  { %v2078_v1 = vpop.f32.mrf.mxu1  ;;  %v3901_v10 = vld [vmem:[%s6810_s6 + $0x40] ss:$16 sps:$4 sm:$0xff]  }
 0x19d   :  { %v2079_v58 = vpop.f32.mrf.mxu1 }
 0x19e   :  { %v5819_v58 = vld [vmem:[%s6810_s6 + $0x48] ss:$16 sps:$4 sm:$0xff]  }
 0x1bc   :  { %v2115_v16 = vpop.f32.mrf.mxu0 }
 0x1bd   :  { %v2186_v20 = vpop.f32.mrf.mxu1  ;;  %v2116_v22 = vadd.f32 %v2115_v16, %v2045_v9 }
 0x1be   :  { %v2117_v33 = vpop.f32.mrf.mxu0 }
 0x1bf   :  { %v2188_v14 = vpop.f32.mrf.mxu1  ;;  %v2118_v29 = vadd.f32 %v2117_v33, %v5665_v36  ;;  %v5739_v9 = vadd.f32 %v2186_v20, %v2116_v22  ;;  %v3891_v36 = vld [vmem:[%s6810_s6 + $0x84] ss:$16 sps:$4 sm:$0xff]   ;;  %v3907_v22 = vld [vmem:[%s6810_s6 + $0x20] ss:$16 sps:$4 sm:$0xff]   ;;  %v5844_v33 = vld [vmem:[%s6810_s6 + $0x28] ss:$16 sps:$4 sm:$0xff]  }
 0x1c0   :  { %v2119_v30 = vpop.f32.mrf.mxu0  ;;  %2795 = vmatprep.subr.bf16.mxu1 %v3891_v36  ;;  %v5865_v36 = vld [vmem:[%s6810_s6 + $0xc] ss:$16 sps:$4 sm:$0xff]  }
 0x1c1   :  { %v2190_v45 = vpop.f32.mrf.mxu1  ;;  %v2120_v53 = vadd.f32 %v2119_v30, %v5667_v47  ;;  %v5748_v26 = vadd.f32 %v2188_v14, %v2118_v29  ;;  %2796 = vmatpush1.bf16.msra.mxu1 %v3889_v15  ;;  %v3915_v29 = vld [vmem:[%s6810_s6 + $0x4] ss:$16 sps:$4 sm:$0xff]  }
 0x1c2   :  { %v2121_v48 = vpop.f32.mrf.mxu0 }
 0x1c3   :  { %v2192_v3 = vpop.f32.mrf.mxu1  ;;  %v2122_v47 = vadd.f32 %v2121_v48, %v5669_v8  ;;  %v5763_v50 = vadd.f32 %v2190_v45, %v2120_v53  ;;  %v3897_v8 = vld [vmem:[%s6810_s6 + $0x64] ss:$16 sps:$4 sm:$0xff]   ;;  %v3913_v53 = vld [vmem:[%s6810_s6] ss:$16 sps:$4 sm:$0xff]   ;;  %v5870_v48 = vld [vmem:[%s6810_s6 + $0x8] ss:$16 sps:$4 sm:$0xff]  }
 0x1c4   :  { %v2125_v37 = vpop.f32.mrf.mxu0  ;;  %2797 = vmatprep.subr.bf16.mxu1 %v3897_v8  ;;  %v5891_v8 = vld [vmem:[%s6810_s6 + $0x16c] ss:$16 sps:$4 sm:$0xff]  }
 0x1c5   :  { %v2196_v39 = vpop.f32.mrf.mxu1  ;;  %v2126_v11 = vadd.f32 %v2125_v37, %v5671_v43  ;;  %v5772_v25 = vadd.f32 %v2192_v3, %v2122_v47  ;;  %2798 = vmatpush1.bf16.msra.mxu1 %v3895_v34  ;;  %v3921_v47 = vld [vmem:[%s6810_s6 + $0x164] ss:$16 sps:$4 sm:$0xff]  }
 0x1c6   :  { %v2127_v27 = vpop.f32.mrf.mxu0 }
 0x1c7   :  { %v2198_v6 = vpop.f32.mrf.mxu1  ;;  %v2128_v43 = vadd.f32 %v2127_v27, %v5673_v5  ;;  %v5787_v42 = vadd.f32 %v2196_v39, %v2126_v11  ;;  %v3903_v5 = vld [vmem:[%s6810_s6 + $0x44] ss:$16 sps:$4 sm:$0xff]   ;;  %v3919_v11 = vld [vmem:[%s6810_s6 + $0x160] ss:$16 sps:$4 sm:$0xff]   ;;  %v5896_v27 = vld [vmem:[%s6810_s6 + $0x168] ss:$16 sps:$4 sm:$0xff]  }
 0x1c8   :  { %v2129_v62 = vpop.f32.mrf.mxu0  ;;  %2799 = vmatprep.subr.bf16.mxu1 %v3903_v5  ;;  %v5909_v5 = vld [vmem:[%s6810_s6 + $0x14c] ss:$16 sps:$4 sm:$0xff]  }
 0x1c9   :  { %v2200_v57 = vpop.f32.mrf.mxu1  ;;  %v2130_v7 = vadd.f32 %v2129_v62, %v5675_v18  ;;  %v5796_v59 = vadd.f32 %v2198_v6, %v2128_v43  ;;  %v5812_v18 = vld [vmem:[%s6810_s6 + $0x4c] ss:$16 sps:$4 sm:$0xff]   ;;  %2800 = vmatpush1.bf16.msra.mxu1 %v3901_v10  ;;  %v3927_v43 = vld [vmem:[%s6810_s6 + $0x144] ss:$16 sps:$4 sm:$0xff]   ;;  %v5914_v10 = vld [vmem:[%s6810_s6 + $0x148] ss:$16 sps:$4 sm:$0xff]  }
 0x1ca   :  { %v5801_v21 = vpop.f32.mrf.mxu0  ;;  %2869 = vmatprep.subr.bf16.mxu0 %v5812_v18  ;;  %2801 = vmatprep.subr.bf16.mxu1 %v3909_v44  ;;  %v5932_v44 = vld [vmem:[%s6810_s6 + $0x128] ss:$16 sps:$4 sm:$0xff]  }
 0x1cb   :  { %v5803_v28 = vpop.f32.mrf.mxu1  ;;  %v5814_v1 = vadd.f32 %v2200_v57, %v2130_v7  ;;  %2870 = vmatpush1.bf16.msra.mxu0 %v5819_v58  ;;  %v3925_v7 = vld [vmem:[%s6810_s6 + $0x140] ss:$16 sps:$4 sm:$0xff]  }
 0x1cc   :  { %v2135_v17 = vpop.f32.mrf.mxu0  ;;  %2871 = vmatprep.subr.bf16.mxu0 %v5837_v19 }
 0x1cd   :  { %v2206_v56 = vpop.f32.mrf.mxu1  ;;  %v2136_v49 = vadd.f32 %v2135_v17, %v5679_v55  ;;  %2802 = vmatpush1.bf16.msra.mxu1 %v3907_v22  ;;  %v3933_v17 = vld [vmem:[%s6810_s6 + $0x124] ss:$16 sps:$4 sm:$0xff]   ;;  %v3937_v22 = vld [vmem:[%s6810_s6 + $0x100] ss:$16 sps:$4 sm:$0xff]  }
 0x1ce   :  { %v5826_v16 = vpop.f32.mrf.mxu0  ;;  %2803 = vmatprep.subr.bf16.mxu1 %v3915_v29  ;;  %v3939_v29 = vld [vmem:[%s6810_s6 + $0x104] ss:$16 sps:$4 sm:$0xff]  }
 0x1cf   :  { %v5828_v20 = vpop.f32.mrf.mxu1  ;;  %v5839_v55 = vadd.f32 %v2206_v56, %v2136_v49  ;;  %2872 = vmatpush1.bf16.msra.mxu0 %v5844_v33  ;;  %v3931_v56 = vld [vmem:[%s6810_s6 + $0x120] ss:$16 sps:$4 sm:$0xff]   ;;  %v5927_v49 = vld [vmem:[%s6810_s6 + $0x12c] ss:$16 sps:$4 sm:$0xff]  }
 0x1d0   :  { %v5846_v14 = vpop.f32.mrf.mxu0  ;;  %2873 = vmatprep.subr.bf16.mxu0 %v5865_v36 }
 0x1d1   :  { %v5848_v23 = vpop.f32.mrf.mxu1  ;;  %2804 = vmatpush1.bf16.msra.mxu1 %v3913_v53  ;;  %v5945_v53 = vld [vmem:[%s6810_s6 + $0x108] ss:$16 sps:$4 sm:$0xff]  }
 0x1d2   :  { %v5854_v30 = vpop.f32.mrf.mxu0  ;;  %2813 = vmatprep.subr.bf16.mxu1 %v3921_v47  ;;  %7086 = vst [vmem:[#allocation58_spill] sm:$0xff] %v5945_v53  ;;  %v5950_v47 = vld [vmem:[%s6810_s6 + $0x10c] ss:$16 sps:$4 sm:$0xff]  }
 0x1d3   :  { %v5856_v45 = vpop.f32.mrf.mxu1  ;;  %2874 = vmatpush1.bf16.msra.mxu0 %v5870_v48 }
 0x1d4   :  { %v5872_v3 = vpop.f32.mrf.mxu0  ;;  %2883 = vmatprep.subr.bf16.mxu0 %v5891_v8 }
 0x1d5   :  { %v5874_v15 = vpop.f32.mrf.mxu1  ;;  %2814 = vmatpush2.bf16.msra.mxu1 %v3919_v11 }
 0x1d6   :  { %v5880_v37 = vpop.f32.mrf.mxu0  ;;  %2815 = vmatprep.subr.bf16.mxu1 %v3927_v43 }
 0x1d7   :  { %v5882_v39 = vpop.f32.mrf.mxu1  ;;  %2884 = vmatpush2.bf16.msra.mxu0 %v5896_v27 }
 0x1d8   :  { %v2149_v6 = vpop.f32.mrf.mxu0  ;;  %2885 = vmatprep.subr.bf16.mxu0 %v5909_v5 }
 0x1d9   :  { %v2220_v34 = vpop.f32.mrf.mxu1  ;;  %2816 = vmatpush2.bf16.msra.mxu1 %v3925_v7 }
 0x1da   :  { %v2150_v62 = vpop.f32.mrf.mxu0  ;;  %2817 = vmatprep.subr.bf16.mxu1 %v3933_v17 }
 0x1db   :  { %v2221_v57 = vpop.f32.mrf.mxu1  ;;  %2886 = vmatpush2.bf16.msra.mxu0 %v5914_v10 }
 0x1dc   :  { %2887 = vmatprep.subr.bf16.mxu0 %v5927_v49 }
 0x1dd   :  { %2818 = vmatpush2.bf16.msra.mxu1 %v3931_v56 }
 0x1de   :  { %2819 = vmatprep.subr.bf16.mxu1 %v3939_v29 }
 0x1df   :  { %2888 = vmatpush2.bf16.msra.mxu0 %v5932_v44 }
 0x1e0   :  { %2889 = vmatprep.subr.bf16.mxu0 %v5950_v47 }
 0x1e1   :  { %2820 = vmatpush2.bf16.msra.mxu1 %v3937_v22  ;;  %v2132_v22 = vadd.f32 %v5801_v21, %v5677_v12  ;;  %v2138_v12 = vadd.f32 %v5826_v16, %v5681_v51 }
 0x1e2   :  { %3604 = vmatprep.subr.bf16.mxu1 %v5705_v60 }
 0x1e3   :  { %2890 = vmatpush2.bf16.msra.mxu0 %v5945_v53 }
 0x1f4   :  { %v2257_v11 = vpop.f32.mrf.mxu0 }
 0x1f5   :  { %v5956_v43 = vadd.f32 %v2257_v11, %v5739_v9 }
 0x1f6   :  { %v2259_v6 = vpop.f32.mrf.mxu0 }
 0x1f7   :  { %v5959_v62 = vadd.f32 %v2259_v6, %v5748_v26 }
 0x1f8   :  { %v2261_v34 = vpop.f32.mrf.mxu0 }
 0x1f9   :  { %v5962_v57 = vadd.f32 %v2261_v34, %v5763_v50  ;;  %v2308_v9 = vsel %vm2307_vm3, %v5959_v62, 0.0 }
 0x1fa   :  { %v2263_v7 = vpop.f32.mrf.mxu0 }
 0x1fb   :  { %v2294_v17 = vadd.f32 %v5962_v57, %v5956_v43  ;;  %v5967_v60 = vadd.f32 %v2263_v7, %v5772_v25  ;;  %v2203_v7 = vadd.f32 %v5803_v28, %v2132_v22  ;;  %v2142_v28 = vadd.f32 %v5854_v30, %v5685_v61 }
 0x1fc   :  { %v2267_v56 = vpop.f32.mrf.mxu0  ;;  %v2148_v61 = vadd.f32 %v5880_v37, %v5689_v38 }
 0x1fd   :  { %v2309_v26 = vsel %vm2307_vm3, %v5967_v60, 0.0  ;;  %v5976_v50 = vadd.f32 %v2267_v56, %v5787_v42 }
 0x1fe   :  { %v2310_v29 = vadd.f32 %v2309_v26, %v2308_v9  ;;  %v2269_v11 = vpop.f32.mrf.mxu0  ;;  %v2140_v9 = vadd.f32 %v5846_v14, %v5683_v24  ;;  %v2146_v24 = vadd.f32 %v5872_v3, %v5687_v35  ;;  %v2219_v35 = vadd.f32 %v5882_v39, %v2148_v61 }
 0x1ff   :  { %v2295_v6 = vadd.f32 %v2294_v17, %v5976_v50  ;;  %v5980_v25 = vadd.f32 %v2269_v11, %v5796_v59  ;;  %v2209_v11 = vadd.f32 %v5828_v20, %v2138_v12  ;;  %v2213_v20 = vadd.f32 %v5856_v45, %v2142_v28 }
 0x200   :  { %v2271_v34 = vpop.f32.mrf.mxu0 }
 0x201   :  { %v2311_v21 = vsel %vm2307_vm3, %v5980_v25, 0.0  ;;  %v2272_v53 = vadd.f32 %v2271_v34, %v5814_v1 }
 0x202   :  { %v2312_v42 = vadd.f32 %v2311_v21, %v2310_v29  ;;  %v2273_v56 = vpop.f32.mrf.mxu0  ;;  %v2211_v29 = vadd.f32 %v5848_v23, %v2140_v9  ;;  %v2217_v21 = vadd.f32 %v5874_v15, %v2146_v24 }
 0x203   :  { %v2296_v17 = vadd.f32 %v2295_v6, %v2272_v53  ;;  %v5990_v26 = vadd.f32 %v2273_v56, %v2203_v7 }
 0x204   :  { %v2277_v59 = vpop.f32.mrf.mxu0 }
 0x205   :  { %v2313_v51 = vsel %vm2307_vm3, %v5990_v26, 0.0  ;;  %v2278_v16 = vadd.f32 %v2277_v59, %v5839_v55 }
 0x206   :  { %v2314_v1 = vadd.f32 %v2313_v51, %v2312_v42  ;;  %v2279_v22 = vpop.f32.mrf.mxu0 }
 0x207   :  { %v2297_v14 = vadd.f32 %v2296_v17, %v2278_v16  ;;  %v2280_v6 = vadd.f32 %v2279_v22, %v2209_v11 }
 0x208   :  { %v2281_v34 = vpop.f32.mrf.mxu0 }
 0x209   :  { %v2315_v30 = vsel %vm2307_vm3, %v2280_v6, 0.0  ;;  %v2282_v7 = vadd.f32 %v2281_v34, %v2211_v29 }
 0x20a   :  { %v2316_v12 = vadd.f32 %v2315_v30, %v2314_v1  ;;  %v2283_v55 = vpop.f32.mrf.mxu0 }
 0x20b   :  { %v2298_v42 = vadd.f32 %v2297_v14, %v2282_v7  ;;  %v2284_v23 = vadd.f32 %v2283_v55, %v2213_v20 }
 0x20c   :  { %v2287_v56 = vpop.f32.mrf.mxu0 }
 0x20d   :  { %v2317_v3 = vsel %vm2307_vm3, %v2284_v23, 0.0  ;;  %v2288_v9 = vadd.f32 %v2287_v56, %v2217_v21 }
 0x20e   :  { %v2318_v17 = vadd.f32 %v2317_v3, %v2316_v12  ;;  %v2289_v45 = vpop.f32.mrf.mxu0 }
 0x20f   :  { %v2299_v38 = vsel %vm105_vm0, %v2288_v9, 0.0  ;;  %v2290_v37 = vadd.f32 %v2289_v45, %v2219_v35 }
 0x210   :  { %v2300_v59 = vadd.f32 %v2299_v38, %v2298_v42  ;;  %v2291_v11 = vpop.f32.mrf.mxu0 }
 0x211   :  { %v2320_v28 = vsel %vm2319_vm4, %v2290_v37, 0.0 }
 0x212   :  { %v2301_v51 = vrot.slane %v2300_v59, 4  ;;  %v2321_v15 = vadd.f32 %v2320_v28, %v2318_v17  ;;  %v2292_v1 = vpop.f32.mrf.mxu0 }
 0x214   :  { %v2302_v22 = vadd.f32 %v2301_v51, %v2300_v59  ;;  %v2322_v29 = vrot.slane %v2321_v15, 4 }
 0x216   :  { %v2303_v24 = vrot.slane %v2302_v22, 2  ;;  %v2323_v39 = vadd.f32 %v2322_v29, %v2321_v15 }
 0x218   :  { %v2304_v14 = vadd.f32 %v2303_v24, %v2302_v22  ;;  %v2324_v34 = vrot.slane %v2323_v39, 2 }
 0x21a   :  { %v2305_v20 = vrot.slane %v2304_v14, 1  ;;  %v2325_v61 = vadd.f32 %v2324_v34, %v2323_v39 }
 0x21c   :  { %v2306_v30 = vadd.f32 %v2305_v20, %v2304_v14  ;;  %v2326_v12 = vrot.slane %v2325_v61, 1 }
 0x21e   :  { %v2328_v55 = vmul.f32 0.020408163, %v2306_v30  ;;  %v2327_v21 = vadd.f32 %v2326_v12, %v2325_v61 }
 0x220   :  { %v6011_v42 = vsub.f32 %v5956_v43, %v2328_v55  ;;  %v6014_v56 = vsub.f32 %v5962_v57, %v2328_v55  ;;  %v6017_v35 = vsub.f32 %v5976_v50, %v2328_v55  ;;  %v6019_v3 = vsub.f32 %v2272_v53, %v2328_v55 }
 0x221   :  { %v6021_v17 = vsub.f32 %v2278_v16, %v2328_v55  ;;  %v6023_v45 = vsub.f32 %v2282_v7, %v2328_v55  ;;  %v6025_v38 = vsub.f32 %v2288_v9, %v2328_v55  ;;  %v2329_v59 = vmul.f32 0.020408163, %v2327_v21 }
 0x222   :  { %v2344_v11 = vmul.f32 %v6011_v42, %v6011_v42  ;;  %v2346_v43 = vmul.f32 %v6014_v56, %v6014_v56  ;;  %v2348_v57 = vmul.f32 %v6017_v35, %v6017_v35  ;;  %v2350_v28 = vmul.f32 %v6019_v3, %v6019_v3 }
 0x223   :  { %v6034_v50 = vsub.f32 %v5959_v62, %v2329_v59  ;;  %v6037_v16 = vsub.f32 %v5967_v60, %v2329_v59  ;;  %v6040_v7 = vsub.f32 %v5980_v25, %v2329_v59  ;;  %v6043_v9 = vsub.f32 %v5990_v26, %v2329_v59 }
 0x224   :  { %v2358_v53 = vadd.f32 %v2346_v43, %v2344_v11  ;;  %v6047_v51 = vsub.f32 %v2280_v6, %v2329_v59  ;;  %v6049_v15 = vsub.f32 %v2284_v23, %v2329_v59  ;;  %v2343_v1 = vsub.f32 %v2290_v37, %v2329_v59 }
 0x225   :  { %v2345_v22 = vmul.f32 %v6034_v50, %v6034_v50  ;;  %v2347_v60 = vmul.f32 %v6037_v16, %v6037_v16  ;;  %v2349_v25 = vmul.f32 %v6040_v7, %v6040_v7  ;;  %v2352_v26 = vmul.f32 %v6021_v17, %v6021_v17 }
 0x226   :  { %v2359_v62 = vadd.f32 %v2358_v53, %v2348_v57  ;;  %v2351_v6 = vmul.f32 %v6043_v9, %v6043_v9  ;;  %v2356_v24 = vmul.f32 %v6025_v38, %v6025_v38  ;;  %v2354_v14 = vmul.f32 %v6023_v45, %v6023_v45 }
 0x227   :  { %v2371_v23 = vsel %vm2307_vm3, %v2345_v22, 0.0  ;;  %v2372_v37 = vsel %vm2307_vm3, %v2347_v60, 0.0  ;;  %v2353_v20 = vmul.f32 %v6047_v51, %v6047_v51  ;;  %v2374_v61 = vsel %vm2307_vm3, %v2349_v25, 0.0 }
 0x228   :  { %v2360_v29 = vadd.f32 %v2359_v62, %v2350_v28  ;;  %v2373_v39 = vadd.f32 %v2372_v37, %v2371_v23  ;;  %v2355_v55 = vmul.f32 %v6049_v15, %v6049_v15  ;;  %v2376_v21 = vsel %vm2307_vm3, %v2351_v6, 0.0 }
 0x229   :  { %v2363_v59 = vsel %vm105_vm0, %v2356_v24, 0.0  ;;  %v2357_v57 = vmul.f32 %v2343_v1, %v2343_v1  ;;  %v2378_v53 = vsel %vm2307_vm3, %v2353_v20, 0.0 }
 0x22a   :  { %v2361_v34 = vadd.f32 %v2360_v29, %v2352_v26  ;;  %v2375_v30 = vadd.f32 %v2374_v61, %v2373_v39  ;;  %v2380_v22 = vsel %vm2307_vm3, %v2355_v55, 0.0 }
 0x22b   :  { %v2382_v26 = vsel %vm2319_vm4, %v2357_v57, 0.0 }
 0x22c   :  { %v2362_v12 = vadd.f32 %v2361_v34, %v2354_v14  ;;  %v2377_v11 = vadd.f32 %v2376_v21, %v2375_v30 }
 0x22e   :  { %v2364_v43 = vadd.f32 %v2363_v59, %v2362_v12  ;;  %v2379_v28 = vadd.f32 %v2378_v53, %v2377_v11 }
 0x230   :  { %v2365_v62 = vrot.slane %v2364_v43, 4  ;;  %v2381_v60 = vadd.f32 %v2380_v22, %v2379_v28  ;;  %v2392_v28 = vld [vmem:[%s6811_s4] sm:$0x3] }
 0x231   :  { %v2441_v22 = vld [vmem:[%s6812_s5] sm:$0x3]  ;;  %s3974_s5 = smov 96  }
 0x232   :  { %v2366_v25 = vadd.f32 %v2365_v62, %v2364_v43  ;;  %v2383_v29 = vadd.f32 %v2382_v26, %v2381_v60 }
 0x234   :  { %v2367_v23 = vrot.slane %v2366_v25, 2  ;;  %v2384_v37 = vrot.slane %v2383_v29, 4 }
 0x236   :  { %v2368_v39 = vadd.f32 %v2367_v23, %v2366_v25  ;;  %v2385_v6 = vadd.f32 %v2384_v37, %v2383_v29  ;;  %v6088_v29 = vrot.slane %v2441_v22, %v5007_v40  ;;  %v2450_v23 = vrot.slane %v2441_v22, %v4993_v2 }
 0x238   :  { %v2369_v14 = vrot.slane %v2368_v39, 1  ;;  %v2386_v24 = vrot.slane %v2385_v6, 2 }
 0x23a   :  { %v2370_v34 = vadd.f32 %v2369_v14, %v2368_v39  ;;  %v2387_v61 = vadd.f32 %v2386_v24, %v2385_v6 }
 0x23c   :  { %v2390_v30 = vmul.f32 0.020408163, %v2370_v34  ;;  %v2388_v12 = vrot.slane %v2387_v61, 1 }
 0x23e   :  { %v2389_v20 = vadd.f32 %v2388_v12, %v2387_v61  ;;  %v2393_v21 = vadd.f32 1e-05, %v2390_v30 }
 0x240   :  { %v2391_v59 = vmul.f32 0.020408163, %v2389_v20  ;;  %3963 = vrsqrt.f32 %v2393_v21 }
 0x242   :  { %v2394_v11 = vadd.f32 1e-05, %v2391_v59 }
 0x244   :  { %3965 = vrsqrt.f32 %v2394_v11 }
 0x24d   :  { %v3964_v55 = vpop.eup %3963 }
 0x251   :  { %v3966_v43 = vpop.eup %3965 }
 0x252   :  { %v2399_v57 = vcombine.low %v3964_v55, %v3966_v43 }
 0x254   :  { %v2406_v53 = vrot.slane %v2399_v57, %v4938_v32 }
 0x256   :  { %v2413_v62 = vrot.slane %v2406_v53, %v4938_v32 }
 0x258   :  { %v2415_v60 = vmul.f32 %v2413_v62, %v2392_v28 }
 0x25a   :  { %v2420_v25 = vrot.slane %v2415_v60, %v5007_v40  ;;  %v2424_v26 = vrot.slane %v2415_v60, %v4993_v2 }
 0x25c   :  { %v2440_v37 = vmul.f32 %v2424_v26, %v2343_v1  ;;  %v2428_v39 = vmul.f32 %v2424_v26, %v6034_v50  ;;  %v2430_v6 = vmul.f32 %v2424_v26, %v6037_v16  ;;  %v2427_v32 = vmul.f32 %v2420_v25, %v6011_v42 }
 0x25d   :  { %v2429_v14 = vmul.f32 %v2420_v25, %v6014_v56  ;;  %v2432_v24 = vmul.f32 %v2424_v26, %v6040_v7  ;;  %v2434_v34 = vmul.f32 %v2424_v26, %v6043_v9  ;;  %v2431_v61 = vmul.f32 %v2420_v25, %v6017_v35 }
 0x25e   :  { %v2454_v30 = vadd.f32 %v2450_v23, %v2428_v39  ;;  %v2456_v40 = vadd.f32 %v2450_v23, %v2430_v6  ;;  %v2453_v12 = vadd.f32 %v6088_v29, %v2427_v32  ;;  %v2433_v16 = vmul.f32 %v2420_v25, %v6019_v3 }
 0x25f   :  { %v2455_v2 = vadd.f32 %v6088_v29, %v2429_v14  ;;  %v2458_v1 = vadd.f32 %v2450_v23, %v2432_v24  ;;  %v2460_v50 = vadd.f32 %v2450_v23, %v2434_v34  ;;  %v2457_v9 = vadd.f32 %v6088_v29, %v2431_v61 }
 0x260   :  { %v2468_v20 = vmax.f32 %v2454_v30, 0.0  ;;  %v2470_v42 = vmax.f32 %v2456_v40, 0.0  ;;  %v2467_v21 = vmax.f32 %v2453_v12, 0.0  ;;  %v2459_v35 = vadd.f32 %v6088_v29, %v2433_v16  ;;  %v2940_v40 = vld [vmem:[%s6814_s7 + $0x60] sm:$0xff]  ;;  %v2941_v16 = vld [vmem:[%s6814_s7 + $0x68] sm:$0xff] }
 0x261   :  { %v2469_v56 = vmax.f32 %v2455_v2, 0.0  ;;  %v2472_v59 = vmax.f32 %v2458_v1, 0.0  ;;  %v2474_v7 = vmax.f32 %v2460_v50, 0.0  ;;  %v2436_v55 = vmul.f32 %v2424_v26, %v6047_v51  ;;  %v2937_v2 = vld [vmem:[%s6814_s7 + $0x48] sm:$0xff] }
 0x262   :  { %v2482_v11 = vpack.c.bf16 %v2470_v42, %v2468_v20  ;;  %v2438_v43 = vmul.f32 %v2424_v26, %v6049_v15  ;;  %v2471_v28 = vmax.f32 %v2457_v9, 0.0  ;;  %v2435_v3 = vmul.f32 %v2420_v25, %v6021_v17 }
 0x263   :  { %v2481_v57 = vpack.c.bf16 %v2469_v56, %v2467_v21  ;;  %v2484_v53 = vpack.c.bf16 %v2474_v7, %v2472_v59  ;;  %v2473_v62 = vmax.f32 %v2459_v35, 0.0  ;;  %v2462_v22 = vadd.f32 %v2450_v23, %v2436_v55  ;;  %v2944_v59 = vld [vmem:[%s6814_s7 + $0x80] sm:$0xff]  ;;  %v2945_v35 = vld [vmem:[%s6814_s7 + $0x88] sm:$0xff] }
 0x264   :  { %3596 = vmatprep.mubr.msk.bf16.mxu1 %vm2307_vm3, %v2482_v11  ;;  %3600 = vmatprep.mubr.msk.bf16.mxu0 %vm2307_vm3, %v2482_v11  ;;  %v2464_v60 = vadd.f32 %v2450_v23, %v2438_v43  ;;  %v2437_v39 = vmul.f32 %v2420_v25, %v6023_v45  ;;  %v2461_v51 = vadd.f32 %v6088_v29, %v2435_v3 }
 0x265   :  { %2822 = vmatmul.mubr.bf16.vlgmr.msra.gmra.mxu1 %v2481_v57  ;;  %2892 = vmatmul.mubr.bf16.vlgmr.msra.gmra.mxu0 %v2481_v57  ;;  %v2483_v15 = vpack.c.bf16 %v2473_v62, %v2471_v28  ;;  %v2476_v26 = vmax.f32 %v2462_v22, 0.0  ;;  %v2466_v34 = vadd.f32 %v2450_v23, %v2440_v37  ;;  %v2952_v57 = vld [vmem:[%s6814_s7 + $0xc8] sm:$0x1] }
 0x266   :  { %3616 = vmatpush1.bf16.msra.mxu1 %v5700_v52  ;;  %3597 = vmatprep.mubr.msk.bf16.mxu1 %vm2307_vm3, %v2484_v53  ;;  %v2478_v17 = vmax.f32 %v2464_v60, 0.0  ;;  %v2463_v6 = vadd.f32 %v6088_v29, %v2437_v39  ;;  %v2475_v32 = vmax.f32 %v2461_v51, 0.0  ;;  %v2439_v52 = vmul.f32 %v2420_v25, %v6025_v38  ;;  %v2933_v38 = vld [vmem:[%s6814_s7 + $0x28] sm:$0xff] }
 0x267   :  { %3605 = vmatprep.subr.bf16.mxu1 %v5718_v0  ;;  %v2480_v61 = vmax.f32 %v2466_v34, 0.0  ;;  %v2949_v62 = vld [vmem:[%s6814_s7 + $0xa8] sm:$0xff] }
 0x268   :  { %v2486_v14 = vpack.c.bf16 %v2478_v17, %v2476_v26  ;;  %v2477_v24 = vmax.f32 %v2463_v6, 0.0  ;;  %v2465_v0 = vadd.f32 %v6088_v29, %v2439_v52  ;;  %v2934_v6 = vld [vmem:[%s6814_s7 + $0x30] sm:$0xff] }
 0x26a   :  { %3617 = vmatpush1.bf16.msra.mxu1 %v5723_v13  ;;  %v2485_v45 = vpack.c.bf16 %v2477_v24, %v2475_v32  ;;  %v2488_v13 = vpack.c.bf16 %v2480_v61, %v2480_v61  ;;  %v2931_v24 = vld [vmem:[%s6814_s7 + $0x10] sm:$0xff] }
 0x26b   :  { %3606 = vmatprep.subr.bf16.mxu1 %v5736_v46  ;;  %v2479_v46 = vmax.f32 %v2465_v0, 0.0  ;;  %v2938_v61 = vld [vmem:[%s6814_s7 + $0x50] sm:$0xff] }
 0x26d   :  { %2832 = vmatmul.mubr.bf16.gmra.mxu1 %v2483_v15 }
 0x26e   :  { %3618 = vmatpush1.bf16.msra.mxu1 %v5744_v41  ;;  %3598 = vmatprep.mubr.msk.bf16.mxu1 %vm2307_vm3, %v2486_v14  ;;  %v2487_v41 = vpack.c.bf16 %v2479_v46, %v2479_v46 }
 0x26f   :  { %3607 = vmatprep.subr.bf16.mxu1 %v5760_v63  ;;  %v7087_v63 = vld [vmem:[#allocation58_spill] sm:$0xff] }
 0x272   :  { %3619 = vmatpush1.bf16.msra.mxu1 %v5768_v31  ;;  %v3968_v31 = vmov 0.0  }
 0x273   :  { %3608 = vmatprep.subr.bf16.mxu1 %v5784_v54  ;;  %2981 = vst [vmem:[%s6813_s8] sm:$0xff] %v3968_v31  ;;  %2982 = vst [vmem:[%s6813_s8 + $0x8] sm:$0xff] %v3968_v31  ;;  %v2929_v54 = vld [vmem:[%s6814_s7] sm:$0xff] }
 0x274   :  { %2983 = vst [vmem:[%s6813_s8 + $0x10] sm:$0xff] %v3968_v31  ;;  %2984 = vst [vmem:[%s6813_s8 + $0x18] sm:$0xff] %v3968_v31 }
 0x275   :  { %2842 = vmatmul.mubr.bf16.gmra.mxu1 %v2485_v45  ;;  %2985 = vst [vmem:[%s6813_s8 + $0x20] sm:$0xff] %v3968_v31  ;;  %2986 = vst [vmem:[%s6813_s8 + $0x28] sm:$0xff] %v3968_v31 }
 0x276   :  { %3620 = vmatpush1.bf16.msra.mxu1 %v5792_v4  ;;  %3599 = vmatprep.mubr.msk.bf16.mxu1 %vm2307_vm3, %v2488_v13  ;;  %2987 = vst [vmem:[%s6813_s8 + $0x30] sm:$0x1] %v3968_v31 }
 0x277   :  { %3609 = vmatprep.subr.bf16.mxu1 %v5812_v18 }
 0x27a   :  { %3621 = vmatpush1.bf16.msra.mxu1 %v5819_v58  ;;  %v2930_v58 = vld [vmem:[%s6814_s7 + $0x8] sm:$0xff] }
 0x27b   :  { %3610 = vmatprep.subr.bf16.mxu1 %v5837_v19 }
 0x27d   :  { %2852 = vmatmul.mubr.bf16.gmra.mxu1 %v2487_v41 }
 0x27e   :  { %3622 = vmatpush1.bf16.msra.mxu1 %v5844_v33  ;;  %3601 = vmatprep.mubr.msk.bf16.mxu1 %vm2307_vm3, %v2484_v53  ;;  %v2948_v53 = vld [vmem:[%s6814_s7 + $0xa0] sm:$0xff] }
 0x27f   :  { %3611 = vmatprep.subr.bf16.mxu1 %v5865_v36 }
 0x282   :  { %3623 = vmatpush1.bf16.msra.mxu1 %v5870_v48 }
 0x283   :  { %3612 = vmatprep.subr.bf16.mxu1 %v5891_v8 }
 0x286   :  { %3624 = vmatpush2.bf16.msra.mxu1 %v5896_v27  ;;  %v2932_v27 = vld [vmem:[%s6814_s7 + $0x20] sm:$0xff] }
 0x287   :  { %3613 = vmatprep.subr.bf16.mxu1 %v5909_v5 }
 0x28a   :  { %3625 = vmatpush2.bf16.msra.mxu1 %v5914_v10 }
 0x28b   :  { %3614 = vmatprep.subr.bf16.mxu1 %v5927_v49 }
 0x28e   :  { %3626 = vmatpush2.bf16.msra.mxu1 %v5932_v44  ;;  %v2936_v44 = vld [vmem:[%s6814_s7 + $0x40] sm:$0xff] }
 0x28f   :  { %3615 = vmatprep.subr.bf16.mxu1 %v5950_v47 }
 0x292   :  { %3627 = vmatpush2.bf16.msra.mxu1 %v7087_v63 }
 0x295   :  { %2901 = vmatmul.mubr.bf16.vlgmr.msra.gmra.mxu1 %v2483_v15 }
 0x296   :  { %3602 = vmatprep.mubr.msk.bf16.mxu1 %vm2307_vm3, %v2486_v14 }
 0x29d   :  { %2911 = vmatmul.mubr.bf16.gmra.mxu1 %v2485_v45 }
 0x29e   :  { %3603 = vmatprep.mubr.msk.bf16.mxu1 %vm2307_vm3, %v2488_v13 }
 0x2a5   :  { %2921 = vmatmul.mubr.bf16.gmra.mxu1 %v2487_v41 }
 0x325   :  { %v2823_v4 = vpop.f32.mrf.mxu1  ;;  %v6166_v18 = vpop.f32.mrf.mxu0 }
 0x326   :  { %v6171_v19 = vmul.f32 %v2929_v54, %v2823_v4  ;;  %v6310_v0 = vmul.f32 %v2931_v24, %v6166_v18  ;;  %v2942_v4 = vld [vmem:[%s6814_s7 + $0x70] sm:$0xff] }
 0x327   :  { %v2825_v33 = vpop.f32.mrf.mxu1  ;;  %v2895_v36 = vpop.f32.mrf.mxu0 }
 0x328   :  { %v6173_v48 = vmul.f32 %v2930_v58, %v2825_v33  ;;  %3055 = vrot.lane.b32.xlu1 %v6171_v19, %s3969_s23  ;;  %v3195_v18 = vrot.slane %v6310_v0, 1  ;;  %v3323_v24 = vrot.slane %v6310_v0, 7 }
 0x329   :  { %v2827_v8 = vpop.f32.mrf.mxu1  ;;  %v2896_v17 = vpop.f32.mrf.mxu0 }
 0x32a   :  { %2995 = vrot.lane.b32.xlu0 %v6173_v48, %s3970_s2  ;;  %v6184_v49 = vmul.f32 %v2932_v27, %v2827_v8  ;;  %v6301_v45 = vmul.f32 %v2934_v6, %v2896_v17  ;;  %v3192_v52 = vrot.slane %v6173_v48, 1 }
 0x32b   :  { %v2829_v5 = vpop.f32.mrf.mxu1 }
 0x32c   :  { %3092 = vrot.lane.b32.xlu1 %v6171_v19, %s3971_s26  ;;  %v6200_v37 = vmul.f32 %v2933_v38, %v2829_v5  ;;  %v3196_v63 = vrot.slane %v6301_v45, 1  ;;  %v3324_v6 = vrot.slane %v6301_v45, 7 }
 0x32d   :  { %v2833_v10 = vpop.f32.mrf.mxu1 }
 0x32e   :  { %3094 = vrot.lane.b32.xlu0 %v6173_v48, %s3971_s26  ;;  %v6196_v29 = vmul.f32 %v2936_v44, %v2833_v10  ;;  %v3193_v14 = vrot.slane %v6200_v37, 1  ;;  %v3197_v5 = vsel %vm3191_vm5, %v3195_v18, %v3196_v63  ;;  %v2946_v10 = vld [vmem:[%s6814_s7 + $0x90] sm:$0xff] }
 0x32f   :  { %v2835_v47 = vpop.f32.mrf.mxu1 }
 0x330   :  { %3096 = vrot.lane.b32.xlu1 %v6184_v49, %s3971_s26  ;;  %v6221_v42 = vmul.f32 %v2937_v2, %v2835_v47  ;;  %v3194_v46 = vsel %vm3191_vm5, %v3192_v52, %v3193_v14 }
 0x331   :  { %v2837_v25 = vpop.f32.mrf.mxu1 }
 0x332   :  { %3057 = vrot.lane.b32.xlu0 %v6184_v49, %s3969_s23  ;;  %v6214_v50 = vmul.f32 %v2940_v40, %v2837_v25  ;;  %v3198_v41 = vrot.slane %v6221_v42, 1 }
 0x333   :  { %v2839_v23 = vpop.f32.mrf.mxu1 }
 0x334   :  { %3059 = vrot.lane.b32.xlu1 %v6196_v29, %s3969_s23  ;;  %v6225_v56 = vmul.f32 %v2941_v16, %v2839_v23  ;;  %v3199_v33 = vsel %vm3191_vm5, %v3193_v14, %v3198_v41 }
 0x335   :  { %v2843_v30 = vpop.f32.mrf.mxu1 }
 0x336   :  { %2997 = vrot.lane.b32.xlu0 %v6200_v37, %s3970_s2  ;;  %v6234_v11 = vmul.f32 %v2944_v59, %v2843_v30  ;;  %v3202_v36 = vrot.slane %v6225_v56, 1  ;;  %v2950_v30 = vld [vmem:[%s6814_s7 + $0xb0] sm:$0xff] }
 0x337   :  { %v2845_v12 = vpop.f32.mrf.mxu1 }
 0x338   :  { %3100 = vrot.lane.b32.xlu1 %v6196_v29, %s3971_s26  ;;  %v6243_v43 = vmul.f32 %v2945_v35, %v2845_v12  ;;  %v3203_v47 = vsel %vm3191_vm5, %v3198_v41, %v3202_v36 }
 0x339   :  { %v2847_v1 = vpop.f32.mrf.mxu1 }
 0x33a   :  { %3098 = vrot.lane.b32.xlu0 %v6200_v37, %s3971_s26  ;;  %v6259_v3 = vmul.f32 %v2948_v53, %v2847_v1  ;;  %v3206_v38 = vrot.slane %v6243_v43, 1 }
 0x33b   :  { %v2849_v20 = vpop.f32.mrf.mxu1 }
 0x33c   :  { %3104 = vrot.lane.b32.xlu1 %v6214_v50, %s3971_s26  ;;  %v6268_v22 = vmul.f32 %v2949_v62, %v2849_v20  ;;  %v3207_v40 = vsel %vm3191_vm5, %v3202_v36, %v3206_v38  ;;  %v2953_v20 = vld [vmem:[%s6814_s7 + $0xd0] sm:$0x1] }
 0x33d   :  { %v2853_v21 = vpop.f32.mrf.mxu1 }
 0x33e   :  { %2999 = vrot.lane.b32.xlu0 %v6221_v42, %s3970_s2  ;;  %v3210_v12 = vrot.slane %v6268_v22, 1 }
 0x33f   :  { %v2854_v7 = vpop.f32.mrf.mxu1 }
 0x340   :  { %3001 = vrot.lane.b32.xlu1 %v6225_v56, %s3970_s2  ;;  %v6255_v28 = vmul.f32 %v2952_v57, %v2854_v7  ;;  %v3211_v21 = vsel %vm3191_vm5, %v3206_v38, %v3210_v12 }
 0x341   :  { %v2856_v9 = vpop.f32.mrf.mxu1 }
 0x342   :  { %3102 = vrot.lane.b32.xlu0 %v6221_v42, %s3971_s26  ;;  %v3275_v9 = vrot.slane %v6301_v45, 6 }
 0x343   :  { %v2857_v55 = vpop.f32.mrf.mxu1 }
 0x344   :  { %3063 = vrot.lane.b32.xlu1 %v6234_v11, %s3969_s23  ;;  %v3274_v55 = vrot.slane %v6310_v0, 6 }
 0x346   :  { %3061 = vrot.lane.b32.xlu0 %v6214_v50, %s3969_s23 }
 0x348   :  { %3003 = vrot.lane.b32.xlu1 %v6243_v43, %s3970_s2 }
 0x34a   :  { %3106 = vrot.lane.b32.xlu0 %v6225_v56, %s3971_s26 }
 0x34c   :  { %3007 = vrot.lane.b32.xlu1 %v6255_v28, %s3970_s2 }
 0x34e   :  { %3065 = vrot.lane.b32.xlu0 %v6259_v3, %s3969_s23 }
 0x350   :  { %3108 = vrot.lane.b32.xlu1 %v6234_v11, %s3971_s26 }
 0x352   :  { %3005 = vrot.lane.b32.xlu0 %v6268_v22, %s3970_s2 }
 0x354   :  { %3112 = vrot.lane.b32.xlu1 %v6259_v3, %s3971_s26 }
 0x355   :  { %v2902_v60 = vpop.f32.mrf.mxu1 }
 0x356   :  { %3110 = vrot.lane.b32.xlu0 %v6243_v43, %s3971_s26  ;;  %v6318_v31 = vmul.f32 %v2938_v61, %v2902_v60 }
 0x357   :  { %v6278_v39 = vpop.f32.mrf.mxu1 }
 0x358   :  { %3148 = vrot.lane.b32.xlu1 %v6173_v48, %s3972_s20  ;;  %v3200_v48 = vrot.slane %v6318_v31, 1  ;;  %v3277_v62 = vrot.slane %v6318_v31, 6  ;;  %v3326_v41 = vrot.slane %v6318_v31, 7 }
 0x359   :  { %v2906_v51 = vpop.f32.mrf.mxu1 }
 0x35a   :  { %3114 = vrot.lane.b32.xlu0 %v6268_v22, %s3971_s26  ;;  %v6332_v8 = vmul.f32 %v2942_v4, %v2906_v51  ;;  %v3278_v17 = vsel %vm3273_vm6, %v3275_v9, %v3277_v62  ;;  %v3327_v4 = vsel %vm105_vm0, %v3324_v6, %v3326_v41 }
 0x35b   :  { %v6284_v15 = vpop.f32.mrf.mxu1 }
 0x35c   :  { %3152 = vrot.lane.b32.xlu1 %v6221_v42, %s3972_s20  ;;  %v3204_v25 = vrot.slane %v6332_v8, 1  ;;  %v3214_v42 = vrot.slane %v6255_v28, 1  ;;  %v3279_v53 = vrot.slane %v6332_v8, 6  ;;  %v3276_v28 = vsel %vm3273_vm6, %v3274_v55, %v3275_v9 }
 0x35d   :  { %v2912_v26 = vpop.f32.mrf.mxu1  ;;  %v3328_v61 = vrot.slane %v6332_v8, 7 }
 0x35e   :  { %3150 = vrot.lane.b32.xlu0 %v6200_v37, %s3972_s20  ;;  %v6343_v23 = vmul.f32 %v2946_v10, %v2912_v26  ;;  %v3201_v37 = vsel %vm3191_vm5, %v3196_v63, %v3200_v48  ;;  %v3205_v16 = vsel %vm3191_vm5, %v3200_v48, %v3204_v25  ;;  %v3215_v35 = vsel %vm3191_vm5, %v3210_v12, %v3214_v42 }
 0x35f   :  { %v6293_v32 = vpop.f32.mrf.mxu1  ;;  %v3280_v51 = vsel %vm3273_vm6, %v3277_v62, %v3279_v53 }
 0x360   :  { %3156 = vrot.lane.b32.xlu1 %v6243_v43, %s3972_s20  ;;  %v3208_v2 = vrot.slane %v6343_v23, 1  ;;  %v3281_v26 = vrot.slane %v6343_v23, 6  ;;  %v3330_v0 = vrot.slane %v6343_v23, 7 }
 0x361   :  { %v2916_v34 = vpop.f32.mrf.mxu1 }
 0x362   :  { %3154 = vrot.lane.b32.xlu0 %v6225_v56, %s3972_s20  ;;  %v2976_v1 = vmul.f32 %v2950_v30, %v2916_v34  ;;  %v3209_v7 = vsel %vm3191_vm5, %v3204_v25, %v3208_v2  ;;  %v3282_v52 = vsel %vm3273_vm6, %v3279_v53, %v3281_v26  ;;  %v3331_v36 = vsel %vm105_vm0, %v3328_v61, %v3330_v0 }
 0x363   :  { %v6312_v13 = vpop.f32.mrf.mxu1 }
 0x364   :  { %3218 = vrot.lane.b32.xlu1 %v3194_v46, %s3973_s25  ;;  %v3212_v56 = vrot.slane %v2976_v1, 1  ;;  %v3283_v60 = vrot.slane %v2976_v1, 6  ;;  %v3325_v46 = vsel %vm105_vm0, %v3323_v24, %v3324_v6  ;;  %v3332_v45 = vrot.slane %v2976_v1, 7 }
 0x365   :  { %v2922_v54 = vpop.f32.mrf.mxu1 }
 0x366   :  { %3158 = vrot.lane.b32.xlu0 %v6268_v22, %s3972_s20  ;;  %v2979_v59 = vmul.f32 %v2953_v20, %v2922_v54  ;;  %v3213_v57 = vsel %vm3191_vm5, %v3208_v2, %v3212_v56  ;;  %v3284_v14 = vsel %vm3273_vm6, %v3281_v26, %v3283_v60  ;;  %v3329_v54 = vsel %vm105_vm0, %v3326_v41, %v3328_v61 }
 0x367   :  { %v6326_v58 = vpop.f32.mrf.mxu1  ;;  %v3333_v18 = vsel %vm105_vm0, %v3330_v0, %v3332_v45 }
 0x368   :  { %3222 = vrot.lane.b32.xlu1 %v3199_v33, %s3973_s25  ;;  %v3216_v43 = vrot.slane %v2979_v59, 1  ;;  %v3285_v34 = vrot.slane %v2979_v59, 6  ;;  %v3334_v33 = vrot.slane %v2979_v59, 7 }
 0x369   :  { %v2926_v27 = vpop.f32.mrf.mxu1 }
 0x36a   :  { %3220 = vrot.lane.b32.xlu0 %v3197_v5, %s3973_s25  ;;  %v3217_v22 = vsel %vm3191_vm5, %v3212_v56, %v3216_v43  ;;  %v3286_v63 = vsel %vm3273_vm6, %v3283_v60, %v3285_v34  ;;  %v3335_v31 = vsel %vm105_vm0, %v3332_v45, %v3334_v33 }
 0x36b   :  { %v2927_v44 = vpop.f32.mrf.mxu1 }
 0x36c   :  { %3226 = vrot.lane.b32.xlu1 %v3203_v47, %s3973_s25 }
 0x36e   :  { %3224 = vrot.lane.b32.xlu0 %v3201_v37, %s3973_s25 }
 0x370   :  { %3230 = vrot.lane.b32.xlu1 %v3207_v40, %s3973_s25 }
 0x372   :  { %3228 = vrot.lane.b32.xlu0 %v3205_v16, %s3973_s25 }
 0x374   :  { %3234 = vrot.lane.b32.xlu1 %v3211_v21, %s3973_s25 }
 0x376   :  { %3232 = vrot.lane.b32.xlu0 %v3209_v7, %s3973_s25 }
 0x378   :  { %3238 = vrot.lane.b32.xlu1 %v3215_v35, %s3973_s25 }
 0x37a   :  { %3236 = vrot.lane.b32.xlu0 %v3213_v57, %s3973_s25 }
 0x37c   :  { %3287 = vrot.lane.b32.xlu1 %v3276_v28, %s3974_s5 }
 0x37e   :  { %3240 = vrot.lane.b32.xlu0 %v3217_v22, %s3973_s25 }
 0x380   :  { %3291 = vrot.lane.b32.xlu1 %v3280_v51, %s3974_s5 }
 0x382   :  { %3289 = vrot.lane.b32.xlu0 %v3278_v17, %s3974_s5 }
 0x384   :  { %3295 = vrot.lane.b32.xlu1 %v3284_v14, %s3974_s5 }
 0x386   :  { %3293 = vrot.lane.b32.xlu0 %v3282_v52, %s3974_s5 }
 0x388   :  { %3336 = vrot.lane.b32.xlu1 %v3325_v46, %s3975_s10 }
 0x38a   :  { %3297 = vrot.lane.b32.xlu0 %v3286_v63, %s3974_s5 }
 0x38c   :  { %3340 = vrot.lane.b32.xlu1 %v3329_v54, %s3975_s10 }
 0x38e   :  { %3338 = vrot.lane.b32.xlu0 %v3327_v4, %s3975_s10 }
 0x390   :  { %3344 = vrot.lane.b32.xlu1 %v3333_v18, %s3975_s10 }
 0x392   :  { %3342 = vrot.lane.b32.xlu0 %v3331_v36, %s3975_s10 }
 0x396   :  { %3346 = vrot.lane.b32.xlu0 %v3335_v31, %s3975_s10 }
 0x39a   :  { %v3056_v48 = vpop.permute.xlu1 %3055 }
 0x39c   :  { %v2996_v8 = vpop.permute.xlu0 %2995 }
 0x39d   :  { %3017 = vst.msk [vmem:[%s6813_s8] sm:$0xff] %vm3016_vm7, %v2996_v8 }
 0x39e   :  { %v3093_v27 = vpop.permute.xlu1 %3092 }
 0x3a0   :  { %v3095_v5 = vpop.permute.xlu0 %3094 }
 0x3a1   :  { %v3117_v62 = vsel %vm3116_vm9, %v3093_v27, %v3095_v5 }
 0x3a2   :  { %v3097_v10 = vpop.permute.xlu1 %3096 }
 0x3a4   :  { %v3058_v44 = vpop.permute.xlu0 %3057 }
 0x3a6   :  { %v3060_v47 = vpop.permute.xlu1 %3059 }
 0x3a8   :  { %v2998_v38 = vpop.permute.xlu0 %2997 }
 0x3a9   :  { %3018 = vst.msk [vmem:[%s6813_s8 + $0x8] sm:$0xff] %vm3016_vm7, %v2998_v38 }
 0x3aa   :  { %v3101_v25 = vpop.permute.xlu1 %3100 }
 0x3ac   :  { %v3099_v23 = vpop.permute.xlu0 %3098 }
 0x3ad   :  { %v3118_v52 = vsel %vm3116_vm9, %v3097_v10, %v3099_v23 }
 0x3ae   :  { %v6400_v37 = vpop.permute.xlu1 %3104 }
 0x3b0   :  { %v3025_v30 = vld [vmem:[%s6813_s8 + $0x8] sm:$0xff]  ;;  %v3000_v40 = vpop.permute.xlu0 %2999 }
 0x3b1   :  { %v3031_v12 = vadd.f32 %v3025_v30, %v6171_v19  ;;  %3019 = vst.msk [vmem:[%s6813_s8 + $0x10] sm:$0xff] %vm3016_vm7, %v3000_v40 }
 0x3b2   :  { %v3002_v2 = vpop.permute.xlu1 %3001 }
 0x3b3   :  { %3037 = vst.msk [vmem:[%s6813_s8 + $0x8] sm:$0xff] %vm3016_vm7, %v3031_v12  ;;  %3020 = vst.msk [vmem:[%s6813_s8 + $0x18] sm:$0xff] %vm3016_vm7, %v3002_v2 }
 0x3b4   :  { %v3103_v1 = vpop.permute.xlu0 %3102 }
 0x3b5   :  { %v3119_v4 = vsel %vm3116_vm9, %v3101_v25, %v3103_v1 }
 0x3b6   :  { %v6418_v16 = vpop.permute.xlu1 %3063 }
 0x3b8   :  { %v3026_v19 = vld [vmem:[%s6813_s8 + $0x10] sm:$0xff]  ;;  %v3062_v20 = vpop.permute.xlu0 %3061 }
 0x3b9   :  { %v3032_v42 = vadd.f32 %v3026_v19, %v6184_v49 }
 0x3ba   :  { %v3043_v21 = vld [vmem:[%s6813_s8 + $0x7] sm:$0xff]  ;;  %v3027_v56 = vld [vmem:[%s6813_s8 + $0x18] sm:$0xff]  ;;  %v3004_v59 = vpop.permute.xlu1 %3003 }
 0x3bb   :  { %v3073_v7 = vadd.f32 %v3056_v48, %v3043_v21  ;;  %3038 = vst.msk [vmem:[%s6813_s8 + $0x10] sm:$0xff] %vm3016_vm7, %v3032_v42  ;;  %v3033_v9 = vadd.f32 %v3027_v56, %v6196_v29  ;;  %3021 = vst.msk [vmem:[%s6813_s8 + $0x20] sm:$0xff] %vm3016_vm7, %v3004_v59 }
 0x3bc   :  { %v3107_v49 = vpop.permute.xlu0 %3106 }
 0x3bd   :  { %3079 = vst.msk [vmem:[%s6813_s8 + $0x7] sm:$0xff] %vm3016_vm7, %v3073_v7  ;;  %3039 = vst.msk [vmem:[%s6813_s8 + $0x18] sm:$0xff] %vm3016_vm7, %v3033_v9  ;;  %v3120_v5 = vsel %vm3116_vm9, %v6400_v37, %v3107_v49 }
 0x3be   :  { %v3008_v35 = vpop.permute.xlu1 %3007 }
 0x3bf   :  { %3024 = vst.msk [vmem:[%s6813_s8 + $0x30] sm:$0x1] %vm3023_vm8, %v3008_v35 }
 0x3c0   :  { %v3066_v29 = vpop.permute.xlu0 %3065 }
 0x3c2   :  { %v3044_v55 = vld [vmem:[%s6813_s8 + $0xf] sm:$0xff]  ;;  %v3028_v43 = vld [vmem:[%s6813_s8 + $0x20] sm:$0xff]  ;;  %v6457_v57 = vpop.permute.xlu1 %3108 }
 0x3c3   :  { %v3074_v53 = vadd.f32 %v3058_v44, %v3044_v55  ;;  %v3034_v28 = vadd.f32 %v3028_v43, %v6214_v50 }
 0x3c4   :  { %v3045_v22 = vld [vmem:[%s6813_s8 + $0x17] sm:$0xff]  ;;  %v3006_v60 = vpop.permute.xlu0 %3005  ;;  %v3086_v51 = vld [vmem:[%s6813_s8 + $0x6] sm:$0xff] }
 0x3c5   :  { %3080 = vst.msk [vmem:[%s6813_s8 + $0xf] sm:$0xff] %vm3016_vm7, %v3074_v53  ;;  %v3075_v26 = vadd.f32 %v3060_v47, %v3045_v22  ;;  %3040 = vst.msk [vmem:[%s6813_s8 + $0x20] sm:$0xff] %vm3016_vm7, %v3034_v28  ;;  %v3129_v50 = vadd.f32 %v3117_v62, %v3086_v51 }
 0x3c6   :  { %3022 = vst.msk [vmem:[%s6813_s8 + $0x28] sm:$0xff] %vm3016_vm7, %v3006_v60  ;;  %v3030_v17 = vld [vmem:[%s6813_s8 + $0x30] sm:$0x1]  ;;  %v3113_v6 = vpop.permute.xlu1 %3112 }
 0x3c7   :  { %3081 = vst.msk [vmem:[%s6813_s8 + $0x17] sm:$0xff] %vm3016_vm7, %v3075_v26  ;;  %v3036_v14 = vadd.f32 %v3030_v17, %v6259_v3  ;;  %3135 = vst.msk [vmem:[%s6813_s8 + $0x6] sm:$0xff] %vm3016_vm7, %v3129_v50 }
 0x3c8   :  { %v3111_v24 = vpop.permute.xlu0 %3110 }
 0x3c9   :  { %3042 = vst.msk [vmem:[%s6813_s8 + $0x30] sm:$0x1] %vm3023_vm8, %v3036_v14  ;;  %v3121_v59 = vsel %vm3116_vm9, %v6457_v57, %v3111_v24 }
 0x3ca   :  { %v3149_v34 = vpop.permute.xlu1 %3148 }
 0x3cc   :  { %v3046_v61 = vld [vmem:[%s6813_s8 + $0x1f] sm:$0xff]  ;;  %v3115_v46 = vpop.permute.xlu0 %3114  ;;  %v3087_v41 = vld [vmem:[%s6813_s8 + $0xe] sm:$0xff] }
 0x3cd   :  { %v3029_v3 = vld [vmem:[%s6813_s8 + $0x28] sm:$0xff]  ;;  %v3076_v63 = vadd.f32 %v3062_v20, %v3046_v61  ;;  %v3130_v54 = vadd.f32 %v3118_v52, %v3087_v41  ;;  %v3122_v9 = vsel %vm3116_vm9, %v3113_v6, %v3115_v46 }
 0x3ce   :  { %v3035_v45 = vadd.f32 %v3029_v3, %v6234_v11  ;;  %v3088_v0 = vld [vmem:[%s6813_s8 + $0x16] sm:$0xff]  ;;  %v3142_v18 = vld [vmem:[%s6813_s8 + $0x1] sm:$0xff]  ;;  %v3153_v33 = vpop.permute.xlu1 %3152 }
 0x3cf   :  { %v3131_v36 = vadd.f32 %v3119_v4, %v3088_v0  ;;  %3082 = vst.msk [vmem:[%s6813_s8 + $0x1f] sm:$0xff] %vm3016_vm7, %v3076_v63  ;;  %v3166_v11 = vadd.f32 %v3149_v34, %v3142_v18  ;;  %3136 = vst.msk [vmem:[%s6813_s8 + $0xe] sm:$0xff] %vm3016_vm7, %v3130_v54 }
 0x3d0   :  { %3041 = vst.msk [vmem:[%s6813_s8 + $0x28] sm:$0xff] %vm3016_vm7, %v3035_v45  ;;  %v3151_v31 = vpop.permute.xlu0 %3150 }
 0x3d1   :  { %3137 = vst.msk [vmem:[%s6813_s8 + $0x16] sm:$0xff] %vm3016_vm7, %v3131_v36  ;;  %3172 = vst.msk [vmem:[%s6813_s8 + $0x1] sm:$0xff] %vm3016_vm7, %v3166_v11 }
 0x3d2   :  { %v3157_v48 = vpop.permute.xlu1 %3156 }
 0x3d4   :  { %v3155_v8 = vpop.permute.xlu0 %3154 }
 0x3d6   :  { %v3089_v27 = vld [vmem:[%s6813_s8 + $0x1e] sm:$0xff]  ;;  %v3219_v47 = vpop.permute.xlu1 %3218  ;;  %v3143_v30 = vld [vmem:[%s6813_s8 + $0x9] sm:$0xff] }
 0x3d7   :  { %v3047_v10 = vld [vmem:[%s6813_s8 + $0x27] sm:$0xff]  ;;  %v3048_v44 = vld [vmem:[%s6813_s8 + $0x2f] sm:$0x3]  ;;  %v3132_v38 = vadd.f32 %v3120_v5, %v3089_v27  ;;  %v3167_v40 = vadd.f32 %v3151_v31, %v3143_v30 }
 0x3d8   :  { %v3077_v25 = vadd.f32 %v6418_v16, %v3047_v10  ;;  %v3078_v23 = vadd.f32 %v3066_v29, %v3048_v44  ;;  %v3144_v37 = vld [vmem:[%s6813_s8 + $0x11] sm:$0xff]  ;;  %v3159_v12 = vpop.permute.xlu0 %3158  ;;  %v3178_v19 = vld [vmem:[%s6813_s8] sm:$0xff] }
 0x3d9   :  { %3138 = vst.msk [vmem:[%s6813_s8 + $0x1e] sm:$0xff] %vm3016_vm7, %v3132_v38  ;;  %v3168_v2 = vadd.f32 %v3153_v33, %v3144_v37  ;;  %3173 = vst.msk [vmem:[%s6813_s8 + $0x9] sm:$0xff] %vm3016_vm7, %v3167_v40 }
 0x3da   :  { %3083 = vst.msk [vmem:[%s6813_s8 + $0x27] sm:$0xff] %vm3016_vm7, %v3077_v25  ;;  %v3223_v1 = vpop.permute.xlu1 %3222 }
 0x3db   :  { %3085 = vst.msk [vmem:[%s6813_s8 + $0x2f] sm:$0x3] %vm3084_vm10, %v3078_v23 }
 0x3dc   :  { %3174 = vst.msk [vmem:[%s6813_s8 + $0x11] sm:$0xff] %vm3016_vm7, %v3168_v2  ;;  %v3221_v16 = vpop.permute.xlu0 %3220 }
 0x3dd   :  { %v3243_v20 = vsel %vm3242_vm11, %v3219_v47, %v3221_v16 }
 0x3de   :  { %v3255_v42 = vadd.f32 %v3243_v20, %v3178_v19  ;;  %v3227_v21 = vpop.permute.xlu1 %3226 }
 0x3e0   :  { %v3145_v49 = vld [vmem:[%s6813_s8 + $0x19] sm:$0xff]  ;;  %3261 = vst.msk [vmem:[%s6813_s8] sm:$0xff] %vm3016_vm7, %v3255_v42  ;;  %v3225_v35 = vpop.permute.xlu0 %3224  ;;  %v3179_v57 = vld [vmem:[%s6813_s8 + $0x8] sm:$0xff] }
 0x3e1   :  { %v3090_v56 = vld [vmem:[%s6813_s8 + $0x26] sm:$0xff]  ;;  %v3169_v43 = vadd.f32 %v3155_v8, %v3145_v49  ;;  %v3244_v53 = vsel %vm3242_vm11, %v3223_v1, %v3225_v35 }
 0x3e2   :  { %v3091_v7 = vld [vmem:[%s6813_s8 + $0x2e] sm:$0x7]  ;;  %v3133_v29 = vadd.f32 %v3121_v59, %v3090_v56  ;;  %v3256_v28 = vadd.f32 %v3244_v53, %v3179_v57  ;;  %v3231_v62 = vpop.permute.xlu1 %3230  ;;  %v2898_v56 = vpop.f32.mrf.mxu0  ;;  %v2935_v59 = vld [vmem:[%s6814_s7 + $0x38] sm:$0xff] }
 0x3e3   :  { %v3134_v55 = vadd.f32 %v3122_v9, %v3091_v7  ;;  %3175 = vst.msk [vmem:[%s6813_s8 + $0x19] sm:$0xff] %vm3016_vm7, %v3169_v43  ;;  %v3180_v60 = vld [vmem:[%s6813_s8 + $0x10] sm:$0xff]  ;;  %v2961_v35 = vmul.f32 %v2935_v59, %v2898_v56 }
 0x3e4   :  { %3139 = vst.msk [vmem:[%s6813_s8 + $0x26] sm:$0xff] %vm3016_vm7, %v3133_v29  ;;  %3262 = vst.msk [vmem:[%s6813_s8 + $0x8] sm:$0xff] %vm3016_vm7, %v3256_v28  ;;  %v3229_v22 = vpop.permute.xlu0 %3228  ;;  %v2943_v29 = vld [vmem:[%s6814_s7 + $0x78] sm:$0xff] }
 0x3e5   :  { %3141 = vst.msk [vmem:[%s6813_s8 + $0x2e] sm:$0x7] %vm3140_vm12, %v3134_v55  ;;  %v3245_v51 = vsel %vm3242_vm11, %v3227_v21, %v3229_v22  ;;  %v2969_v22 = vmul.f32 %v2943_v29, %v6284_v15 }
 0x3e6   :  { %v3257_v26 = vadd.f32 %v3245_v51, %v3180_v60  ;;  %v3235_v50 = vpop.permute.xlu1 %3234 }
 0x3e7   :  { %v3267_v63 = vld [vmem:[%s6813_s8] sm:$0xff] }
 0x3e8   :  { %3263 = vst.msk [vmem:[%s6813_s8 + $0x10] sm:$0xff] %vm3016_vm7, %v3257_v26  ;;  %v3233_v17 = vpop.permute.xlu0 %3232 }
 0x3e9   :  { %v3246_v6 = vsel %vm3242_vm11, %v3231_v62, %v3233_v17  ;;  %v2939_v62 = vld [vmem:[%s6814_s7 + $0x58] sm:$0xff] }
 0x3ea   :  { %v3181_v34 = vld [vmem:[%s6813_s8 + $0x18] sm:$0xff]  ;;  %v3239_v52 = vpop.permute.xlu1 %3238  ;;  %v2965_v17 = vmul.f32 %v2939_v62, %v6278_v39 }
 0x3eb   :  { %v3146_v14 = vld [vmem:[%s6813_s8 + $0x21] sm:$0xff]  ;;  %v3258_v46 = vadd.f32 %v3246_v6, %v3181_v34  ;;  %v2947_v34 = vld [vmem:[%s6814_s7 + $0x98] sm:$0xff] }
 0x3ec   :  { %v3147_v24 = vld [vmem:[%s6813_s8 + $0x29] sm:$0xff]  ;;  %v3170_v61 = vadd.f32 %v3157_v48, %v3146_v14  ;;  %v3237_v41 = vpop.permute.xlu0 %3236  ;;  %v2973_v39 = vmul.f32 %v2947_v34, %v6293_v32 }
 0x3ed   :  { %v3171_v3 = vadd.f32 %v3159_v12, %v3147_v24  ;;  %3264 = vst.msk [vmem:[%s6813_s8 + $0x18] sm:$0xff] %vm3016_vm7, %v3258_v46  ;;  %v3247_v11 = vsel %vm3242_vm11, %v3235_v50, %v3237_v41  ;;  %v3268_v8 = vld [vmem:[%s6813_s8 + $0x8] sm:$0xff]  ;;  %v2954_v46 = vld [vmem:[%s6814_s7 + $0xd8] sm:$0x1] }
 0x3ee   :  { %3176 = vst.msk [vmem:[%s6813_s8 + $0x21] sm:$0xff] %vm3016_vm7, %v3170_v61  ;;  %v3288_v45 = vpop.permute.xlu1 %3287 }
 0x3ef   :  { %3177 = vst.msk [vmem:[%s6813_s8 + $0x29] sm:$0xff] %vm3016_vm7, %v3171_v3  ;;  %v3305_v54 = vadd.f32 %v3288_v45, %v3267_v63  ;;  %v3269_v18 = vld [vmem:[%s6813_s8 + $0x10] sm:$0xff]  ;;  %v2951_v3 = vld [vmem:[%s6814_s7 + $0xb8] sm:$0xff]  ;;  %v2980_v45 = vmul.f32 %v2954_v46, %v6326_v58 }
 0x3f0   :  { %v3241_v0 = vpop.permute.xlu0 %3240  ;;  %v2977_v32 = vmul.f32 %v2951_v3, %v6312_v13 }
 0x3f1   :  { %3311 = vst.msk [vmem:[%s6813_s8] sm:$0xff] %vm3016_vm7, %v3305_v54  ;;  %v3248_v48 = vsel %vm3242_vm11, %v3239_v52, %v3241_v0 }
 0x3f2   :  { %v3292_v4 = vpop.permute.xlu1 %3291 }
 0x3f3   :  { %v3307_v33 = vadd.f32 %v3292_v4, %v3269_v18 }
 0x3f4   :  { %v3290_v27 = vpop.permute.xlu0 %3289  ;;  %v3270_v38 = vld [vmem:[%s6813_s8 + $0x18] sm:$0xff] }
 0x3f5   :  { %v3182_v36 = vld [vmem:[%s6813_s8 + $0x20] sm:$0xff]  ;;  %3313 = vst.msk [vmem:[%s6813_s8 + $0x10] sm:$0xff] %vm3016_vm7, %v3307_v33  ;;  %v3306_v44 = vadd.f32 %v3290_v27, %v3268_v8 }
 0x3f6   :  { %v3183_v31 = vld [vmem:[%s6813_s8 + $0x28] sm:$0xff]  ;;  %v3259_v5 = vadd.f32 %v3247_v11, %v3182_v36  ;;  %v3296_v47 = vpop.permute.xlu1 %3295 }
 0x3f7   :  { %v3260_v10 = vadd.f32 %v3248_v48, %v3183_v31  ;;  %3312 = vst.msk [vmem:[%s6813_s8 + $0x8] sm:$0xff] %vm3016_vm7, %v3306_v44 }
 0x3f8   :  { %3265 = vst.msk [vmem:[%s6813_s8 + $0x20] sm:$0xff] %vm3016_vm7, %v3259_v5  ;;  %v3294_v25 = vpop.permute.xlu0 %3293  ;;  %v3317_v30 = vld [vmem:[%s6813_s8] sm:$0xff] }
 0x3f9   :  { %3266 = vst.msk [vmem:[%s6813_s8 + $0x28] sm:$0xff] %vm3016_vm7, %v3260_v10  ;;  %v3308_v23 = vadd.f32 %v3294_v25, %v3270_v38 }
 0x3fa   :  { %v3337_v37 = vpop.permute.xlu1 %3336 }
 0x3fb   :  { %3314 = vst.msk [vmem:[%s6813_s8 + $0x18] sm:$0xff] %vm3016_vm7, %v3308_v23  ;;  %v3354_v40 = vadd.f32 %v3337_v37, %v3317_v30 }
 0x3fc   :  { %v3298_v12 = vpop.permute.xlu0 %3297  ;;  %v3319_v16 = vld [vmem:[%s6813_s8 + $0x10] sm:$0xff] }
 0x3fd   :  { %3360 = vst.msk [vmem:[%s6813_s8] sm:$0xff] %vm3016_vm7, %v3354_v40 }
 0x3fe   :  { %v3341_v19 = vpop.permute.xlu1 %3340  ;;  %v3318_v7 = vld [vmem:[%s6813_s8 + $0x8] sm:$0xff] }
 0x3ff   :  { %v3271_v2 = vld [vmem:[%s6813_s8 + $0x20] sm:$0xff]  ;;  %v3356_v21 = vadd.f32 %v3341_v19, %v3319_v16 }
 0x400   :  { %v3272_v1 = vld [vmem:[%s6813_s8 + $0x28] sm:$0x7]  ;;  %v3309_v20 = vadd.f32 %v3296_v47, %v3271_v2  ;;  %v3339_v9 = vpop.permute.xlu0 %3338 }
 0x401   :  { %v3310_v42 = vadd.f32 %v3298_v12, %v3272_v1  ;;  %3362 = vst.msk [vmem:[%s6813_s8 + $0x10] sm:$0xff] %vm3016_vm7, %v3356_v21  ;;  %v3355_v49 = vadd.f32 %v3339_v9, %v3318_v7 }
 0x402   :  { %3315 = vst.msk [vmem:[%s6813_s8 + $0x20] sm:$0xff] %vm3016_vm7, %v3309_v20  ;;  %v3320_v43 = vld [vmem:[%s6813_s8 + $0x18] sm:$0xff]  ;;  %v3345_v51 = vpop.permute.xlu1 %3344 }
 0x403   :  { %3316 = vst.msk [vmem:[%s6813_s8 + $0x28] sm:$0x7] %vm3140_vm12, %v3310_v42 }
 0x404   :  { %3361 = vst.msk [vmem:[%s6813_s8 + $0x8] sm:$0xff] %vm3016_vm7, %v3355_v49  ;;  %v3366_v55 = vld [vmem:[%s6813_s8] sm:$0xff]  ;;  %v3343_v57 = vpop.permute.xlu0 %3342 }
 0x405   :  { %v3372_v53 = vadd.f32 %v3366_v55, %v2961_v35  ;;  %v3357_v28 = vadd.f32 %v3343_v57, %v3320_v43 }
 0x407   :  { %3378 = vst.msk [vmem:[%s6813_s8] sm:$0xff] %vm3016_vm7, %v3372_v53  ;;  %3363 = vst.msk [vmem:[%s6813_s8 + $0x18] sm:$0xff] %vm3016_vm7, %v3357_v28 }
 0x408   :  { %v3368_v60 = vld [vmem:[%s6813_s8 + $0x10] sm:$0xff]  ;;  %v3347_v50 = vpop.permute.xlu0 %3346 }
 0x409   :  { %v3321_v26 = vld [vmem:[%s6813_s8 + $0x20] sm:$0xff]  ;;  %v3374_v6 = vadd.f32 %v3368_v60, %v2969_v22 }
 0x40a   :  { %v3322_v15 = vld [vmem:[%s6813_s8 + $0x28] sm:$0x3]  ;;  %v3358_v14 = vadd.f32 %v3345_v51, %v3321_v26 }
 0x40b   :  { %v3359_v24 = vadd.f32 %v3347_v50, %v3322_v15  ;;  %v3367_v52 = vld [vmem:[%s6813_s8 + $0x8] sm:$0xff]  ;;  %3380 = vst.msk [vmem:[%s6813_s8 + $0x10] sm:$0xff] %vm3016_vm7, %v3374_v6 }
 0x40c   :  { %v3373_v61 = vadd.f32 %v3367_v52, %v2965_v17  ;;  %3364 = vst.msk [vmem:[%s6813_s8 + $0x20] sm:$0xff] %vm3016_vm7, %v3358_v14 }
 0x40d   :  { %3365 = vst.msk [vmem:[%s6813_s8 + $0x28] sm:$0x3] %vm3084_vm10, %v3359_v24 }
 0x40e   :  { %3379 = vst.msk [vmem:[%s6813_s8 + $0x8] sm:$0xff] %vm3016_vm7, %v3373_v61  ;;  %v3369_v41 = vld [vmem:[%s6813_s8 + $0x18] sm:$0xff] }
 0x40f   :  { %v3375_v63 = vadd.f32 %v3369_v41, %v2973_v39 }
 0x411   :  { %3381 = vst.msk [vmem:[%s6813_s8 + $0x18] sm:$0xff] %vm3016_vm7, %v3375_v63 }
 0x413   :  { %v3370_v54 = vld [vmem:[%s6813_s8 + $0x20] sm:$0xff] }
 0x414   :  { %v3371_v0 = vld [vmem:[%s6813_s8 + $0x28] sm:$0x1]  ;;  %v3376_v4 = vadd.f32 %v3370_v54, %v2977_v32 }
 0x415   :  { %v3377_v18 = vadd.f32 %v3371_v0, %v2980_v45 }
 0x416   :  { %3382 = vst.msk [vmem:[%s6813_s8 + $0x20] sm:$0xff] %vm3016_vm7, %v3376_v4 }
 0x417   :  { %3383 = vst.msk [vmem:[%s6813_s8 + $0x28] sm:$0x1] %vm3023_vm8, %v3377_v18 }

</bundles_post_ra>
